<compile_context>
chip_gen: v7x
topology: tpu7x:2x2x1
jax: 0.10.0
libtpu: 0.0.40
codegen_flags: <defaults>
</compile_context>

<pallas_src>
import functools
import math

import jax
import jax.numpy as jnp
from jax.experimental import pallas as pl
from jax.experimental.pallas import tpu as pltpu


# ----------------------------------------------------------------------------
# helpers
# ----------------------------------------------------------------------------
def _round_up(x, m):
    return ((x + m - 1) // m) * m


def _pad2(a, rows, cols):
    return jnp.pad(a, ((0, rows - a.shape[0]), (0, cols - a.shape[1])))


# ----------------------------------------------------------------------------
# Tiled matmul kernel (bias / relu / optional residual fused into the epilogue)
# ----------------------------------------------------------------------------
def _matmul_kernel(x_ref, w_ref, b_ref, o_ref, acc_ref, *, act):
    @pl.when(pl.program_id(2) == 0)
    def _init():
        acc_ref[...] = jnp.zeros_like(acc_ref)

    acc_ref[...] += jnp.dot(x_ref[...], w_ref[...],
                            preferred_element_type=jnp.float32)

    @pl.when(pl.program_id(2) == pl.num_programs(2) - 1)
    def _epilogue():
        y = acc_ref[...] + b_ref[...]
        if act == "relu":
            y = jnp.maximum(y, 0.0)
        o_ref[...] = y


def _matmul_res_kernel(x_ref, w_ref, b_ref, r_ref, o_ref, acc_ref, *, act):
    @pl.when(pl.program_id(2) == 0)
    def _init():
        acc_ref[...] = jnp.zeros_like(acc_ref)

    acc_ref[...] += jnp.dot(x_ref[...], w_ref[...],
                            preferred_element_type=jnp.float32)

    @pl.when(pl.program_id(2) == pl.num_programs(2) - 1)
    def _epilogue():
        y = acc_ref[...] + b_ref[...]
        if act == "relu":
            y = jnp.maximum(y, 0.0)
        o_ref[...] = r_ref[...] + y


def matmul_pallas(x, w, b, act="none", residual=None, tm=512, tn=256, tk=512):
    """y = [residual +] act(x @ w + b).

    bf16 operands / fp32 accumulation, tiled grid with a VMEM accumulator.
    N is padded to a multiple of 128 so stores are lane-dense; the wrapper
    slices the padding back off.
    """
    M, K = x.shape
    N = w.shape[1]
    tm = min(tm, _round_up(M, 8))
    tk = min(tk, _round_up(K, 8))
    tn = min(tn, _round_up(N, 128))
    Mp, Kp, Np = _round_up(M, tm), _round_up(K, tk), _round_up(N, tn)

    x_p = _pad2(x, Mp, Kp).astype(jnp.bfloat16)
    w_p = _pad2(w, Kp, Np).astype(jnp.bfloat16)
    b_p = _pad2(jnp.asarray(b, jnp.float32).reshape(1, N), 1, Np)

    args = [x_p, w_p, b_p]
    in_specs = [
        pl.BlockSpec((tm, tk), lambda i, j, k: (i, k)),
        pl.BlockSpec((tk, tn), lambda i, j, k: (k, j)),
        pl.BlockSpec((1, tn), lambda i, j, k: (0, j)),
    ]
    if residual is None:
        kernel = functools.partial(_matmul_kernel, act=act)
    else:
        args.append(_pad2(residual.astype(jnp.float32), Mp, Np))
        in_specs.append(pl.BlockSpec((tm, tn), lambda i, j, k: (i, j)))
        kernel = functools.partial(_matmul_res_kernel, act=act)

    out = pl.pallas_call(
        kernel,
        out_shape=jax.ShapeDtypeStruct((Mp, Np), jnp.float32),
        grid=(Mp // tm, Np // tn, Kp // tk),
        in_specs=in_specs,
        out_specs=pl.BlockSpec((tm, tn), lambda i, j, k: (i, j)),
        scratch_shapes=[pltpu.VMEM((tm, tn), jnp.float32)],
        compiler_params=pltpu.CompilerParams(
            dimension_semantics=("parallel", "parallel", "arbitrary")),
    )(*args)
    if Mp != M or Np != N:
        out = out[:M, :N]
    return out


# ----------------------------------------------------------------------------
# 3x3 conv with in-kernel im2col (taps accumulated in-register, NHWC layout)
# ----------------------------------------------------------------------------
def _conv3x3_kernel(x_ref, w_ref, b_ref, o_ref, *, act):
    # x_ref: (1, H+2, W+2, Cin) bf16 ; w_ref: (9*Cin, tn) bf16 ; b_ref: (1, tn) f32
    # o_ref: (1, H, W, tn) f32.  The 9 taps never touch HBM as an im2col tensor.
    H, W, tn = o_ref.shape[1], o_ref.shape[2], o_ref.shape[3]
    C = x_ref.shape[3]
    bias = b_ref[...]

    def row_body(h, carry):
        acc = jnp.zeros((W, tn), jnp.float32)
        for t in range(9):                      # static unroll over the 9 taps
            dy, dx = divmod(t, 3)
            xs = x_ref[0, h + dy, pl.ds(dx, W), :]              # (W, Cin)
            acc = acc + jnp.dot(xs, w_ref[t * C:(t + 1) * C, :],
                                preferred_element_type=jnp.float32)
        y = acc + bias
        if act == "relu":
            y = jnp.maximum(y, 0.0)
        o_ref[0, h, :, :] = y
        return carry

    jax.lax.fori_loop(0, H, row_body, 0)


def conv3x3_pallas(x, w, b, act="none"):
    """3x3 'same' conv, NHWC.  x:(B,H,W,Cin)  w:(9*Cin,Cout)  b:(Cout,)."""
    # TODO(synk): add a spatial row-tile grid axis for very large feature maps.
    B, H, W, C = x.shape
    Cout = w.shape[1]
    Coutp = _round_up(Cout, 128)
    tn = 128
    xp = jnp.pad(x, ((0, 0), (1, 1), (1, 1), (0, 0))).astype(jnp.bfloat16)
    wp = _pad2(w, 9 * C, Coutp).astype(jnp.bfloat16)
    bp = _pad2(jnp.asarray(b, jnp.float32).reshape(1, Cout), 1, Coutp)
    out = pl.pallas_call(
        functools.partial(_conv3x3_kernel, act=act),
        out_shape=jax.ShapeDtypeStruct((B, H, W, Coutp), jnp.float32),
        grid=(B, Coutp // tn),
        in_specs=[
            pl.BlockSpec((1, H + 2, W + 2, C), lambda b_, j: (b_, 0, 0, 0)),
            pl.BlockSpec((9 * C, tn), lambda b_, j: (0, j)),
            pl.BlockSpec((1, tn), lambda b_, j: (0, j)),
        ],
        out_specs=pl.BlockSpec((1, H, W, tn), lambda b_, j: (b_, 0, 0, j)),
        compiler_params=pltpu.CompilerParams(
            dimension_semantics=("parallel", "parallel")),
    )(xp, wp, bp)
    return out[..., :Cout] if Coutp != Cout else out


# ----------------------------------------------------------------------------
# Cross-attention with residual add (flash-style over key/value blocks)
# ----------------------------------------------------------------------------
def _attn_kernel(q_ref, k_ref, v_ref, ex_ref, o_ref, m_sc, l_sc, acc_sc,
                 *, s_valid, block_s):
    si = pl.program_id(1)

    @pl.when(si == 0)
    def _init():
        m_sc[...] = jnp.full_like(m_sc, -1e30)
        l_sc[...] = jnp.zeros_like(l_sc)
        acc_sc[...] = jnp.zeros_like(acc_sc)

    s = jnp.dot(q_ref[0], k_ref[0].T, preferred_element_type=jnp.float32)
    col = si * block_s + jax.lax.broadcasted_iota(jnp.int32, s.shape, 1)
    s = jnp.where(col < s_valid, s, -1e30)          # mask zero-padded keys

    m_prev = m_sc[...]
    m_new = jnp.maximum(m_prev, s.max(axis=-1, keepdims=True))
    alpha = jnp.exp(m_prev - m_new)
    p = jnp.exp(s - m_new)
    l_sc[...] = alpha * l_sc[...] + p.sum(axis=-1, keepdims=True)
    acc_sc[...] = alpha * acc_sc[...] + jnp.dot(
        p.astype(v_ref.dtype), v_ref[0], preferred_element_type=jnp.float32)
    m_sc[...] = m_new

    @pl.when(si == pl.num_programs(1) - 1)
    def _epilogue():
        o_ref[0] = ex_ref[0] + acc_sc[...] * pl.reciprocal(l_sc[...], approx=True)


def cross_attention_pallas(q, k, v, ex, block_s=512):
    """ex + softmax(q k^T) v per batch (1/sqrt(D) is pre-folded into the q weights).

    Online softmax over key/value blocks so K/V never need to fit whole in VMEM.
    """
    B, L, D = q.shape
    S = k.shape[1]
    ts = min(block_s, _round_up(S, 8))
    Sp = _round_up(S, ts)
    kp = jnp.pad(k, ((0, 0), (0, Sp - S), (0, 0))).astype(jnp.bfloat16)
    vp = jnp.pad(v, ((0, 0), (0, Sp - S), (0, 0))).astype(jnp.bfloat16)
    return pl.pallas_call(
        functools.partial(_attn_kernel, s_valid=S, block_s=ts),
        out_shape=jax.ShapeDtypeStruct((B, L, D), jnp.float32),
        grid=(B, Sp // ts),
        in_specs=[
            pl.BlockSpec((1, L, D), lambda b, s: (b, 0, 0)),
            pl.BlockSpec((1, ts, D), lambda b, s: (b, s, 0)),
            pl.BlockSpec((1, ts, D), lambda b, s: (b, s, 0)),
            pl.BlockSpec((1, L, D), lambda b, s: (b, 0, 0)),
        ],
        out_specs=pl.BlockSpec((1, L, D), lambda b, s: (b, 0, 0)),
        scratch_shapes=[pltpu.VMEM((L, 1), jnp.float32),
                        pltpu.VMEM((L, 1), jnp.float32),
                        pltpu.VMEM((L, D), jnp.float32)],
        compiler_params=pltpu.CompilerParams(
            dimension_semantics=("parallel", "arbitrary")),
    )(q.astype(jnp.bfloat16), kp, vp, ex.astype(jnp.float32))


# ----------------------------------------------------------------------------
# Exemplar-image matching (mean over boxes folded into the matmul)
# ----------------------------------------------------------------------------
def _match_kernel(img_ref, exm_ref, o_ref):
    o_ref[0] = jnp.dot(img_ref[0], exm_ref[0].T,
                       preferred_element_type=jnp.float32)


def matching_pallas(img, ex_mean):
    """img:(B,HW,E) x box-mean exemplar (B,49,E) -> (B,HW,128).

    The 49 similarity channels are zero-padded to a lane-dense 128 so the
    following 1x1 conv consumes them without re-slicing (its weight is padded
    with zero rows to match).
    """
    B, HW, E = img.shape
    K = ex_mean.shape[1]
    Kp = _round_up(K, 128)
    tmi = min(512, _round_up(HW, 8))
    HWp = _round_up(HW, tmi)
    imgp = jnp.pad(img, ((0, 0), (0, HWp - HW), (0, 0))).astype(jnp.bfloat16)
    exmp = jnp.pad(ex_mean, ((0, 0), (0, Kp - K), (0, 0))).astype(jnp.bfloat16)
    out = pl.pallas_call(
        _match_kernel,
        out_shape=jax.ShapeDtypeStruct((B, HWp, Kp), jnp.float32),
        grid=(B, HWp // tmi),
        in_specs=[
            pl.BlockSpec((1, tmi, E), lambda b, i: (b, i, 0)),
            pl.BlockSpec((1, Kp, E), lambda b, i: (b, 0, 0)),
        ],
        out_specs=pl.BlockSpec((1, tmi, Kp), lambda b, i: (b, i, 0)),
        compiler_params=pltpu.CompilerParams(
            dimension_semantics=("parallel", "parallel")),
    )(imgp, exmp)
    return out[:, :HW, :] if HWp != HW else out


# ----------------------------------------------------------------------------
# Fused bilinear resize: o = Ah @ x @ Aw^T in one kernel per map
# ----------------------------------------------------------------------------
def _bilinear_matrix(out_size, in_size):
    i = jnp.arange(out_size, dtype=jnp.float32)
    src = (i + 0.5) * (in_size / out_size) - 0.5
    i0 = jnp.floor(src)
    w1 = src - i0
    w0 = 1.0 - w1
    i0c = jnp.clip(i0, 0, in_size - 1).astype(jnp.int32)
    i1c = jnp.clip(i0 + 1, 0, in_size - 1).astype(jnp.int32)
    A = jnp.zeros((out_size, in_size), jnp.float32)
    A = A.at[jnp.arange(out_size), i0c].add(w0)
    A = A.at[jnp.arange(out_size), i1c].add(w1)
    return A


def _resize_kernel(x_ref, ah_ref, awt_ref, o_ref):
    t = jnp.dot(ah_ref[...], x_ref[0], preferred_element_type=jnp.float32)
    o_ref[0] = jnp.dot(t, awt_ref[...], preferred_element_type=jnp.float32)


def bilinear_resize_pallas(x, out_h, out_w):
    """F.interpolate(mode='bilinear', align_corners=False) on (M, h, w) maps."""
    M, h, w = x.shape
    ah = _bilinear_matrix(out_h, h)          # (out_h, h)
    awt = _bilinear_matrix(out_w, w).T       # (w, out_w)
    return pl.pallas_call(
        _resize_kernel,
        out_shape=jax.ShapeDtypeStruct((M, out_h, out_w), jnp.float32),
        grid=(M,),
        in_specs=[
            pl.BlockSpec((1, h, w), lambda i: (i, 0, 0)),
            pl.BlockSpec((out_h, h), lambda i: (0, 0)),
            pl.BlockSpec((w, out_w), lambda i: (0, 0)),
        ],
        out_specs=pl.BlockSpec((1, out_h, out_w), lambda i: (i, 0, 0)),
        compiler_params=pltpu.CompilerParams(
            dimension_semantics=("parallel",)),
    )(x.astype(jnp.float32), ah, awt)


# ----------------------------------------------------------------------------
# roi_align (aligned=True) — gather-heavy, kept in JAX, NHWC input
# ----------------------------------------------------------------------------
# TODO(synk): torchvision roi_align uses an adaptive sampling_ratio per bin;
# here a single bilinear sample at each bin center is used.
def roi_align_jax(feat_nhwc, bboxes, spatial_scale, out_size=7):
    B, H, W, C = feat_nhwc.shape
    Nb = bboxes.shape[1]
    boxes = bboxes.reshape(B * Nb, 4)
    bidx = jnp.repeat(jnp.arange(B), Nb)

    def sample_one(b, box):
        x1 = box[0] * spatial_scale - 0.5
        y1 = box[1] * spatial_scale - 0.5
        x2 = box[2] * spatial_scale - 0.5
        y2 = box[3] * spatial_scale - 0.5
        bw = (x2 - x1) / out_size
        bh = (y2 - y1) / out_size
        xs = x1 + (jnp.arange(out_size, dtype=jnp.float32) + 0.5) * bw
        ys = y1 + (jnp.arange(out_size, dtype=jnp.float32) + 0.5) * bh
        fmap = feat_nhwc[b]

        def bil(coords, size):
            c0 = jnp.floor(coords)
            w1 = coords - c0
            i0 = jnp.clip(c0, 0, size - 1).astype(jnp.int32)
            i1 = jnp.clip(c0 + 1, 0, size - 1).astype(jnp.int32)
            return i0, i1, 1.0 - w1, w1

        x0, x1i, wx0, wx1 = bil(xs, W)
        y0, y1i, wy0, wy1 = bil(ys, H)
        v00 = fmap[y0[:, None], x0[None, :], :]
        v01 = fmap[y0[:, None], x1i[None, :], :]
        v10 = fmap[y1i[:, None], x0[None, :], :]
        v11 = fmap[y1i[:, None], x1i[None, :], :]
        wgt = lambda a, c: (a[:, None] * c[None, :])[..., None]
        return (v00 * wgt(wy0, wx0) + v01 * wgt(wy0, wx1) +
                v10 * wgt(wy1, wx0) + v11 * wgt(wy1, wx1))       # (7,7,C)

    return jax.vmap(sample_one)(bidx, boxes)                      # (B*Nb,7,7,C)


# ----------------------------------------------------------------------------
# Parameters
# ----------------------------------------------------------------------------
def _init_linear(key, fan_in, fan_out):
    k1, k2 = jax.random.split(key)
    w = jax.random.normal(k1, (fan_in, fan_out), jnp.float32) / math.sqrt(fan_in)
    b = 0.01 * jax.random.normal(k2, (fan_out,), jnp.float32)
    return w, b


def init_params(emb_dim, reduction, in_ch=3, seed=42):
    keys = jax.random.split(jax.random.PRNGKey(seed), 16)
    E = emb_dim
    p = {}
    p["patch_w"], p["patch_b"] = _init_linear(keys[0], in_ch * reduction * reduction, E)
    p["enh_w"], p["enh_b"] = _init_linear(keys[1], E, E)

    q_w, q_b = _init_linear(keys[2], E, E)
    scale = 1.0 / math.sqrt(E)
    p["q_w"], p["q_b"] = q_w * scale, q_b * scale       # 1/sqrt(D) folded into q proj
    k_w, k_b = _init_linear(keys[3], E, E)
    v_w, v_b = _init_linear(keys[4], E, E)
    p["kv_w"] = jnp.concatenate([k_w, v_w], axis=1)     # fused K/V projection
    p["kv_b"] = jnp.concatenate([k_b, v_b], axis=0)

    resp_w, resp_b = _init_linear(keys[5], 49, E)
    p["resp_w"] = jnp.pad(resp_w, ((0, 128 - 49), (0, 0)))   # K padded to lane-dense sim
    p["resp_b"] = resp_b

    a1_w1, a1_b1 = _init_linear(keys[6], 9 * E, 128)
    a1_w2, a1_b2 = _init_linear(keys[7], 128, 1)
    a2_w1, a2_b1 = _init_linear(keys[8], 9 * E, 64)
    a2_w2, a2_b2 = _init_linear(keys[9], 64, 1)
    r_w1, r_b1 = _init_linear(keys[10], 9 * E, 128)
    p["r_w2"], p["r_b2"] = _init_linear(keys[11], 9 * 128, 64)
    p["r_w3"], p["r_b3"] = _init_linear(keys[12], 64, 1)

    # Three first-stage 3x3 convs (shared input) fused into one: E -> 128+64+128.
    p["head_w1"] = jnp.concatenate([a1_w1, a2_w1, r_w1], axis=1)      # (9E, 320)
    p["head_b1"] = jnp.concatenate([a1_b1, a2_b1, r_b1], axis=0)      # (320,)
    # Two aux 1x1 heads fused into one block-diagonal matmul: 192 -> 2.
    aux_w = jnp.zeros((192, 2), jnp.float32)
    aux_w = aux_w.at[:128, 0].set(a1_w2[:, 0]).at[128:, 1].set(a2_w2[:, 0])
    p["aux_w2"] = aux_w
    p["aux_b2"] = jnp.concatenate([a1_b2, a2_b2], axis=0)             # (2,)
    return p


# ----------------------------------------------------------------------------
# Forward pass
# ----------------------------------------------------------------------------
def efficient_counter_forward(params, x, bboxes, *, image_size, emb_dim,
                              reduction=8, num_iterations=2):
    B = x.shape[0]
    E = emb_dim
    P = reduction
    Hf = image_size // reduction
    HW = Hf * Hf
    Nb = bboxes.shape[1]

    # HybridEncoder stand-in: strided patch embedding as one tiled matmul.
    xp = x.reshape(B, 3, Hf, P, Hf, P).transpose(0, 2, 4, 1, 3, 5)
    xp = xp.reshape(B * HW, 3 * P * P)
    f = matmul_pallas(xp, params["patch_w"], params["patch_b"])        # (B*HW, E)

    # FeatureEnhancer stand-in: residual ReLU MLP; residual fused into epilogue.
    f = matmul_pallas(f, params["enh_w"], params["enh_b"], act="relu", residual=f)

    feat_nhwc = f.reshape(B, Hf, Hf, E)       # channels-last end-to-end
    img_flat = f.reshape(B, HW, E)

    # roi_align of exemplar boxes on the enhanced features (plain-JAX gathers).
    pooled = roi_align_jax(feat_nhwc, bboxes, 1.0 / reduction)          # (B*Nb,7,7,E)
    ex = pooled.reshape(B, Nb * 49, E)

    # ExemplarFeatureLearning stand-in: iterative cross-attention refinement.
    # TODO(synk): original module (num_heads=8) is undefined; single-head used.
    kv = matmul_pallas(f, params["kv_w"], params["kv_b"])               # (B*HW, 2E)
    k = kv[:, :E].reshape(B, HW, E)
    v = kv[:, E:].reshape(B, HW, E)
    for _ in range(num_iterations):
        q = matmul_pallas(ex.reshape(B * Nb * 49, E),
                          params["q_w"], params["q_b"]).reshape(B, Nb * 49, E)
        ex = cross_attention_pallas(q, k, v, ex)

    # ExemplarImageMatching stand-in: dot-product similarity averaged over boxes.
    # The box-mean commutes with the matmul, so match against the mean exemplar.
    ex_mean = ex.reshape(B, Nb, 49, E).mean(axis=1)                     # (B, 49, E)
    sim = matching_pallas(img_flat, ex_mean)                            # (B, HW, 128)

    # response_proj: Conv2d(49, E, 1) == matmul with zero-padded K.
    resp = matmul_pallas(sim.reshape(B * HW, 128),
                         params["resp_w"], params["resp_b"])            # (B*HW, E)
    resp_nhwc = resp.reshape(B, Hf, Hf, E)

    # Fused first-stage 3x3 conv for all three heads (E -> 128 | 64 | 128).
    h = conv3x3_pallas(resp_nhwc, params["head_w1"], params["head_b1"], act="relu")
    h12 = h[..., :192].reshape(B * HW, 192)
    hr = h[..., 192:320]

    # Fused aux 1x1 heads (block-diagonal 192 -> 2, padded lane-dense in-kernel).
    aux = matmul_pallas(h12, params["aux_w2"], params["aux_b2"])        # (B*HW, 2)

    # Regression head tail.
    d = conv3x3_pallas(hr, params["r_w2"], params["r_b2"], act="relu")  # (B,Hf,Hf,64)
    d = matmul_pallas(d.reshape(B * HW, 64), params["r_w3"], params["r_b3"])

    # One fused bilinear resize (Ah @ x @ Aw^T) for all three 1-channel maps.
    maps = jnp.stack([d.reshape(B, Hf, Hf),
                      aux[:, 0].reshape(B, Hf, Hf),
                      aux[:, 1].reshape(B, Hf, Hf)], axis=1)
    up = bilinear_resize_pallas(maps.reshape(B * 3, Hf, Hf), image_size, image_size)
    up = up.reshape(B, 3, image_size, image_size)

    density = up[:, 0:1]
    aux1 = up[:, 1:2]
    aux2 = up[:, 2:3]
    ex_out = ex.reshape(B, Nb, 49 * E)
    return density, [aux1, aux2], ex_out


# ----------------------------------------------------------------------------
if __name__ == "__main__":
    IMAGE_SIZE = 16
    EMB_DIM = 32
    REDUCTION = 8
    NUM_ITERS = 2
    B, NBOX = 2, 3

    params = init_params(EMB_DIM, REDUCTION)

    key = jax.random.PRNGKey(0)
    x = jax.random.normal(key, (B, 3, IMAGE_SIZE, IMAGE_SIZE), jnp.float32)
    bboxes = jnp.array(
        [[[1.0, 1.0, 9.0, 9.0], [4.0, 2.0, 12.0, 10.0], [0.0, 5.0, 7.0, 15.0]],
         [[2.0, 2.0, 10.0, 12.0], [6.0, 1.0, 14.0, 9.0], [3.0, 4.0, 11.0, 13.0]]],
        dtype=jnp.float32)

    fwd = jax.jit(functools.partial(
        efficient_counter_forward, image_size=IMAGE_SIZE, emb_dim=EMB_DIM,
        reduction=REDUCTION, num_iterations=NUM_ITERS))
    density, (aux1, aux2), exemplar_features = fwd(params, x, bboxes)

    jax.block_until_ready((density, aux1, aux2, exemplar_features))
    assert density.shape == (B, 1, IMAGE_SIZE, IMAGE_SIZE)
    assert aux1.shape == (B, 1, IMAGE_SIZE, IMAGE_SIZE)
    assert aux2.shape == (B, 1, IMAGE_SIZE, IMAGE_SIZE)
    assert exemplar_features.shape == (B, NBOX, 49 * EMB_DIM)
    assert bool(jnp.all(jnp.isfinite(density)))
    print("KERNEL_OK")
</pallas_src>

<mosaic_0001>
module attributes {stable_mosaic.version = 11 : i64} {
  func.func private @main(%arg0: i32) attributes {dimension_semantics = [#tpu.dimension_semantics<core_parallel>], iteration_bounds = array<i64: 2>, tpu.core_type = #tpu.core_type<sc_scalar_subcore>, window_params = []} {
    return
  }
}

module attributes {stable_mosaic.version = 11 : i64} {
  func.func private @main(%arg0: i32) attributes {dimension_semantics = [#tpu.dimension_semantics<core_parallel>], iteration_bounds = array<i64: 2>, tpu.core_type = #tpu.core_type<sc_scalar_subcore>, window_params = []} {
    return
  }
}

module attributes {stable_mosaic.version = 11 : i64} {
  func.func @_matmul_res_kernel(%arg0: i32, %arg1: i32, %arg2: i32, %arg3: memref<8x32xbf16, #tpu.memory_space<vmem>>, %arg4: memref<32x128xbf16, #tpu.memory_space<vmem>>, %arg5: memref<1x128xf32, #tpu.memory_space<vmem>>, %arg6: memref<8x128xf32, #tpu.memory_space<vmem>>, %arg7: memref<8x128xf32, #tpu.memory_space<vmem>>, %arg8: memref<8x128xf32, #tpu.memory_space<vmem>>) attributes {dimension_semantics = [#tpu.dimension_semantics<parallel>, #tpu.dimension_semantics<parallel>, #tpu.dimension_semantics<arbitrary>], iteration_bounds = array<i64: 1, 1, 1>, scalar_prefetch = 0 : i64, scratch_operands = 1 : i64, tpu.core_type = #tpu.core_type<tc>, window_params = [{transform_indices = @transform_0, window_bounds = array<i64: 8, 32>}, {transform_indices = @transform_1, window_bounds = array<i64: 32, 128>}, {transform_indices = @transform_2, window_bounds = array<i64: 1, 128>}, {transform_indices = @transform_3, window_bounds = array<i64: 8, 128>}, {transform_indices = @transform_4, window_bounds = array<i64: 8, 128>}]} {
    %c0_i32 = arith.constant 0 : i32
    %0 = arith.cmpi eq, %arg2, %c0_i32 : i32
    %1 = arith.extui %0 : i1 to i32
    %c0_i32_0 = arith.constant 0 : i32
    %2 = arith.cmpi ne, %1, %c0_i32_0 : i32
    scf.if %2 {
      %cst_10 = arith.constant 0.000000e+00 : f32
      %12 = vector.broadcast %cst_10 : f32 to vector<8x128xf32>
      %c0_11 = arith.constant 0 : index
      %c0_12 = arith.constant 0 : index
      %13 = vector.load %arg8[%c0_11, %c0_12] : memref<8x128xf32, #tpu.memory_space<vmem>>, vector<8x128xf32>
      tpu.vector_store %arg8[%c0_11, %c0_12], %12 {strides = array<i32>} : memref<8x128xf32, #tpu.memory_space<vmem>>, vector<8x128xf32>,
    } else {
    }
    %c0 = arith.constant 0 : index
    %c0_1 = arith.constant 0 : index
    %3 = vector.load %arg8[%c0, %c0_1] : memref<8x128xf32, #tpu.memory_space<vmem>>, vector<8x128xf32>
    %c0_2 = arith.constant 0 : index
    %c0_3 = arith.constant 0 : index
    %4 = vector.load %arg3[%c0_2, %c0_3] : memref<8x32xbf16, #tpu.memory_space<vmem>>, vector<8x32xbf16>
    %c0_4 = arith.constant 0 : index
    %c0_5 = arith.constant 0 : index
    %5 = vector.load %arg4[%c0_4, %c0_5] : memref<32x128xbf16, #tpu.memory_space<vmem>>, vector<32x128xbf16>
    %cst = arith.constant dense<0.000000e+00> : vector<8x128xf32>
    %6 = tpu.matmul %4, %5, %cst {dimension_numbers = #tpu.dot_dimension_numbers<[1], [0], [0], [1], [0, 0, 1, 1], [], []>} : vector<8x32xbf16>, vector<32x128xbf16>, vector<8x128xf32> -> vector<8x128xf32>
    %7 = arith.addf %3, %6 : vector<8x128xf32>
    %c0_6 = arith.constant 0 : index
    %c0_7 = arith.constant 0 : index
    %8 = vector.load %arg8[%c0_6, %c0_7] : memref<8x128xf32, #tpu.memory_space<vmem>>, vector<8x128xf32>
    tpu.vector_store %arg8[%c0_6, %c0_7], %7 {strides = array<i32>} : memref<8x128xf32, #tpu.memory_space<vmem>>, vector<8x128xf32>,
    %c0_i32_8 = arith.constant 0 : i32
    %9 = arith.cmpi eq, %arg2, %c0_i32_8 : i32
    %10 = arith.extui %9 : i1 to i32
    %c0_i32_9 = arith.constant 0 : i32
    %11 = arith.cmpi ne, %10, %c0_i32_9 : i32
    scf.if %11 {
      %c0_10 = arith.constant 0 : index
      %c0_11 = arith.constant 0 : index
      %12 = vector.load %arg8[%c0_10, %c0_11] : memref<8x128xf32, #tpu.memory_space<vmem>>, vector<8x128xf32>
      %c0_12 = arith.constant 0 : index
      %c0_13 = arith.constant 0 : index
      %13 = vector.load %arg5[%c0_12, %c0_13] : memref<1x128xf32, #tpu.memory_space<vmem>>, vector<1x128xf32>
      %14 = vector.broadcast %13 : vector<1x128xf32> to vector<8x128xf32>
      %15 = arith.addf %12, %14 : vector<8x128xf32>
      %cst_14 = arith.constant 0.000000e+00 : f32
      %16 = vector.broadcast %cst_14 : f32 to vector<8x128xf32>
      %17 = arith.maximumf %15, %16 : vector<8x128xf32>
      %c0_15 = arith.constant 0 : index
      %c0_16 = arith.constant 0 : index
      %18 = vector.load %arg6[%c0_15, %c0_16] : memref<8x128xf32, #tpu.memory_space<vmem>>, vector<8x128xf32>
      %19 = arith.addf %18, %17 : vector<8x128xf32>
      %c0_17 = arith.constant 0 : index
      %c0_18 = arith.constant 0 : index
      %20 = vector.load %arg7[%c0_17, %c0_18] : memref<8x128xf32, #tpu.memory_space<vmem>>, vector<8x128xf32>
      tpu.vector_store %arg7[%c0_17, %c0_18], %19 {strides = array<i32>} : memref<8x128xf32, #tpu.memory_space<vmem>>, vector<8x128xf32>,
    } else {
    }
    return
  }
  func.func @transform_0(%arg0: i32, %arg1: i32, %arg2: i32) -> (i32, i32) {
    %c0_i32 = arith.constant 0 : i32
    return %arg0, %arg2 : i32, i32
  }
  func.func @transform_1(%arg0: i32, %arg1: i32, %arg2: i32) -> (i32, i32) {
    %c0_i32 = arith.constant 0 : i32
    return %arg2, %arg1 : i32, i32
  }
  func.func @transform_2(%arg0: i32, %arg1: i32, %arg2: i32) -> (i32, i32) {
    %c0_i32 = arith.constant 0 : i32
    %c0_i32_0 = arith.constant 0 : i32
    return %c0_i32, %arg1 : i32, i32
  }
  func.func @transform_3(%arg0: i32, %arg1: i32, %arg2: i32) -> (i32, i32) {
    %c0_i32 = arith.constant 0 : i32
    return %arg0, %arg1 : i32, i32
  }
  func.func @transform_4(%arg0: i32, %arg1: i32, %arg2: i32) -> (i32, i32) {
    %c0_i32 = arith.constant 0 : i32
    return %arg0, %arg1 : i32, i32
  }
}

module attributes {stable_mosaic.version = 11 : i64} {
  func.func @_matmul_kernel(%arg0: i32, %arg1: i32, %arg2: i32, %arg3: memref<8x192xbf16, #tpu.memory_space<vmem>>, %arg4: memref<192x128xbf16, #tpu.memory_space<vmem>>, %arg5: memref<1x128xf32, #tpu.memory_space<vmem>>, %arg6: memref<8x128xf32, #tpu.memory_space<vmem>>, %arg7: memref<8x128xf32, #tpu.memory_space<vmem>>) attributes {dimension_semantics = [#tpu.dimension_semantics<parallel>, #tpu.dimension_semantics<parallel>, #tpu.dimension_semantics<arbitrary>], iteration_bounds = array<i64: 1, 1, 1>, scalar_prefetch = 0 : i64, scratch_operands = 1 : i64, tpu.core_type = #tpu.core_type<tc>, window_params = [{transform_indices = @transform_0, window_bounds = array<i64: 8, 192>}, {transform_indices = @transform_1, window_bounds = array<i64: 192, 128>}, {transform_indices = @transform_2, window_bounds = array<i64: 1, 128>}, {transform_indices = @transform_3, window_bounds = array<i64: 8, 128>}]} {
    %c0_i32 = arith.constant 0 : i32
    %0 = arith.cmpi eq, %arg2, %c0_i32 : i32
    %1 = arith.extui %0 : i1 to i32
    %c0_i32_0 = arith.constant 0 : i32
    %2 = arith.cmpi ne, %1, %c0_i32_0 : i32
    scf.if %2 {
      %cst_10 = arith.constant 0.000000e+00 : f32
      %12 = vector.broadcast %cst_10 : f32 to vector<8x128xf32>
      %c0_11 = arith.constant 0 : index
      %c0_12 = arith.constant 0 : index
      %13 = vector.load %arg7[%c0_11, %c0_12] : memref<8x128xf32, #tpu.memory_space<vmem>>, vector<8x128xf32>
      tpu.vector_store %arg7[%c0_11, %c0_12], %12 {strides = array<i32>} : memref<8x128xf32, #tpu.memory_space<vmem>>, vector<8x128xf32>,
    } else {
    }
    %c0 = arith.constant 0 : index
    %c0_1 = arith.constant 0 : index
    %3 = vector.load %arg7[%c0, %c0_1] : memref<8x128xf32, #tpu.memory_space<vmem>>, vector<8x128xf32>
    %c0_2 = arith.constant 0 : index
    %c0_3 = arith.constant 0 : index
    %4 = vector.load %arg3[%c0_2, %c0_3] : memref<8x192xbf16, #tpu.memory_space<vmem>>, vector<8x192xbf16>
    %c0_4 = arith.constant 0 : index
    %c0_5 = arith.constant 0 : index
    %5 = vector.load %arg4[%c0_4, %c0_5] : memref<192x128xbf16, #tpu.memory_space<vmem>>, vector<192x128xbf16>
    %cst = arith.constant dense<0.000000e+00> : vector<8x128xf32>
    %6 = tpu.matmul %4, %5, %cst {dimension_numbers = #tpu.dot_dimension_numbers<[1], [0], [0], [1], [0, 0, 1, 1], [], []>} : vector<8x192xbf16>, vector<192x128xbf16>, vector<8x128xf32> -> vector<8x128xf32>
    %7 = arith.addf %3, %6 : vector<8x128xf32>
    %c0_6 = arith.constant 0 : index
    %c0_7 = arith.constant 0 : index
    %8 = vector.load %arg7[%c0_6, %c0_7] : memref<8x128xf32, #tpu.memory_space<vmem>>, vector<8x128xf32>
    tpu.vector_store %arg7[%c0_6, %c0_7], %7 {strides = array<i32>} : memref<8x128xf32, #tpu.memory_space<vmem>>, vector<8x128xf32>,
    %c0_i32_8 = arith.constant 0 : i32
    %9 = arith.cmpi eq, %arg2, %c0_i32_8 : i32
    %10 = arith.extui %9 : i1 to i32
    %c0_i32_9 = arith.constant 0 : i32
    %11 = arith.cmpi ne, %10, %c0_i32_9 : i32
    scf.if %11 {
      %c0_10 = arith.constant 0 : index
      %c0_11 = arith.constant 0 : index
      %12 = vector.load %arg7[%c0_10, %c0_11] : memref<8x128xf32, #tpu.memory_space<vmem>>, vector<8x128xf32>
      %c0_12 = arith.constant 0 : index
      %c0_13 = arith.constant 0 : index
      %13 = vector.load %arg5[%c0_12, %c0_13] : memref<1x128xf32, #tpu.memory_space<vmem>>, vector<1x128xf32>
      %14 = vector.broadcast %13 : vector<1x128xf32> to vector<8x128xf32>
      %15 = arith.addf %12, %14 : vector<8x128xf32>
      %c0_14 = arith.constant 0 : index
      %c0_15 = arith.constant 0 : index
      %16 = vector.load %arg6[%c0_14, %c0_15] : memref<8x128xf32, #tpu.memory_space<vmem>>, vector<8x128xf32>
      tpu.vector_store %arg6[%c0_14, %c0_15], %15 {strides = array<i32>} : memref<8x128xf32, #tpu.memory_space<vmem>>, vector<8x128xf32>,
    } else {
    }
    return
  }
  func.func @transform_0(%arg0: i32, %arg1: i32, %arg2: i32) -> (i32, i32) {
    %c0_i32 = arith.constant 0 : i32
    return %arg0, %arg2 : i32, i32
  }
  func.func @transform_1(%arg0: i32, %arg1: i32, %arg2: i32) -> (i32, i32) {
    %c0_i32 = arith.constant 0 : i32
    return %arg2, %arg1 : i32, i32
  }
  func.func @transform_2(%arg0: i32, %arg1: i32, %arg2: i32) -> (i32, i32) {
    %c0_i32 = arith.constant 0 : i32
    %c0_i32_0 = arith.constant 0 : i32
    return %c0_i32, %arg1 : i32, i32
  }
  func.func @transform_3(%arg0: i32, %arg1: i32, %arg2: i32) -> (i32, i32) {
    %c0_i32 = arith.constant 0 : i32
    return %arg0, %arg1 : i32, i32
  }
}

module attributes {stable_mosaic.version = 11 : i64} {
  func.func @_matmul_kernel(%arg0: i32, %arg1: i32, %arg2: i32, %arg3: memref<296x32xbf16, #tpu.memory_space<vmem>>, %arg4: memref<32x128xbf16, #tpu.memory_space<vmem>>, %arg5: memref<1x128xf32, #tpu.memory_space<vmem>>, %arg6: memref<296x128xf32, #tpu.memory_space<vmem>>, %arg7: memref<296x128xf32, #tpu.memory_space<vmem>>) attributes {dimension_semantics = [#tpu.dimension_semantics<parallel>, #tpu.dimension_semantics<parallel>, #tpu.dimension_semantics<arbitrary>], iteration_bounds = array<i64: 1, 1, 1>, scalar_prefetch = 0 : i64, scratch_operands = 1 : i64, tpu.core_type = #tpu.core_type<tc>, window_params = [{transform_indices = @transform_0, window_bounds = array<i64: 296, 32>}, {transform_indices = @transform_1, window_bounds = array<i64: 32, 128>}, {transform_indices = @transform_2, window_bounds = array<i64: 1, 128>}, {transform_indices = @transform_3, window_bounds = array<i64: 296, 128>}]} {
    %c0_i32 = arith.constant 0 : i32
    %0 = arith.cmpi eq, %arg2, %c0_i32 : i32
    %1 = arith.extui %0 : i1 to i32
    %c0_i32_0 = arith.constant 0 : i32
    %2 = arith.cmpi ne, %1, %c0_i32_0 : i32
    scf.if %2 {
      %cst_10 = arith.constant 0.000000e+00 : f32
      %12 = vector.broadcast %cst_10 : f32 to vector<296x128xf32>
      %c0_11 = arith.constant 0 : index
      %c0_12 = arith.constant 0 : index
      %13 = vector.load %arg7[%c0_11, %c0_12] : memref<296x128xf32, #tpu.memory_space<vmem>>, vector<296x128xf32>
      tpu.vector_store %arg7[%c0_11, %c0_12], %12 {strides = array<i32>} : memref<296x128xf32, #tpu.memory_space<vmem>>, vector<296x128xf32>,
    } else {
    }
    %c0 = arith.constant 0 : index
    %c0_1 = arith.constant 0 : index
    %3 = vector.load %arg7[%c0, %c0_1] : memref<296x128xf32, #tpu.memory_space<vmem>>, vector<296x128xf32>
    %c0_2 = arith.constant 0 : index
    %c0_3 = arith.constant 0 : index
    %4 = vector.load %arg3[%c0_2, %c0_3] : memref<296x32xbf16, #tpu.memory_space<vmem>>, vector<296x32xbf16>
    %c0_4 = arith.constant 0 : index
    %c0_5 = arith.constant 0 : index
    %5 = vector.load %arg4[%c0_4, %c0_5] : memref<32x128xbf16, #tpu.memory_space<vmem>>, vector<32x128xbf16>
    %cst = arith.constant dense<0.000000e+00> : vector<296x128xf32>
    %6 = tpu.matmul %4, %5, %cst {dimension_numbers = #tpu.dot_dimension_numbers<[1], [0], [0], [1], [0, 0, 1, 1], [], []>} : vector<296x32xbf16>, vector<32x128xbf16>, vector<296x128xf32> -> vector<296x128xf32>
    %7 = arith.addf %3, %6 : vector<296x128xf32>
    %c0_6 = arith.constant 0 : index
    %c0_7 = arith.constant 0 : index
    %8 = vector.load %arg7[%c0_6, %c0_7] : memref<296x128xf32, #tpu.memory_space<vmem>>, vector<296x128xf32>
    tpu.vector_store %arg7[%c0_6, %c0_7], %7 {strides = array<i32>} : memref<296x128xf32, #tpu.memory_space<vmem>>, vector<296x128xf32>,
    %c0_i32_8 = arith.constant 0 : i32
    %9 = arith.cmpi eq, %arg2, %c0_i32_8 : i32
    %10 = arith.extui %9 : i1 to i32
    %c0_i32_9 = arith.constant 0 : i32
    %11 = arith.cmpi ne, %10, %c0_i32_9 : i32
    scf.if %11 {
      %c0_10 = arith.constant 0 : index
      %c0_11 = arith.constant 0 : index
      %12 = vector.load %arg7[%c0_10, %c0_11] : memref<296x128xf32, #tpu.memory_space<vmem>>, vector<296x128xf32>
      %c0_12 = arith.constant 0 : index
      %c0_13 = arith.constant 0 : index
      %13 = vector.load %arg5[%c0_12, %c0_13] : memref<1x128xf32, #tpu.memory_space<vmem>>, vector<1x128xf32>
      %14 = vector.broadcast %13 : vector<1x128xf32> to vector<296x128xf32>
      %15 = arith.addf %12, %14 : vector<296x128xf32>
      %c0_14 = arith.constant 0 : index
      %c0_15 = arith.constant 0 : index
      %16 = vector.load %arg6[%c0_14, %c0_15] : memref<296x128xf32, #tpu.memory_space<vmem>>, vector<296x128xf32>
      tpu.vector_store %arg6[%c0_14, %c0_15], %15 {strides = array<i32>} : memref<296x128xf32, #tpu.memory_space<vmem>>, vector<296x128xf32>,
    } else {
    }
    return
  }
  func.func @transform_0(%arg0: i32, %arg1: i32, %arg2: i32) -> (i32, i32) {
    %c0_i32 = arith.constant 0 : i32
    return %arg0, %arg2 : i32, i32
  }
  func.func @transform_1(%arg0: i32, %arg1: i32, %arg2: i32) -> (i32, i32) {
    %c0_i32 = arith.constant 0 : i32
    return %arg2, %arg1 : i32, i32
  }
  func.func @transform_2(%arg0: i32, %arg1: i32, %arg2: i32) -> (i32, i32) {
    %c0_i32 = arith.constant 0 : i32
    %c0_i32_0 = arith.constant 0 : i32
    return %c0_i32, %arg1 : i32, i32
  }
  func.func @transform_3(%arg0: i32, %arg1: i32, %arg2: i32) -> (i32, i32) {
    %c0_i32 = arith.constant 0 : i32
    return %arg0, %arg1 : i32, i32
  }
}

module attributes {stable_mosaic.version = 11 : i64} {
  func.func @_matmul_kernel(%arg0: i32, %arg1: i32, %arg2: i32, %arg3: memref<8x32xbf16, #tpu.memory_space<vmem>>, %arg4: memref<32x128xbf16, #tpu.memory_space<vmem>>, %arg5: memref<1x128xf32, #tpu.memory_space<vmem>>, %arg6: memref<8x128xf32, #tpu.memory_space<vmem>>, %arg7: memref<8x128xf32, #tpu.memory_space<vmem>>) attributes {dimension_semantics = [#tpu.dimension_semantics<parallel>, #tpu.dimension_semantics<parallel>, #tpu.dimension_semantics<arbitrary>], iteration_bounds = array<i64: 1, 1, 1>, scalar_prefetch = 0 : i64, scratch_operands = 1 : i64, tpu.core_type = #tpu.core_type<tc>, window_params = [{transform_indices = @transform_0, window_bounds = array<i64: 8, 32>}, {transform_indices = @transform_1, window_bounds = array<i64: 32, 128>}, {transform_indices = @transform_2, window_bounds = array<i64: 1, 128>}, {transform_indices = @transform_3, window_bounds = array<i64: 8, 128>}]} {
    %c0_i32 = arith.constant 0 : i32
    %0 = arith.cmpi eq, %arg2, %c0_i32 : i32
    %1 = arith.extui %0 : i1 to i32
    %c0_i32_0 = arith.constant 0 : i32
    %2 = arith.cmpi ne, %1, %c0_i32_0 : i32
    scf.if %2 {
      %cst_10 = arith.constant 0.000000e+00 : f32
      %12 = vector.broadcast %cst_10 : f32 to vector<8x128xf32>
      %c0_11 = arith.constant 0 : index
      %c0_12 = arith.constant 0 : index
      %13 = vector.load %arg7[%c0_11, %c0_12] : memref<8x128xf32, #tpu.memory_space<vmem>>, vector<8x128xf32>
      tpu.vector_store %arg7[%c0_11, %c0_12], %12 {strides = array<i32>} : memref<8x128xf32, #tpu.memory_space<vmem>>, vector<8x128xf32>,
    } else {
    }
    %c0 = arith.constant 0 : index
    %c0_1 = arith.constant 0 : index
    %3 = vector.load %arg7[%c0, %c0_1] : memref<8x128xf32, #tpu.memory_space<vmem>>, vector<8x128xf32>
    %c0_2 = arith.constant 0 : index
    %c0_3 = arith.constant 0 : index
    %4 = vector.load %arg3[%c0_2, %c0_3] : memref<8x32xbf16, #tpu.memory_space<vmem>>, vector<8x32xbf16>
    %c0_4 = arith.constant 0 : index
    %c0_5 = arith.constant 0 : index
    %5 = vector.load %arg4[%c0_4, %c0_5] : memref<32x128xbf16, #tpu.memory_space<vmem>>, vector<32x128xbf16>
    %cst = arith.constant dense<0.000000e+00> : vector<8x128xf32>
    %6 = tpu.matmul %4, %5, %cst {dimension_numbers = #tpu.dot_dimension_numbers<[1], [0], [0], [1], [0, 0, 1, 1], [], []>} : vector<8x32xbf16>, vector<32x128xbf16>, vector<8x128xf32> -> vector<8x128xf32>
    %7 = arith.addf %3, %6 : vector<8x128xf32>
    %c0_6 = arith.constant 0 : index
    %c0_7 = arith.constant 0 : index
    %8 = vector.load %arg7[%c0_6, %c0_7] : memref<8x128xf32, #tpu.memory_space<vmem>>, vector<8x128xf32>
    tpu.vector_store %arg7[%c0_6, %c0_7], %7 {strides = array<i32>} : memref<8x128xf32, #tpu.memory_space<vmem>>, vector<8x128xf32>,
    %c0_i32_8 = arith.constant 0 : i32
    %9 = arith.cmpi eq, %arg2, %c0_i32_8 : i32
    %10 = arith.extui %9 : i1 to i32
    %c0_i32_9 = arith.constant 0 : i32
    %11 = arith.cmpi ne, %10, %c0_i32_9 : i32
    scf.if %11 {
      %c0_10 = arith.constant 0 : index
      %c0_11 = arith.constant 0 : index
      %12 = vector.load %arg7[%c0_10, %c0_11] : memref<8x128xf32, #tpu.memory_space<vmem>>, vector<8x128xf32>
      %c0_12 = arith.constant 0 : index
      %c0_13 = arith.constant 0 : index
      %13 = vector.load %arg5[%c0_12, %c0_13] : memref<1x128xf32, #tpu.memory_space<vmem>>, vector<1x128xf32>
      %14 = vector.broadcast %13 : vector<1x128xf32> to vector<8x128xf32>
      %15 = arith.addf %12, %14 : vector<8x128xf32>
      %c0_14 = arith.constant 0 : index
      %c0_15 = arith.constant 0 : index
      %16 = vector.load %arg6[%c0_14, %c0_15] : memref<8x128xf32, #tpu.memory_space<vmem>>, vector<8x128xf32>
      tpu.vector_store %arg6[%c0_14, %c0_15], %15 {strides = array<i32>} : memref<8x128xf32, #tpu.memory_space<vmem>>, vector<8x128xf32>,
    } else {
    }
    return
  }
  func.func @transform_0(%arg0: i32, %arg1: i32, %arg2: i32) -> (i32, i32) {
    %c0_i32 = arith.constant 0 : i32
    return %arg0, %arg2 : i32, i32
  }
  func.func @transform_1(%arg0: i32, %arg1: i32, %arg2: i32) -> (i32, i32) {
    %c0_i32 = arith.constant 0 : i32
    return %arg2, %arg1 : i32, i32
  }
  func.func @transform_2(%arg0: i32, %arg1: i32, %arg2: i32) -> (i32, i32) {
    %c0_i32 = arith.constant 0 : i32
    %c0_i32_0 = arith.constant 0 : i32
    return %c0_i32, %arg1 : i32, i32
  }
  func.func @transform_3(%arg0: i32, %arg1: i32, %arg2: i32) -> (i32, i32) {
    %c0_i32 = arith.constant 0 : i32
    return %arg0, %arg1 : i32, i32
  }
}

module attributes {stable_mosaic.version = 11 : i64} {
  func.func @_attn_kernel(%arg0: i32, %arg1: i32, %arg2: memref<1x147x32xbf16, #tpu.memory_space<vmem>>, %arg3: memref<1x8x32xbf16, #tpu.memory_space<vmem>>, %arg4: memref<1x8x32xbf16, #tpu.memory_space<vmem>>, %arg5: memref<1x147x32xf32, #tpu.memory_space<vmem>>, %arg6: memref<1x147x32xf32, #tpu.memory_space<vmem>>, %arg7: memref<147x1xf32, #tpu.memory_space<vmem>>, %arg8: memref<147x1xf32, #tpu.memory_space<vmem>>, %arg9: memref<147x32xf32, #tpu.memory_space<vmem>>) attributes {dimension_semantics = [#tpu.dimension_semantics<parallel>, #tpu.dimension_semantics<arbitrary>], iteration_bounds = array<i64: 2, 1>, scalar_prefetch = 0 : i64, scratch_operands = 3 : i64, tpu.core_type = #tpu.core_type<tc>, window_params = [{transform_indices = @transform_0, window_bounds = array<i64: 1, 147, 32>}, {transform_indices = @transform_1, window_bounds = array<i64: 1, 8, 32>}, {transform_indices = @transform_2, window_bounds = array<i64: 1, 8, 32>}, {transform_indices = @transform_3, window_bounds = array<i64: 1, 147, 32>}, {transform_indices = @transform_4, window_bounds = array<i64: 1, 147, 32>}]} {
    %c0_i32 = arith.constant 0 : i32
    %0 = arith.cmpi eq, %arg1, %c0_i32 : i32
    %1 = arith.extui %0 : i1 to i32
    %c0_i32_0 = arith.constant 0 : i32
    %2 = arith.cmpi ne, %1, %c0_i32_0 : i32
    scf.if %2 {
      %cst_27 = arith.constant -1.000000e+30 : f32
      %45 = vector.broadcast %cst_27 : f32 to vector<147x1xf32>
      %c0_28 = arith.constant 0 : index
      %c0_29 = arith.constant 0 : index
      %46 = vector.load %arg7[%c0_28, %c0_29] : memref<147x1xf32, #tpu.memory_space<vmem>>, vector<147x1xf32>
      tpu.vector_store %arg7[%c0_28, %c0_29], %45 {strides = array<i32>} : memref<147x1xf32, #tpu.memory_space<vmem>>, vector<147x1xf32>,
      %cst_30 = arith.constant 0.000000e+00 : f32
      %47 = vector.broadcast %cst_30 : f32 to vector<147x1xf32>
      %c0_31 = arith.constant 0 : index
      %c0_32 = arith.constant 0 : index
      %48 = vector.load %arg8[%c0_31, %c0_32] : memref<147x1xf32, #tpu.memory_space<vmem>>, vector<147x1xf32>
      tpu.vector_store %arg8[%c0_31, %c0_32], %47 {strides = array<i32>} : memref<147x1xf32, #tpu.memory_space<vmem>>, vector<147x1xf32>,
      %cst_33 = arith.constant 0.000000e+00 : f32
      %49 = vector.broadcast %cst_33 : f32 to vector<147x32xf32>
      %c0_34 = arith.constant 0 : index
      %c0_35 = arith.constant 0 : index
      %50 = vector.load %arg9[%c0_34, %c0_35] : memref<147x32xf32, #tpu.memory_space<vmem>>, vector<147x32xf32>
      tpu.vector_store %arg9[%c0_34, %c0_35], %49 {strides = array<i32>} : memref<147x32xf32, #tpu.memory_space<vmem>>, vector<147x32xf32>,
    } else {
    }
    %c0 = arith.constant 0 : index
    %c0_1 = arith.constant 0 : index
    %c0_2 = arith.constant 0 : index
    %3 = vector.load %arg2[%c0, %c0_1, %c0_2] : memref<1x147x32xbf16, #tpu.memory_space<vmem>>, vector<1x147x32xbf16>
    %4 = vector.shape_cast %3 : vector<1x147x32xbf16> to vector<147x32xbf16>
    %c0_3 = arith.constant 0 : index
    %c0_4 = arith.constant 0 : index
    %c0_5 = arith.constant 0 : index
    %5 = vector.load %arg3[%c0_3, %c0_4, %c0_5] : memref<1x8x32xbf16, #tpu.memory_space<vmem>>, vector<1x8x32xbf16>
    %6 = vector.shape_cast %5 : vector<1x8x32xbf16> to vector<8x32xbf16>
    %7 = tpu.transpose %6, [1, 0] : vector<8x32xbf16> -> vector<32x8xbf16>
    %cst = arith.constant dense<0.000000e+00> : vector<147x8xf32>
    %8 = tpu.matmul %4, %7, %cst {dimension_numbers = #tpu.dot_dimension_numbers<[1], [0], [0], [1], [0, 0, 1, 1], [], []>} : vector<147x32xbf16>, vector<32x8xbf16>, vector<147x8xf32> -> vector<147x8xf32>
    %c8_i32 = arith.constant 8 : i32
    %9 = arith.muli %arg1, %c8_i32 : i32
    %10 = tpu.iota {dimensions = array<i32: 1>} : vector<147x8xi32>
    %11 = vector.broadcast %9 : i32 to vector<147x8xi32>
    %12 = arith.addi %11, %10 : vector<147x8xi32>
    %c4_i32 = arith.constant 4 : i32
    %13 = vector.broadcast %c4_i32 : i32 to vector<147x8xi32>
    %14 = arith.cmpi slt, %12, %13 : vector<147x8xi32>
    %cst_6 = arith.constant -1.000000e+30 : f32
    %15 = vector.broadcast %cst_6 : f32 to vector<147x8xf32>
    %16 = arith.select %14, %8, %15 : vector<147x8xi1>, vector<147x8xf32>
    %c0_7 = arith.constant 0 : index
    %c0_8 = arith.constant 0 : index
    %17 = vector.load %arg7[%c0_7, %c0_8] : memref<147x1xf32, #tpu.memory_space<vmem>>, vector<147x1xf32>
    %cst_9 = arith.constant dense<0xFF800000> : vector<147xf32>
    %18 = vector.multi_reduction <maximumf>, %16, %cst_9 [1] : vector<147x8xf32> to vector<147xf32>
    %19 = vector.shape_cast %18 : vector<147xf32> to vector<147x1xf32>
    %20 = arith.maximumf %17, %19 : vector<147x1xf32>
    %21 = arith.subf %17, %20 : vector<147x1xf32>
    %22 = math.exp %21 : vector<147x1xf32>
    %23 = vector.broadcast %20 : vector<147x1xf32> to vector<147x8xf32>
    %24 = arith.subf %16, %23 : vector<147x8xf32>
    %25 = math.exp %24 : vector<147x8xf32>
    %c0_10 = arith.constant 0 : index
    %c0_11 = arith.constant 0 : index
    %26 = vector.load %arg8[%c0_10, %c0_11] : memref<147x1xf32, #tpu.memory_space<vmem>>, vector<147x1xf32>
    %27 = arith.mulf %22, %26 : vector<147x1xf32>
    %cst_12 = arith.constant dense<0.000000e+00> : vector<147xf32>
    %28 = vector.multi_reduction <add>, %25, %cst_12 [1] : vector<147x8xf32> to vector<147xf32>
    %29 = vector.shape_cast %28 : vector<147xf32> to vector<147x1xf32>
    %30 = arith.addf %27, %29 : vector<147x1xf32>
    %c0_13 = arith.constant 0 : index
    %c0_14 = arith.constant 0 : index
    %31 = vector.load %arg8[%c0_13, %c0_14] : memref<147x1xf32, #tpu.memory_space<vmem>>, vector<147x1xf32>
    tpu.vector_store %arg8[%c0_13, %c0_14], %30 {strides = array<i32>} : memref<147x1xf32, #tpu.memory_space<vmem>>, vector<147x1xf32>,
    %c0_15 = arith.constant 0 : index
    %c0_16 = arith.constant 0 : index
    %32 = vector.load %arg9[%c0_15, %c0_16] : memref<147x32xf32, #tpu.memory_space<vmem>>, vector<147x32xf32>
    %33 = vector.broadcast %22 : vector<147x1xf32> to vector<147x32xf32>
    %34 = arith.mulf %33, %32 : vector<147x32xf32>
    %35 = arith.truncf %25 : vector<147x8xf32> to vector<147x8xbf16>
    %c0_17 = arith.constant 0 : index
    %c0_18 = arith.constant 0 : index
    %c0_19 = arith.constant 0 : index
    %36 = vector.load %arg4[%c0_17, %c0_18, %c0_19] : memref<1x8x32xbf16, #tpu.memory_space<vmem>>, vector<1x8x32xbf16>
    %37 = vector.shape_cast %36 : vector<1x8x32xbf16> to vector<8x32xbf16>
    %cst_20 = arith.constant dense<0.000000e+00> : vector<147x32xf32>
    %38 = tpu.matmul %35, %37, %cst_20 {dimension_numbers = #tpu.dot_dimension_numbers<[1], [0], [0], [1], [0, 0, 1, 1], [], []>} : vector<147x8xbf16>, vector<8x32xbf16>, vector<147x32xf32> -> vector<147x32xf32>
    %39 = arith.addf %34, %38 : vector<147x32xf32>
    %c0_21 = arith.constant 0 : index
    %c0_22 = arith.constant 0 : index
    %40 = vector.load %arg9[%c0_21, %c0_22] : memref<147x32xf32, #tpu.memory_space<vmem>>, vector<147x32xf32>
    tpu.vector_store %arg9[%c0_21, %c0_22], %39 {strides = array<i32>} : memref<147x32xf32, #tpu.memory_space<vmem>>, vector<147x32xf32>,
    %c0_23 = arith.constant 0 : index
    %c0_24 = arith.constant 0 : index
    %41 = vector.load %arg7[%c0_23, %c0_24] : memref<147x1xf32, #tpu.memory_space<vmem>>, vector<147x1xf32>
    tpu.vector_store %arg7[%c0_23, %c0_24], %20 {strides = array<i32>} : memref<147x1xf32, #tpu.memory_space<vmem>>, vector<147x1xf32>,
    %c0_i32_25 = arith.constant 0 : i32
    %42 = arith.cmpi eq, %arg1, %c0_i32_25 : i32
    %43 = arith.extui %42 : i1 to i32
    %c0_i32_26 = arith.constant 0 : i32
    %44 = arith.cmpi ne, %43, %c0_i32_26 : i32
    scf.if %44 {
      %c0_27 = arith.constant 0 : index
      %c0_28 = arith.constant 0 : index
      %c0_29 = arith.constant 0 : index
      %45 = vector.load %arg5[%c0_27, %c0_28, %c0_29] : memref<1x147x32xf32, #tpu.memory_space<vmem>>, vector<1x147x32xf32>
      %46 = vector.shape_cast %45 : vector<1x147x32xf32> to vector<147x32xf32>
      %c0_30 = arith.constant 0 : index
      %c0_31 = arith.constant 0 : index
      %47 = vector.load %arg9[%c0_30, %c0_31] : memref<147x32xf32, #tpu.memory_space<vmem>>, vector<147x32xf32>
      %c0_32 = arith.constant 0 : index
      %c0_33 = arith.constant 0 : index
      %48 = vector.load %arg8[%c0_32, %c0_33] : memref<147x1xf32, #tpu.memory_space<vmem>>, vector<147x1xf32>
      %49 = tpu.reciprocal %48 {approx = true} : vector<147x1xf32> -> vector<147x1xf32>
      %50 = vector.broadcast %49 : vector<147x1xf32> to vector<147x32xf32>
      %51 = arith.mulf %47, %50 : vector<147x32xf32>
      %52 = arith.addf %46, %51 : vector<147x32xf32>
      %c0_34 = arith.constant 0 : index
      %c0_35 = arith.constant 0 : index
      %c0_36 = arith.constant 0 : index
      %53 = vector.load %arg6[%c0_34, %c0_35, %c0_36] : memref<1x147x32xf32, #tpu.memory_space<vmem>>, vector<1x147x32xf32>
      %54 = vector.shape_cast %53 : vector<1x147x32xf32> to vector<147x32xf32>
      %55 = vector.shape_cast %52 : vector<147x32xf32> to vector<1x147x32xf32>
      tpu.vector_store %arg6[%c0_34, %c0_35, %c0_36], %55 {strides = array<i32>} : memref<1x147x32xf32, #tpu.memory_space<vmem>>, vector<1x147x32xf32>,
    } else {
    }
    return
  }
  func.func @transform_0(%arg0: i32, %arg1: i32) -> (i32, i32, i32) {
    %c0_i32 = arith.constant 0 : i32
    %c0_i32_0 = arith.constant 0 : i32
    %c0_i32_1 = arith.constant 0 : i32
    return %arg0, %c0_i32, %c0_i32_0 : i32, i32, i32
  }
  func.func @transform_1(%arg0: i32, %arg1: i32) -> (i32, i32, i32) {
    %c0_i32 = arith.constant 0 : i32
    %c0_i32_0 = arith.constant 0 : i32
    return %arg0, %arg1, %c0_i32 : i32, i32, i32
  }
  func.func @transform_2(%arg0: i32, %arg1: i32) -> (i32, i32, i32) {
    %c0_i32 = arith.constant 0 : i32
    %c0_i32_0 = arith.constant 0 : i32
    return %arg0, %arg1, %c0_i32 : i32, i32, i32
  }
  func.func @transform_3(%arg0: i32, %arg1: i32) -> (i32, i32, i32) {
    %c0_i32 = arith.constant 0 : i32
    %c0_i32_0 = arith.constant 0 : i32
    %c0_i32_1 = arith.constant 0 : i32
    return %arg0, %c0_i32, %c0_i32_0 : i32, i32, i32
  }
  func.func @transform_4(%arg0: i32, %arg1: i32) -> (i32, i32, i32) {
    %c0_i32 = arith.constant 0 : i32
    %c0_i32_0 = arith.constant 0 : i32
    %c0_i32_1 = arith.constant 0 : i32
    return %arg0, %c0_i32, %c0_i32_0 : i32, i32, i32
  }
}

module attributes {stable_mosaic.version = 11 : i64} {
  func.func @_matmul_kernel(%arg0: i32, %arg1: i32, %arg2: i32, %arg3: memref<8x128xbf16, #tpu.memory_space<vmem>>, %arg4: memref<128x128xbf16, #tpu.memory_space<vmem>>, %arg5: memref<1x128xf32, #tpu.memory_space<vmem>>, %arg6: memref<8x128xf32, #tpu.memory_space<vmem>>, %arg7: memref<8x128xf32, #tpu.memory_space<vmem>>) attributes {dimension_semantics = [#tpu.dimension_semantics<parallel>, #tpu.dimension_semantics<parallel>, #tpu.dimension_semantics<arbitrary>], iteration_bounds = array<i64: 1, 1, 1>, scalar_prefetch = 0 : i64, scratch_operands = 1 : i64, tpu.core_type = #tpu.core_type<tc>, window_params = [{transform_indices = @transform_0, window_bounds = array<i64: 8, 128>}, {transform_indices = @transform_1, window_bounds = array<i64: 128, 128>}, {transform_indices = @transform_2, window_bounds = array<i64: 1, 128>}, {transform_indices = @transform_3, window_bounds = array<i64: 8, 128>}]} {
    %c0_i32 = arith.constant 0 : i32
    %0 = arith.cmpi eq, %arg2, %c0_i32 : i32
    %1 = arith.extui %0 : i1 to i32
    %c0_i32_0 = arith.constant 0 : i32
    %2 = arith.cmpi ne, %1, %c0_i32_0 : i32
    scf.if %2 {
      %cst_10 = arith.constant 0.000000e+00 : f32
      %12 = vector.broadcast %cst_10 : f32 to vector<8x128xf32>
      %c0_11 = arith.constant 0 : index
      %c0_12 = arith.constant 0 : index
      %13 = vector.load %arg7[%c0_11, %c0_12] : memref<8x128xf32, #tpu.memory_space<vmem>>, vector<8x128xf32>
      tpu.vector_store %arg7[%c0_11, %c0_12], %12 {strides = array<i32>} : memref<8x128xf32, #tpu.memory_space<vmem>>, vector<8x128xf32>,
    } else {
    }
    %c0 = arith.constant 0 : index
    %c0_1 = arith.constant 0 : index
    %3 = vector.load %arg7[%c0, %c0_1] : memref<8x128xf32, #tpu.memory_space<vmem>>, vector<8x128xf32>
    %c0_2 = arith.constant 0 : index
    %c0_3 = arith.constant 0 : index
    %4 = vector.load %arg3[%c0_2, %c0_3] : memref<8x128xbf16, #tpu.memory_space<vmem>>, vector<8x128xbf16>
    %c0_4 = arith.constant 0 : index
    %c0_5 = arith.constant 0 : index
    %5 = vector.load %arg4[%c0_4, %c0_5] : memref<128x128xbf16, #tpu.memory_space<vmem>>, vector<128x128xbf16>
    %cst = arith.constant dense<0.000000e+00> : vector<8x128xf32>
    %6 = tpu.matmul %4, %5, %cst {dimension_numbers = #tpu.dot_dimension_numbers<[1], [0], [0], [1], [0, 0, 1, 1], [], []>} : vector<8x128xbf16>, vector<128x128xbf16>, vector<8x128xf32> -> vector<8x128xf32>
    %7 = arith.addf %3, %6 : vector<8x128xf32>
    %c0_6 = arith.constant 0 : index
    %c0_7 = arith.constant 0 : index
    %8 = vector.load %arg7[%c0_6, %c0_7] : memref<8x128xf32, #tpu.memory_space<vmem>>, vector<8x128xf32>
    tpu.vector_store %arg7[%c0_6, %c0_7], %7 {strides = array<i32>} : memref<8x128xf32, #tpu.memory_space<vmem>>, vector<8x128xf32>,
    %c0_i32_8 = arith.constant 0 : i32
    %9 = arith.cmpi eq, %arg2, %c0_i32_8 : i32
    %10 = arith.extui %9 : i1 to i32
    %c0_i32_9 = arith.constant 0 : i32
    %11 = arith.cmpi ne, %10, %c0_i32_9 : i32
    scf.if %11 {
      %c0_10 = arith.constant 0 : index
      %c0_11 = arith.constant 0 : index
      %12 = vector.load %arg7[%c0_10, %c0_11] : memref<8x128xf32, #tpu.memory_space<vmem>>, vector<8x128xf32>
      %c0_12 = arith.constant 0 : index
      %c0_13 = arith.constant 0 : index
      %13 = vector.load %arg5[%c0_12, %c0_13] : memref<1x128xf32, #tpu.memory_space<vmem>>, vector<1x128xf32>
      %14 = vector.broadcast %13 : vector<1x128xf32> to vector<8x128xf32>
      %15 = arith.addf %12, %14 : vector<8x128xf32>
      %c0_14 = arith.constant 0 : index
      %c0_15 = arith.constant 0 : index
      %16 = vector.load %arg6[%c0_14, %c0_15] : memref<8x128xf32, #tpu.memory_space<vmem>>, vector<8x128xf32>
      tpu.vector_store %arg6[%c0_14, %c0_15], %15 {strides = array<i32>} : memref<8x128xf32, #tpu.memory_space<vmem>>, vector<8x128xf32>,
    } else {
    }
    return
  }
  func.func @transform_0(%arg0: i32, %arg1: i32, %arg2: i32) -> (i32, i32) {
    %c0_i32 = arith.constant 0 : i32
    return %arg0, %arg2 : i32, i32
  }
  func.func @transform_1(%arg0: i32, %arg1: i32, %arg2: i32) -> (i32, i32) {
    %c0_i32 = arith.constant 0 : i32
    return %arg2, %arg1 : i32, i32
  }
  func.func @transform_2(%arg0: i32, %arg1: i32, %arg2: i32) -> (i32, i32) {
    %c0_i32 = arith.constant 0 : i32
    %c0_i32_0 = arith.constant 0 : i32
    return %c0_i32, %arg1 : i32, i32
  }
  func.func @transform_3(%arg0: i32, %arg1: i32, %arg2: i32) -> (i32, i32) {
    %c0_i32 = arith.constant 0 : i32
    return %arg0, %arg1 : i32, i32
  }
}

module attributes {stable_mosaic.version = 11 : i64} {
  func.func @_match_kernel(%arg0: i32, %arg1: i32, %arg2: memref<1x8x32xbf16, #tpu.memory_space<vmem>>, %arg3: memref<1x128x32xbf16, #tpu.memory_space<vmem>>, %arg4: memref<1x8x128xf32, #tpu.memory_space<vmem>>) attributes {dimension_semantics = [#tpu.dimension_semantics<parallel>, #tpu.dimension_semantics<parallel>], iteration_bounds = array<i64: 2, 1>, scalar_prefetch = 0 : i64, scratch_operands = 0 : i64, tpu.core_type = #tpu.core_type<tc>, window_params = [{transform_indices = @transform_0, window_bounds = array<i64: 1, 8, 32>}, {transform_indices = @transform_1, window_bounds = array<i64: 1, 128, 32>}, {transform_indices = @transform_2, window_bounds = array<i64: 1, 8, 128>}]} {
    %c0 = arith.constant 0 : index
    %c0_0 = arith.constant 0 : index
    %c0_1 = arith.constant 0 : index
    %0 = vector.load %arg2[%c0, %c0_0, %c0_1] : memref<1x8x32xbf16, #tpu.memory_space<vmem>>, vector<1x8x32xbf16>
    %1 = vector.shape_cast %0 : vector<1x8x32xbf16> to vector<8x32xbf16>
    %c0_2 = arith.constant 0 : index
    %c0_3 = arith.constant 0 : index
    %c0_4 = arith.constant 0 : index
    %2 = vector.load %arg3[%c0_2, %c0_3, %c0_4] : memref<1x128x32xbf16, #tpu.memory_space<vmem>>, vector<1x128x32xbf16>
    %3 = vector.shape_cast %2 : vector<1x128x32xbf16> to vector<128x32xbf16>
    %4 = tpu.transpose %3, [1, 0] : vector<128x32xbf16> -> vector<32x128xbf16>
    %cst = arith.constant dense<0.000000e+00> : vector<8x128xf32>
    %5 = tpu.matmul %1, %4, %cst {dimension_numbers = #tpu.dot_dimension_numbers<[1], [0], [0], [1], [0, 0, 1, 1], [], []>} : vector<8x32xbf16>, vector<32x128xbf16>, vector<8x128xf32> -> vector<8x128xf32>
    %c0_5 = arith.constant 0 : index
    %c0_6 = arith.constant 0 : index
    %c0_7 = arith.constant 0 : index
    %6 = vector.load %arg4[%c0_5, %c0_6, %c0_7] : memref<1x8x128xf32, #tpu.memory_space<vmem>>, vector<1x8x128xf32>
    %7 = vector.shape_cast %6 : vector<1x8x128xf32> to vector<8x128xf32>
    %8 = vector.shape_cast %5 : vector<8x128xf32> to vector<1x8x128xf32>
    tpu.vector_store %arg4[%c0_5, %c0_6, %c0_7], %8 {strides = array<i32>} : memref<1x8x128xf32, #tpu.memory_space<vmem>>, vector<1x8x128xf32>,
    return
  }
  func.func @transform_0(%arg0: i32, %arg1: i32) -> (i32, i32, i32) {
    %c0_i32 = arith.constant 0 : i32
    %c0_i32_0 = arith.constant 0 : i32
    return %arg0, %arg1, %c0_i32 : i32, i32, i32
  }
  func.func @transform_1(%arg0: i32, %arg1: i32) -> (i32, i32, i32) {
    %c0_i32 = arith.constant 0 : i32
    %c0_i32_0 = arith.constant 0 : i32
    %c0_i32_1 = arith.constant 0 : i32
    return %arg0, %c0_i32, %c0_i32_0 : i32, i32, i32
  }
  func.func @transform_2(%arg0: i32, %arg1: i32) -> (i32, i32, i32) {
    %c0_i32 = arith.constant 0 : i32
    %c0_i32_0 = arith.constant 0 : i32
    return %arg0, %arg1, %c0_i32 : i32, i32, i32
  }
}

module attributes {stable_mosaic.version = 11 : i64} {
  func.func @_conv3x3_kernel(%arg0: i32, %arg1: i32, %arg2: memref<1x4x4x32xbf16, #tpu.memory_space<vmem>>, %arg3: memref<288x128xbf16, #tpu.memory_space<vmem>>, %arg4: memref<1x128xf32, #tpu.memory_space<vmem>>, %arg5: memref<1x2x2x128xf32, #tpu.memory_space<vmem>>) attributes {dimension_semantics = [#tpu.dimension_semantics<parallel>, #tpu.dimension_semantics<parallel>], iteration_bounds = array<i64: 2, 3>, scalar_prefetch = 0 : i64, scratch_operands = 0 : i64, tpu.core_type = #tpu.core_type<tc>, window_params = [{transform_indices = @transform_0, window_bounds = array<i64: 1, 4, 4, 32>}, {transform_indices = @transform_1, window_bounds = array<i64: 288, 128>}, {transform_indices = @transform_2, window_bounds = array<i64: 1, 128>}, {transform_indices = @transform_3, window_bounds = array<i64: 1, 2, 2, 128>}]} {
    %c0 = arith.constant 0 : index
    %c0_0 = arith.constant 0 : index
    %0 = vector.load %arg4[%c0, %c0_0] : memref<1x128xf32, #tpu.memory_space<vmem>>, vector<1x128xf32>
    %c0_i32 = arith.constant 0 : i32
    %c2_i32 = arith.constant 2 : i32
    %1 = arith.addi %c0_i32, %c2_i32 : i32
    %c1_i32 = arith.constant 1 : i32
    scf.for %arg6 = %c0_i32 to %1 step %c1_i32  : i32 {
      %cst = arith.constant 0.000000e+00 : f32
      %2 = vector.broadcast %cst : f32 to vector<2x128xf32>
      %c0_i32_2 = arith.constant 0 : i32
      %3 = arith.addi %arg6, %c0_i32_2 : i32
      %c0_3 = arith.constant 0 : index
      %4 = arith.index_cast %3 : i32 to index
      %c0_4 = arith.constant 0 : index
      %c0_5 = arith.constant 0 : index
      %5 = vector.load %arg2[%c0_3, %4, %c0_4, %c0_5] : memref<1x4x4x32xbf16, #tpu.memory_space<vmem>>, vector<1x1x2x32xbf16>
      %6 = vector.shape_cast %5 : vector<1x1x2x32xbf16> to vector<2x32xbf16>
      %c0_6 = arith.constant 0 : index
      %c0_7 = arith.constant 0 : index
      %7 = vector.load %arg3[%c0_6, %c0_7] : memref<288x128xbf16, #tpu.memory_space<vmem>>, vector<32x128xbf16>
      %cst_8 = arith.constant dense<0.000000e+00> : vector<2x128xf32>
      %8 = tpu.matmul %6, %7, %cst_8 {dimension_numbers = #tpu.dot_dimension_numbers<[1], [0], [0], [1], [0, 0, 1, 1], [], []>} : vector<2x32xbf16>, vector<32x128xbf16>, vector<2x128xf32> -> vector<2x128xf32>
      %9 = arith.addf %2, %8 : vector<2x128xf32>
      %c0_i32_9 = arith.constant 0 : i32
      %10 = arith.addi %arg6, %c0_i32_9 : i32
      %c0_10 = arith.constant 0 : index
      %11 = arith.index_cast %10 : i32 to index
      %c1 = arith.constant 1 : index
      %c0_11 = arith.constant 0 : index
      %12 = vector.load %arg2[%c0_10, %11, %c1, %c0_11] : memref<1x4x4x32xbf16, #tpu.memory_space<vmem>>, vector<1x1x2x32xbf16>
      %13 = vector.shape_cast %12 : vector<1x1x2x32xbf16> to vector<2x32xbf16>
      %c32 = arith.constant 32 : index
      %c0_12 = arith.constant 0 : index
      %14 = vector.load %arg3[%c32, %c0_12] : memref<288x128xbf16, #tpu.memory_space<vmem>>, vector<32x128xbf16>
      %cst_13 = arith.constant dense<0.000000e+00> : vector<2x128xf32>
      %15 = tpu.matmul %13, %14, %cst_13 {dimension_numbers = #tpu.dot_dimension_numbers<[1], [0], [0], [1], [0, 0, 1, 1], [], []>} : vector<2x32xbf16>, vector<32x128xbf16>, vector<2x128xf32> -> vector<2x128xf32>
      %16 = arith.addf %9, %15 : vector<2x128xf32>
      %c0_i32_14 = arith.constant 0 : i32
      %17 = arith.addi %arg6, %c0_i32_14 : i32
      %c0_15 = arith.constant 0 : index
      %18 = arith.index_cast %17 : i32 to index
      %c2 = arith.constant 2 : index
      %c0_16 = arith.constant 0 : index
      %19 = vector.load %arg2[%c0_15, %18, %c2, %c0_16] : memref<1x4x4x32xbf16, #tpu.memory_space<vmem>>, vector<1x1x2x32xbf16>
      %20 = vector.shape_cast %19 : vector<1x1x2x32xbf16> to vector<2x32xbf16>
      %c64 = arith.constant 64 : index
      %c0_17 = arith.constant 0 : index
      %21 = vector.load %arg3[%c64, %c0_17] : memref<288x128xbf16, #tpu.memory_space<vmem>>, vector<32x128xbf16>
      %cst_18 = arith.constant dense<0.000000e+00> : vector<2x128xf32>
      %22 = tpu.matmul %20, %21, %cst_18 {dimension_numbers = #tpu.dot_dimension_numbers<[1], [0], [0], [1], [0, 0, 1, 1], [], []>} : vector<2x32xbf16>, vector<32x128xbf16>, vector<2x128xf32> -> vector<2x128xf32>
      %23 = arith.addf %16, %22 : vector<2x128xf32>
      %c1_i32_19 = arith.constant 1 : i32
      %24 = arith.addi %arg6, %c1_i32_19 : i32
      %c0_20 = arith.constant 0 : index
      %25 = arith.index_cast %24 : i32 to index
      %c0_21 = arith.constant 0 : index
      %c0_22 = arith.constant 0 : index
      %26 = vector.load %arg2[%c0_20, %25, %c0_21, %c0_22] : memref<1x4x4x32xbf16, #tpu.memory_space<vmem>>, vector<1x1x2x32xbf16>
      %27 = vector.shape_cast %26 : vector<1x1x2x32xbf16> to vector<2x32xbf16>
      %c96 = arith.constant 96 : index
      %c0_23 = arith.constant 0 : index
      %28 = vector.load %arg3[%c96, %c0_23] : memref<288x128xbf16, #tpu.memory_space<vmem>>, vector<32x128xbf16>
      %cst_24 = arith.constant dense<0.000000e+00> : vector<2x128xf32>
      %29 = tpu.matmul %27, %28, %cst_24 {dimension_numbers = #tpu.dot_dimension_numbers<[1], [0], [0], [1], [0, 0, 1, 1], [], []>} : vector<2x32xbf16>, vector<32x128xbf16>, vector<2x128xf32> -> vector<2x128xf32>
      %30 = arith.addf %23, %29 : vector<2x128xf32>
      %c1_i32_25 = arith.constant 1 : i32
      %31 = arith.addi %arg6, %c1_i32_25 : i32
      %c0_26 = arith.constant 0 : index
      %32 = arith.index_cast %31 : i32 to index
      %c1_27 = arith.constant 1 : index
      %c0_28 = arith.constant 0 : index
      %33 = vector.load %arg2[%c0_26, %32, %c1_27, %c0_28] : memref<1x4x4x32xbf16, #tpu.memory_space<vmem>>, vector<1x1x2x32xbf16>
      %34 = vector.shape_cast %33 : vector<1x1x2x32xbf16> to vector<2x32xbf16>
      %c128 = arith.constant 128 : index
      %c0_29 = arith.constant 0 : index
      %35 = vector.load %arg3[%c128, %c0_29] : memref<288x128xbf16, #tpu.memory_space<vmem>>, vector<32x128xbf16>
      %cst_30 = arith.constant dense<0.000000e+00> : vector<2x128xf32>
      %36 = tpu.matmul %34, %35, %cst_30 {dimension_numbers = #tpu.dot_dimension_numbers<[1], [0], [0], [1], [0, 0, 1, 1], [], []>} : vector<2x32xbf16>, vector<32x128xbf16>, vector<2x128xf32> -> vector<2x128xf32>
      %37 = arith.addf %30, %36 : vector<2x128xf32>
      %c1_i32_31 = arith.constant 1 : i32
      %38 = arith.addi %arg6, %c1_i32_31 : i32
      %c0_32 = arith.constant 0 : index
      %39 = arith.index_cast %38 : i32 to index
      %c2_33 = arith.constant 2 : index
      %c0_34 = arith.constant 0 : index
      %40 = vector.load %arg2[%c0_32, %39, %c2_33, %c0_34] : memref<1x4x4x32xbf16, #tpu.memory_space<vmem>>, vector<1x1x2x32xbf16>
      %41 = vector.shape_cast %40 : vector<1x1x2x32xbf16> to vector<2x32xbf16>
      %c160 = arith.constant 160 : index
      %c0_35 = arith.constant 0 : index
      %42 = vector.load %arg3[%c160, %c0_35] : memref<288x128xbf16, #tpu.memory_space<vmem>>, vector<32x128xbf16>
      %cst_36 = arith.constant dense<0.000000e+00> : vector<2x128xf32>
      %43 = tpu.matmul %41, %42, %cst_36 {dimension_numbers = #tpu.dot_dimension_numbers<[1], [0], [0], [1], [0, 0, 1, 1], [], []>} : vector<2x32xbf16>, vector<32x128xbf16>, vector<2x128xf32> -> vector<2x128xf32>
      %44 = arith.addf %37, %43 : vector<2x128xf32>
      %c2_i32_37 = arith.constant 2 : i32
      %45 = arith.addi %arg6, %c2_i32_37 : i32
      %c0_38 = arith.constant 0 : index
      %46 = arith.index_cast %45 : i32 to index
      %c0_39 = arith.constant 0 : index
      %c0_40 = arith.constant 0 : index
      %47 = vector.load %arg2[%c0_38, %46, %c0_39, %c0_40] : memref<1x4x4x32xbf16, #tpu.memory_space<vmem>>, vector<1x1x2x32xbf16>
      %48 = vector.shape_cast %47 : vector<1x1x2x32xbf16> to vector<2x32xbf16>
      %c192 = arith.constant 192 : index
      %c0_41 = arith.constant 0 : index
      %49 = vector.load %arg3[%c192, %c0_41] : memref<288x128xbf16, #tpu.memory_space<vmem>>, vector<32x128xbf16>
      %cst_42 = arith.constant dense<0.000000e+00> : vector<2x128xf32>
      %50 = tpu.matmul %48, %49, %cst_42 {dimension_numbers = #tpu.dot_dimension_numbers<[1], [0], [0], [1], [0, 0, 1, 1], [], []>} : vector<2x32xbf16>, vector<32x128xbf16>, vector<2x128xf32> -> vector<2x128xf32>
      %51 = arith.addf %44, %50 : vector<2x128xf32>
      %c2_i32_43 = arith.constant 2 : i32
      %52 = arith.addi %arg6, %c2_i32_43 : i32
      %c0_44 = arith.constant 0 : index
      %53 = arith.index_cast %52 : i32 to index
      %c1_45 = arith.constant 1 : index
      %c0_46 = arith.constant 0 : index
      %54 = vector.load %arg2[%c0_44, %53, %c1_45, %c0_46] : memref<1x4x4x32xbf16, #tpu.memory_space<vmem>>, vector<1x1x2x32xbf16>
      %55 = vector.shape_cast %54 : vector<1x1x2x32xbf16> to vector<2x32xbf16>
      %c224 = arith.constant 224 : index
      %c0_47 = arith.constant 0 : index
      %56 = vector.load %arg3[%c224, %c0_47] : memref<288x128xbf16, #tpu.memory_space<vmem>>, vector<32x128xbf16>
      %cst_48 = arith.constant dense<0.000000e+00> : vector<2x128xf32>
      %57 = tpu.matmul %55, %56, %cst_48 {dimension_numbers = #tpu.dot_dimension_numbers<[1], [0], [0], [1], [0, 0, 1, 1], [], []>} : vector<2x32xbf16>, vector<32x128xbf16>, vector<2x128xf32> -> vector<2x128xf32>
      %58 = arith.addf %51, %57 : vector<2x128xf32>
      %c2_i32_49 = arith.constant 2 : i32
      %59 = arith.addi %arg6, %c2_i32_49 : i32
      %c0_50 = arith.constant 0 : index
      %60 = arith.index_cast %59 : i32 to index
      %c2_51 = arith.constant 2 : index
      %c0_52 = arith.constant 0 : index
      %61 = vector.load %arg2[%c0_50, %60, %c2_51, %c0_52] : memref<1x4x4x32xbf16, #tpu.memory_space<vmem>>, vector<1x1x2x32xbf16>
      %62 = vector.shape_cast %61 : vector<1x1x2x32xbf16> to vector<2x32xbf16>
      %c256 = arith.constant 256 : index
      %c0_53 = arith.constant 0 : index
      %63 = vector.load %arg3[%c256, %c0_53] : memref<288x128xbf16, #tpu.memory_space<vmem>>, vector<32x128xbf16>
      %cst_54 = arith.constant dense<0.000000e+00> : vector<2x128xf32>
      %64 = tpu.matmul %62, %63, %cst_54 {dimension_numbers = #tpu.dot_dimension_numbers<[1], [0], [0], [1], [0, 0, 1, 1], [], []>} : vector<2x32xbf16>, vector<32x128xbf16>, vector<2x128xf32> -> vector<2x128xf32>
      %65 = arith.addf %58, %64 : vector<2x128xf32>
      %66 = vector.broadcast %0 : vector<1x128xf32> to vector<2x128xf32>
      %67 = arith.addf %65, %66 : vector<2x128xf32>
      %cst_55 = arith.constant 0.000000e+00 : f32
      %68 = vector.broadcast %cst_55 : f32 to vector<2x128xf32>
      %69 = arith.maximumf %67, %68 : vector<2x128xf32>
      %c0_56 = arith.constant 0 : index
      %70 = arith.index_cast %arg6 : i32 to index
      %c0_57 = arith.constant 0 : index
      %c0_58 = arith.constant 0 : index
      %71 = vector.load %arg5[%c0_56, %70, %c0_57, %c0_58] : memref<1x2x2x128xf32, #tpu.memory_space<vmem>>, vector<1x1x2x128xf32>
      %72 = vector.shape_cast %71 : vector<1x1x2x128xf32> to vector<2x128xf32>
      %73 = vector.shape_cast %69 : vector<2x128xf32> to vector<1x1x2x128xf32>
      tpu.vector_store %arg5[%c0_56, %70, %c0_57, %c0_58], %73 {strides = array<i32>} : memref<1x2x2x128xf32, #tpu.memory_space<vmem>>, vector<1x1x2x128xf32>,
    }
    %c2_i32_1 = arith.constant 2 : i32
    return
  }
  func.func @transform_0(%arg0: i32, %arg1: i32) -> (i32, i32, i32, i32) {
    %c0_i32 = arith.constant 0 : i32
    %c0_i32_0 = arith.constant 0 : i32
    %c0_i32_1 = arith.constant 0 : i32
    %c0_i32_2 = arith.constant 0 : i32
    return %arg0, %c0_i32, %c0_i32_0, %c0_i32_1 : i32, i32, i32, i32
  }
  func.func @transform_1(%arg0: i32, %arg1: i32) -> (i32, i32) {
    %c0_i32 = arith.constant 0 : i32
    %c0_i32_0 = arith.constant 0 : i32
    return %c0_i32, %arg1 : i32, i32
  }
  func.func @transform_2(%arg0: i32, %arg1: i32) -> (i32, i32) {
    %c0_i32 = arith.constant 0 : i32
    %c0_i32_0 = arith.constant 0 : i32
    return %c0_i32, %arg1 : i32, i32
  }
  func.func @transform_3(%arg0: i32, %arg1: i32) -> (i32, i32, i32, i32) {
    %c0_i32 = arith.constant 0 : i32
    %c0_i32_0 = arith.constant 0 : i32
    %c0_i32_1 = arith.constant 0 : i32
    return %arg0, %c0_i32, %c0_i32_0, %arg1 : i32, i32, i32, i32
  }
}

module attributes {stable_mosaic.version = 11 : i64} {
  func.func @_conv3x3_kernel(%arg0: i32, %arg1: i32, %arg2: memref<1x4x4x128xbf16, #tpu.memory_space<vmem>>, %arg3: memref<1152x128xbf16, #tpu.memory_space<vmem>>, %arg4: memref<1x128xf32, #tpu.memory_space<vmem>>, %arg5: memref<1x2x2x128xf32, #tpu.memory_space<vmem>>) attributes {dimension_semantics = [#tpu.dimension_semantics<parallel>, #tpu.dimension_semantics<parallel>], iteration_bounds = array<i64: 2, 1>, scalar_prefetch = 0 : i64, scratch_operands = 0 : i64, tpu.core_type = #tpu.core_type<tc>, window_params = [{transform_indices = @transform_0, window_bounds = array<i64: 1, 4, 4, 128>}, {transform_indices = @transform_1, window_bounds = array<i64: 1152, 128>}, {transform_indices = @transform_2, window_bounds = array<i64: 1, 128>}, {transform_indices = @transform_3, window_bounds = array<i64: 1, 2, 2, 128>}]} {
    %c0 = arith.constant 0 : index
    %c0_0 = arith.constant 0 : index
    %0 = vector.load %arg4[%c0, %c0_0] : memref<1x128xf32, #tpu.memory_space<vmem>>, vector<1x128xf32>
    %c0_i32 = arith.constant 0 : i32
    %c2_i32 = arith.constant 2 : i32
    %1 = arith.addi %c0_i32, %c2_i32 : i32
    %c1_i32 = arith.constant 1 : i32
    scf.for %arg6 = %c0_i32 to %1 step %c1_i32  : i32 {
      %cst = arith.constant 0.000000e+00 : f32
      %2 = vector.broadcast %cst : f32 to vector<2x128xf32>
      %c0_i32_2 = arith.constant 0 : i32
      %3 = arith.addi %arg6, %c0_i32_2 : i32
      %c0_3 = arith.constant 0 : index
      %4 = arith.index_cast %3 : i32 to index
      %c0_4 = arith.constant 0 : index
      %c0_5 = arith.constant 0 : index
      %5 = vector.load %arg2[%c0_3, %4, %c0_4, %c0_5] : memref<1x4x4x128xbf16, #tpu.memory_space<vmem>>, vector<1x1x2x128xbf16>
      %6 = vector.shape_cast %5 : vector<1x1x2x128xbf16> to vector<2x128xbf16>
      %c0_6 = arith.constant 0 : index
      %c0_7 = arith.constant 0 : index
      %7 = vector.load %arg3[%c0_6, %c0_7] : memref<1152x128xbf16, #tpu.memory_space<vmem>>, vector<128x128xbf16>
      %cst_8 = arith.constant dense<0.000000e+00> : vector<2x128xf32>
      %8 = tpu.matmul %6, %7, %cst_8 {dimension_numbers = #tpu.dot_dimension_numbers<[1], [0], [0], [1], [0, 0, 1, 1], [], []>} : vector<2x128xbf16>, vector<128x128xbf16>, vector<2x128xf32> -> vector<2x128xf32>
      %9 = arith.addf %2, %8 : vector<2x128xf32>
      %c0_i32_9 = arith.constant 0 : i32
      %10 = arith.addi %arg6, %c0_i32_9 : i32
      %c0_10 = arith.constant 0 : index
      %11 = arith.index_cast %10 : i32 to index
      %c1 = arith.constant 1 : index
      %c0_11 = arith.constant 0 : index
      %12 = vector.load %arg2[%c0_10, %11, %c1, %c0_11] : memref<1x4x4x128xbf16, #tpu.memory_space<vmem>>, vector<1x1x2x128xbf16>
      %13 = vector.shape_cast %12 : vector<1x1x2x128xbf16> to vector<2x128xbf16>
      %c128 = arith.constant 128 : index
      %c0_12 = arith.constant 0 : index
      %14 = vector.load %arg3[%c128, %c0_12] : memref<1152x128xbf16, #tpu.memory_space<vmem>>, vector<128x128xbf16>
      %cst_13 = arith.constant dense<0.000000e+00> : vector<2x128xf32>
      %15 = tpu.matmul %13, %14, %cst_13 {dimension_numbers = #tpu.dot_dimension_numbers<[1], [0], [0], [1], [0, 0, 1, 1], [], []>} : vector<2x128xbf16>, vector<128x128xbf16>, vector<2x128xf32> -> vector<2x128xf32>
      %16 = arith.addf %9, %15 : vector<2x128xf32>
      %c0_i32_14 = arith.constant 0 : i32
      %17 = arith.addi %arg6, %c0_i32_14 : i32
      %c0_15 = arith.constant 0 : index
      %18 = arith.index_cast %17 : i32 to index
      %c2 = arith.constant 2 : index
      %c0_16 = arith.constant 0 : index
      %19 = vector.load %arg2[%c0_15, %18, %c2, %c0_16] : memref<1x4x4x128xbf16, #tpu.memory_space<vmem>>, vector<1x1x2x128xbf16>
      %20 = vector.shape_cast %19 : vector<1x1x2x128xbf16> to vector<2x128xbf16>
      %c256 = arith.constant 256 : index
      %c0_17 = arith.constant 0 : index
      %21 = vector.load %arg3[%c256, %c0_17] : memref<1152x128xbf16, #tpu.memory_space<vmem>>, vector<128x128xbf16>
      %cst_18 = arith.constant dense<0.000000e+00> : vector<2x128xf32>
      %22 = tpu.matmul %20, %21, %cst_18 {dimension_numbers = #tpu.dot_dimension_numbers<[1], [0], [0], [1], [0, 0, 1, 1], [], []>} : vector<2x128xbf16>, vector<128x128xbf16>, vector<2x128xf32> -> vector<2x128xf32>
      %23 = arith.addf %16, %22 : vector<2x128xf32>
      %c1_i32_19 = arith.constant 1 : i32
      %24 = arith.addi %arg6, %c1_i32_19 : i32
      %c0_20 = arith.constant 0 : index
      %25 = arith.index_cast %24 : i32 to index
      %c0_21 = arith.constant 0 : index
      %c0_22 = arith.constant 0 : index
      %26 = vector.load %arg2[%c0_20, %25, %c0_21, %c0_22] : memref<1x4x4x128xbf16, #tpu.memory_space<vmem>>, vector<1x1x2x128xbf16>
      %27 = vector.shape_cast %26 : vector<1x1x2x128xbf16> to vector<2x128xbf16>
      %c384 = arith.constant 384 : index
      %c0_23 = arith.constant 0 : index
      %28 = vector.load %arg3[%c384, %c0_23] : memref<1152x128xbf16, #tpu.memory_space<vmem>>, vector<128x128xbf16>
      %cst_24 = arith.constant dense<0.000000e+00> : vector<2x128xf32>
      %29 = tpu.matmul %27, %28, %cst_24 {dimension_numbers = #tpu.dot_dimension_numbers<[1], [0], [0], [1], [0, 0, 1, 1], [], []>} : vector<2x128xbf16>, vector<128x128xbf16>, vector<2x128xf32> -> vector<2x128xf32>
      %30 = arith.addf %23, %29 : vector<2x128xf32>
      %c1_i32_25 = arith.constant 1 : i32
      %31 = arith.addi %arg6, %c1_i32_25 : i32
      %c0_26 = arith.constant 0 : index
      %32 = arith.index_cast %31 : i32 to index
      %c1_27 = arith.constant 1 : index
      %c0_28 = arith.constant 0 : index
      %33 = vector.load %arg2[%c0_26, %32, %c1_27, %c0_28] : memref<1x4x4x128xbf16, #tpu.memory_space<vmem>>, vector<1x1x2x128xbf16>
      %34 = vector.shape_cast %33 : vector<1x1x2x128xbf16> to vector<2x128xbf16>
      %c512 = arith.constant 512 : index
      %c0_29 = arith.constant 0 : index
      %35 = vector.load %arg3[%c512, %c0_29] : memref<1152x128xbf16, #tpu.memory_space<vmem>>, vector<128x128xbf16>
      %cst_30 = arith.constant dense<0.000000e+00> : vector<2x128xf32>
      %36 = tpu.matmul %34, %35, %cst_30 {dimension_numbers = #tpu.dot_dimension_numbers<[1], [0], [0], [1], [0, 0, 1, 1], [], []>} : vector<2x128xbf16>, vector<128x128xbf16>, vector<2x128xf32> -> vector<2x128xf32>
      %37 = arith.addf %30, %36 : vector<2x128xf32>
      %c1_i32_31 = arith.constant 1 : i32
      %38 = arith.addi %arg6, %c1_i32_31 : i32
      %c0_32 = arith.constant 0 : index
      %39 = arith.index_cast %38 : i32 to index
      %c2_33 = arith.constant 2 : index
      %c0_34 = arith.constant 0 : index
      %40 = vector.load %arg2[%c0_32, %39, %c2_33, %c0_34] : memref<1x4x4x128xbf16, #tpu.memory_space<vmem>>, vector<1x1x2x128xbf16>
      %41 = vector.shape_cast %40 : vector<1x1x2x128xbf16> to vector<2x128xbf16>
      %c640 = arith.constant 640 : index
      %c0_35 = arith.constant 0 : index
      %42 = vector.load %arg3[%c640, %c0_35] : memref<1152x128xbf16, #tpu.memory_space<vmem>>, vector<128x128xbf16>
      %cst_36 = arith.constant dense<0.000000e+00> : vector<2x128xf32>
      %43 = tpu.matmul %41, %42, %cst_36 {dimension_numbers = #tpu.dot_dimension_numbers<[1], [0], [0], [1], [0, 0, 1, 1], [], []>} : vector<2x128xbf16>, vector<128x128xbf16>, vector<2x128xf32> -> vector<2x128xf32>
      %44 = arith.addf %37, %43 : vector<2x128xf32>
      %c2_i32_37 = arith.constant 2 : i32
      %45 = arith.addi %arg6, %c2_i32_37 : i32
      %c0_38 = arith.constant 0 : index
      %46 = arith.index_cast %45 : i32 to index
      %c0_39 = arith.constant 0 : index
      %c0_40 = arith.constant 0 : index
      %47 = vector.load %arg2[%c0_38, %46, %c0_39, %c0_40] : memref<1x4x4x128xbf16, #tpu.memory_space<vmem>>, vector<1x1x2x128xbf16>
      %48 = vector.shape_cast %47 : vector<1x1x2x128xbf16> to vector<2x128xbf16>
      %c768 = arith.constant 768 : index
      %c0_41 = arith.constant 0 : index
      %49 = vector.load %arg3[%c768, %c0_41] : memref<1152x128xbf16, #tpu.memory_space<vmem>>, vector<128x128xbf16>
      %cst_42 = arith.constant dense<0.000000e+00> : vector<2x128xf32>
      %50 = tpu.matmul %48, %49, %cst_42 {dimension_numbers = #tpu.dot_dimension_numbers<[1], [0], [0], [1], [0, 0, 1, 1], [], []>} : vector<2x128xbf16>, vector<128x128xbf16>, vector<2x128xf32> -> vector<2x128xf32>
      %51 = arith.addf %44, %50 : vector<2x128xf32>
      %c2_i32_43 = arith.constant 2 : i32
      %52 = arith.addi %arg6, %c2_i32_43 : i32
      %c0_44 = arith.constant 0 : index
      %53 = arith.index_cast %52 : i32 to index
      %c1_45 = arith.constant 1 : index
      %c0_46 = arith.constant 0 : index
      %54 = vector.load %arg2[%c0_44, %53, %c1_45, %c0_46] : memref<1x4x4x128xbf16, #tpu.memory_space<vmem>>, vector<1x1x2x128xbf16>
      %55 = vector.shape_cast %54 : vector<1x1x2x128xbf16> to vector<2x128xbf16>
      %c896 = arith.constant 896 : index
      %c0_47 = arith.constant 0 : index
      %56 = vector.load %arg3[%c896, %c0_47] : memref<1152x128xbf16, #tpu.memory_space<vmem>>, vector<128x128xbf16>
      %cst_48 = arith.constant dense<0.000000e+00> : vector<2x128xf32>
      %57 = tpu.matmul %55, %56, %cst_48 {dimension_numbers = #tpu.dot_dimension_numbers<[1], [0], [0], [1], [0, 0, 1, 1], [], []>} : vector<2x128xbf16>, vector<128x128xbf16>, vector<2x128xf32> -> vector<2x128xf32>
      %58 = arith.addf %51, %57 : vector<2x128xf32>
      %c2_i32_49 = arith.constant 2 : i32
      %59 = arith.addi %arg6, %c2_i32_49 : i32
      %c0_50 = arith.constant 0 : index
      %60 = arith.index_cast %59 : i32 to index
      %c2_51 = arith.constant 2 : index
      %c0_52 = arith.constant 0 : index
      %61 = vector.load %arg2[%c0_50, %60, %c2_51, %c0_52] : memref<1x4x4x128xbf16, #tpu.memory_space<vmem>>, vector<1x1x2x128xbf16>
      %62 = vector.shape_cast %61 : vector<1x1x2x128xbf16> to vector<2x128xbf16>
      %c1024 = arith.constant 1024 : index
      %c0_53 = arith.constant 0 : index
      %63 = vector.load %arg3[%c1024, %c0_53] : memref<1152x128xbf16, #tpu.memory_space<vmem>>, vector<128x128xbf16>
      %cst_54 = arith.constant dense<0.000000e+00> : vector<2x128xf32>
      %64 = tpu.matmul %62, %63, %cst_54 {dimension_numbers = #tpu.dot_dimension_numbers<[1], [0], [0], [1], [0, 0, 1, 1], [], []>} : vector<2x128xbf16>, vector<128x128xbf16>, vector<2x128xf32> -> vector<2x128xf32>
      %65 = arith.addf %58, %64 : vector<2x128xf32>
      %66 = vector.broadcast %0 : vector<1x128xf32> to vector<2x128xf32>
      %67 = arith.addf %65, %66 : vector<2x128xf32>
      %cst_55 = arith.constant 0.000000e+00 : f32
      %68 = vector.broadcast %cst_55 : f32 to vector<2x128xf32>
      %69 = arith.maximumf %67, %68 : vector<2x128xf32>
      %c0_56 = arith.constant 0 : index
      %70 = arith.index_cast %arg6 : i32 to index
      %c0_57 = arith.constant 0 : index
      %c0_58 = arith.constant 0 : index
      %71 = vector.load %arg5[%c0_56, %70, %c0_57, %c0_58] : memref<1x2x2x128xf32, #tpu.memory_space<vmem>>, vector<1x1x2x128xf32>
      %72 = vector.shape_cast %71 : vector<1x1x2x128xf32> to vector<2x128xf32>
      %73 = vector.shape_cast %69 : vector<2x128xf32> to vector<1x1x2x128xf32>
      tpu.vector_store %arg5[%c0_56, %70, %c0_57, %c0_58], %73 {strides = array<i32>} : memref<1x2x2x128xf32, #tpu.memory_space<vmem>>, vector<1x1x2x128xf32>,
    }
    %c2_i32_1 = arith.constant 2 : i32
    return
  }
  func.func @transform_0(%arg0: i32, %arg1: i32) -> (i32, i32, i32, i32) {
    %c0_i32 = arith.constant 0 : i32
    %c0_i32_0 = arith.constant 0 : i32
    %c0_i32_1 = arith.constant 0 : i32
    %c0_i32_2 = arith.constant 0 : i32
    return %arg0, %c0_i32, %c0_i32_0, %c0_i32_1 : i32, i32, i32, i32
  }
  func.func @transform_1(%arg0: i32, %arg1: i32) -> (i32, i32) {
    %c0_i32 = arith.constant 0 : i32
    %c0_i32_0 = arith.constant 0 : i32
    return %c0_i32, %arg1 : i32, i32
  }
  func.func @transform_2(%arg0: i32, %arg1: i32) -> (i32, i32) {
    %c0_i32 = arith.constant 0 : i32
    %c0_i32_0 = arith.constant 0 : i32
    return %c0_i32, %arg1 : i32, i32
  }
  func.func @transform_3(%arg0: i32, %arg1: i32) -> (i32, i32, i32, i32) {
    %c0_i32 = arith.constant 0 : i32
    %c0_i32_0 = arith.constant 0 : i32
    %c0_i32_1 = arith.constant 0 : i32
    return %arg0, %c0_i32, %c0_i32_0, %arg1 : i32, i32, i32, i32
  }
}

module attributes {stable_mosaic.version = 11 : i64} {
  func.func @_matmul_kernel(%arg0: i32, %arg1: i32, %arg2: i32, %arg3: memref<8x64xbf16, #tpu.memory_space<vmem>>, %arg4: memref<64x128xbf16, #tpu.memory_space<vmem>>, %arg5: memref<1x128xf32, #tpu.memory_space<vmem>>, %arg6: memref<8x128xf32, #tpu.memory_space<vmem>>, %arg7: memref<8x128xf32, #tpu.memory_space<vmem>>) attributes {dimension_semantics = [#tpu.dimension_semantics<parallel>, #tpu.dimension_semantics<parallel>, #tpu.dimension_semantics<arbitrary>], iteration_bounds = array<i64: 1, 1, 1>, scalar_prefetch = 0 : i64, scratch_operands = 1 : i64, tpu.core_type = #tpu.core_type<tc>, window_params = [{transform_indices = @transform_0, window_bounds = array<i64: 8, 64>}, {transform_indices = @transform_1, window_bounds = array<i64: 64, 128>}, {transform_indices = @transform_2, window_bounds = array<i64: 1, 128>}, {transform_indices = @transform_3, window_bounds = array<i64: 8, 128>}]} {
    %c0_i32 = arith.constant 0 : i32
    %0 = arith.cmpi eq, %arg2, %c0_i32 : i32
    %1 = arith.extui %0 : i1 to i32
    %c0_i32_0 = arith.constant 0 : i32
    %2 = arith.cmpi ne, %1, %c0_i32_0 : i32
    scf.if %2 {
      %cst_10 = arith.constant 0.000000e+00 : f32
      %12 = vector.broadcast %cst_10 : f32 to vector<8x128xf32>
      %c0_11 = arith.constant 0 : index
      %c0_12 = arith.constant 0 : index
      %13 = vector.load %arg7[%c0_11, %c0_12] : memref<8x128xf32, #tpu.memory_space<vmem>>, vector<8x128xf32>
      tpu.vector_store %arg7[%c0_11, %c0_12], %12 {strides = array<i32>} : memref<8x128xf32, #tpu.memory_space<vmem>>, vector<8x128xf32>,
    } else {
    }
    %c0 = arith.constant 0 : index
    %c0_1 = arith.constant 0 : index
    %3 = vector.load %arg7[%c0, %c0_1] : memref<8x128xf32, #tpu.memory_space<vmem>>, vector<8x128xf32>
    %c0_2 = arith.constant 0 : index
    %c0_3 = arith.constant 0 : index
    %4 = vector.load %arg3[%c0_2, %c0_3] : memref<8x64xbf16, #tpu.memory_space<vmem>>, vector<8x64xbf16>
    %c0_4 = arith.constant 0 : index
    %c0_5 = arith.constant 0 : index
    %5 = vector.load %arg4[%c0_4, %c0_5] : memref<64x128xbf16, #tpu.memory_space<vmem>>, vector<64x128xbf16>
    %cst = arith.constant dense<0.000000e+00> : vector<8x128xf32>
    %6 = tpu.matmul %4, %5, %cst {dimension_numbers = #tpu.dot_dimension_numbers<[1], [0], [0], [1], [0, 0, 1, 1], [], []>} : vector<8x64xbf16>, vector<64x128xbf16>, vector<8x128xf32> -> vector<8x128xf32>
    %7 = arith.addf %3, %6 : vector<8x128xf32>
    %c0_6 = arith.constant 0 : index
    %c0_7 = arith.constant 0 : index
    %8 = vector.load %arg7[%c0_6, %c0_7] : memref<8x128xf32, #tpu.memory_space<vmem>>, vector<8x128xf32>
    tpu.vector_store %arg7[%c0_6, %c0_7], %7 {strides = array<i32>} : memref<8x128xf32, #tpu.memory_space<vmem>>, vector<8x128xf32>,
    %c0_i32_8 = arith.constant 0 : i32
    %9 = arith.cmpi eq, %arg2, %c0_i32_8 : i32
    %10 = arith.extui %9 : i1 to i32
    %c0_i32_9 = arith.constant 0 : i32
    %11 = arith.cmpi ne, %10, %c0_i32_9 : i32
    scf.if %11 {
      %c0_10 = arith.constant 0 : index
      %c0_11 = arith.constant 0 : index
      %12 = vector.load %arg7[%c0_10, %c0_11] : memref<8x128xf32, #tpu.memory_space<vmem>>, vector<8x128xf32>
      %c0_12 = arith.constant 0 : index
      %c0_13 = arith.constant 0 : index
      %13 = vector.load %arg5[%c0_12, %c0_13] : memref<1x128xf32, #tpu.memory_space<vmem>>, vector<1x128xf32>
      %14 = vector.broadcast %13 : vector<1x128xf32> to vector<8x128xf32>
      %15 = arith.addf %12, %14 : vector<8x128xf32>
      %c0_14 = arith.constant 0 : index
      %c0_15 = arith.constant 0 : index
      %16 = vector.load %arg6[%c0_14, %c0_15] : memref<8x128xf32, #tpu.memory_space<vmem>>, vector<8x128xf32>
      tpu.vector_store %arg6[%c0_14, %c0_15], %15 {strides = array<i32>} : memref<8x128xf32, #tpu.memory_space<vmem>>, vector<8x128xf32>,
    } else {
    }
    return
  }
  func.func @transform_0(%arg0: i32, %arg1: i32, %arg2: i32) -> (i32, i32) {
    %c0_i32 = arith.constant 0 : i32
    return %arg0, %arg2 : i32, i32
  }
  func.func @transform_1(%arg0: i32, %arg1: i32, %arg2: i32) -> (i32, i32) {
    %c0_i32 = arith.constant 0 : i32
    return %arg2, %arg1 : i32, i32
  }
  func.func @transform_2(%arg0: i32, %arg1: i32, %arg2: i32) -> (i32, i32) {
    %c0_i32 = arith.constant 0 : i32
    %c0_i32_0 = arith.constant 0 : i32
    return %c0_i32, %arg1 : i32, i32
  }
  func.func @transform_3(%arg0: i32, %arg1: i32, %arg2: i32) -> (i32, i32) {
    %c0_i32 = arith.constant 0 : i32
    return %arg0, %arg1 : i32, i32
  }
}

module attributes {stable_mosaic.version = 11 : i64} {
  func.func @_resize_kernel(%arg0: i32, %arg1: memref<1x2x2xf32, #tpu.memory_space<vmem>>, %arg2: memref<16x2xf32, #tpu.memory_space<vmem>>, %arg3: memref<2x16xf32, #tpu.memory_space<vmem>>, %arg4: memref<1x16x16xf32, #tpu.memory_space<vmem>>) attributes {dimension_semantics = [#tpu.dimension_semantics<parallel>], iteration_bounds = array<i64: 6>, scalar_prefetch = 0 : i64, scratch_operands = 0 : i64, tpu.core_type = #tpu.core_type<tc>, window_params = [{transform_indices = @transform_0, window_bounds = array<i64: 1, 2, 2>}, {pipeline_mode = #tpu.pipeline_mode<synchronous>, transform_indices = @transform_1, window_bounds = array<i64: 16, 2>}, {pipeline_mode = #tpu.pipeline_mode<synchronous>, transform_indices = @transform_2, window_bounds = array<i64: 2, 16>}, {transform_indices = @transform_3, window_bounds = array<i64: 1, 16, 16>}]} {
    %c0 = arith.constant 0 : index
    %c0_0 = arith.constant 0 : index
    %0 = vector.load %arg2[%c0, %c0_0] : memref<16x2xf32, #tpu.memory_space<vmem>>, vector<16x2xf32>
    %c0_1 = arith.constant 0 : index
    %c0_2 = arith.constant 0 : index
    %c0_3 = arith.constant 0 : index
    %1 = vector.load %arg1[%c0_1, %c0_2, %c0_3] : memref<1x2x2xf32, #tpu.memory_space<vmem>>, vector<1x2x2xf32>
    %2 = vector.shape_cast %1 : vector<1x2x2xf32> to vector<2x2xf32>
    %cst = arith.constant dense<0.000000e+00> : vector<16x2xf32>
    %3 = tpu.matmul %0, %2, %cst {dimension_numbers = #tpu.dot_dimension_numbers<[1], [0], [0], [1], [0, 0, 1, 1], [], []>} : vector<16x2xf32>, vector<2x2xf32>, vector<16x2xf32> -> vector<16x2xf32>
    %c0_4 = arith.constant 0 : index
    %c0_5 = arith.constant 0 : index
    %4 = vector.load %arg3[%c0_4, %c0_5] : memref<2x16xf32, #tpu.memory_space<vmem>>, vector<2x16xf32>
    %cst_6 = arith.constant dense<0.000000e+00> : vector<16x16xf32>
    %5 = tpu.matmul %3, %4, %cst_6 {dimension_numbers = #tpu.dot_dimension_numbers<[1], [0], [0], [1], [0, 0, 1, 1], [], []>} : vector<16x2xf32>, vector<2x16xf32>, vector<16x16xf32> -> vector<16x16xf32>
    %c0_7 = arith.constant 0 : index
    %c0_8 = arith.constant 0 : index
    %c0_9 = arith.constant 0 : index
    %6 = vector.load %arg4[%c0_7, %c0_8, %c0_9] : memref<1x16x16xf32, #tpu.memory_space<vmem>>, vector<1x16x16xf32>
    %7 = vector.shape_cast %6 : vector<1x16x16xf32> to vector<16x16xf32>
    %8 = vector.shape_cast %5 : vector<16x16xf32> to vector<1x16x16xf32>
    tpu.vector_store %arg4[%c0_7, %c0_8, %c0_9], %8 {strides = array<i32>} : memref<1x16x16xf32, #tpu.memory_space<vmem>>, vector<1x16x16xf32>,
    return
  }
  func.func @transform_0(%arg0: i32) -> (i32, i32, i32) {
    %c0_i32 = arith.constant 0 : i32
    %c0_i32_0 = arith.constant 0 : i32
    %c0_i32_1 = arith.constant 0 : i32
    return %arg0, %c0_i32, %c0_i32_0 : i32, i32, i32
  }
  func.func @transform_1(%arg0: i32) -> (i32, i32) {
    %c0_i32 = arith.constant 0 : i32
    %c0_i32_0 = arith.constant 0 : i32
    %c0_i32_1 = arith.constant 0 : i32
    return %c0_i32, %c0_i32_0 : i32, i32
  }
  func.func @transform_2(%arg0: i32) -> (i32, i32) {
    %c0_i32 = arith.constant 0 : i32
    %c0_i32_0 = arith.constant 0 : i32
    %c0_i32_1 = arith.constant 0 : i32
    return %c0_i32, %c0_i32_0 : i32, i32
  }
  func.func @transform_3(%arg0: i32) -> (i32, i32, i32) {
    %c0_i32 = arith.constant 0 : i32
    %c0_i32_0 = arith.constant 0 : i32
    %c0_i32_1 = arith.constant 0 : i32
    return %arg0, %c0_i32, %c0_i32_0 : i32, i32, i32
  }
}

</mosaic_0001>

<bundles_post_ra>
// kernel: efficient_counter_forward.15
= control target key start
LH: loop header
LB: loop body
LE: loop exit
PB: predicated region body
PF: predicated region fallthrough
CT: control target
= control target key end

     0   :  { %v126_v0 = vmov 0.0   ;;  %vm127_vm0 = vmmov 0   ;;  %vm41_vm1 = vcmask 261120   ;;  %s171_s1 = inlined_call_operand.vmem [shape: bf16[32,128], index: 1, kind: input, shape index: {}]   ;;  %s172_s0 = inlined_call_operand.vmem [shape: bf16[8,32], index: 0, kind: input, shape index: {}]   ;;  %s173_s2 = inlined_call_operand.vmem [shape: f32[1,128], index: 2, kind: input, shape index: {}]   ;;  %s174_s3 = inlined_call_operand.vmem [shape: f32[8,128], index: 3, kind: input, shape index: {}]   ;;  %s175_s4 = inlined_call_operand.vmem [shape: f32[8,128], index: 4, kind: output, shape index: {}]  }
   0x1   :  { %114 = vmatprep.subr.bf16.mxu0 %v126_v0  ;;  %v124_v1 = vld [vmem:[%s171_s1] sm:$0xff]   ;;  %118 = vmatprep.mubr.msk.bf16.mxu0 %vm127_vm0, %v126_v0  ;;  %v125_v2 = vld [vmem:[%s171_s1 + $0x8] sm:$0xff]  }
   0x2   :  { %115 = vmatpush3.bf16.msra.mxu0 %v124_v1  ;;  %v24_v3 = vld [vmem:[%s172_s0] sm:$0xf] }
   0x3   :  { %116 = vmatprep.subr.bf16.mxu0 %v126_v0  ;;  %v110_v4 = vld [vmem:[%s173_s2] ss:$0 sm:$0xff] }
   0x4   :  { %v100_v8 = vld [vmem:[%s174_s3] sm:$0xff] }
   0x6   :  { %117 = vmatpush3.bf16.msra.mxu0 %v125_v2 }
   0x9   :  { %119 = vmatmul.mubr.msk.bf16.vlgmr.msra.gmra.mrb[0].mxu0 %vm41_vm1, %v24_v3 }
  0xdc   :  { %v79_v5 = vpop.f32.mrb[0].mxu0 }
  0xdd   :  { %v98_v6 = vadd.f32 %v110_v4, %v79_v5  ;;  %v120_v7 = vpop.f32.mrb[1].mxu0 }
  0xde   :  { %v82_v9 = vpop.f32.mrb[2].mxu0 }
  0xdf   :  { %v99_v10 = vmax.f32 %v98_v6, 0.0  ;;  %v121_v11 = vpop.f32.mrb[3].mxu0 }
  0xe1   :  { %v101_v12 = vadd.f32 %v100_v8, %v99_v10 }
  0xe3   :  { %102 = vst [vmem:[%s175_s4] sm:$0xff] %v101_v12 }

// kernel: efficient_counter_forward.14
= control target key start
LH: loop header
LB: loop body
LE: loop exit
PB: predicated region body
PF: predicated region fallthrough
CT: control target
= control target key end

     0   :  { %v218_v0 = vmov 0   ;;  %vm124_vm0 = vcmask 523264   ;;  %s284_s1 = inlined_call_operand.vmem [shape: bf16[192,128], index: 1, kind: input, shape index: {}]   ;;  %s285_s0 = inlined_call_operand.vmem [shape: bf16[8,192], index: 0, kind: input, shape index: {}]   ;;  %s286_s2 = inlined_call_operand.vmem [shape: f32[1,128], index: 2, kind: input, shape index: {}]   ;;  %s287_s3 = inlined_call_operand.vmem [shape: f32[8,128], index: 3, kind: output, shape index: {}]  }
   0x1   :  { %128 = vmatprep.subr.bf16.mxu0 %v218_v0  ;;  %v204_v1 = vld [vmem:[%s284_s1] sm:$0xff]   ;;  %v205_v2 = vld [vmem:[%s284_s1 + $0x8] sm:$0xff]   ;;  %v206_v3 = vld [vmem:[%s284_s1 + $0x10] sm:$0xff]  }
   0x2   :  { %129 = vmatpush1.bf16.msra.mxu0 %v204_v1  ;;  %v207_v4 = vld [vmem:[%s284_s1 + $0x18] sm:$0xff]   ;;  %v21_v5 = vld [vmem:[%s285_s0] sm:$0xff]  ;;  %v209_v8 = vld [vmem:[%s284_s1 + $0x28] sm:$0xff]  }
   0x3   :  { %130 = vmatprep.subr.bf16.mxu0 %v218_v0  ;;  %v188_v6 = vcombine.high %v21_v5, %v21_v5  ;;  %v208_v7 = vld [vmem:[%s284_s1 + $0x20] sm:$0xff]   ;;  %v210_v9 = vld [vmem:[%s284_s1 + $0x30] sm:$0xff]   ;;  %v211_v10 = vld [vmem:[%s284_s1 + $0x38] sm:$0xff]   ;;  %v187_v15 = vcombine.low %v21_v5, %v21_v5 }
   0x4   :  { %v212_v11 = vld [vmem:[%s284_s1 + $0x40] sm:$0xff]   ;;  %v213_v12 = vld [vmem:[%s284_s1 + $0x48] sm:$0xff]   ;;  %v214_v13 = vld [vmem:[%s284_s1 + $0x50] sm:$0xff]  }
   0x5   :  { %201 = vmatprep.mubr.msk.bf16.mxu0 %vm124_vm0, %v188_v6  ;;  %v215_v14 = vld [vmem:[%s284_s1 + $0x58] sm:$0xff]   ;;  %v202_v16 = vld [vmem:[%s286_s2] ss:$0 sm:$0xff] }
   0x6   :  { %131 = vmatpush1.bf16.msra.mxu0 %v205_v2 }
   0x7   :  { %132 = vmatprep.subr.bf16.mxu0 %v218_v0 }
   0xa   :  { %133 = vmatpush1.bf16.msra.mxu0 %v206_v3 }
   0xb   :  { %134 = vmatprep.subr.bf16.mxu0 %v218_v0 }
   0xe   :  { %135 = vmatpush1.bf16.msra.mxu0 %v207_v4 }
   0xf   :  { %136 = vmatprep.subr.bf16.mxu0 %v218_v0 }
  0x12   :  { %137 = vmatpush1.bf16.msra.mxu0 %v208_v7 }
  0x13   :  { %138 = vmatprep.subr.bf16.mxu0 %v218_v0 }
  0x16   :  { %139 = vmatpush1.bf16.msra.mxu0 %v209_v8 }
  0x17   :  { %140 = vmatprep.subr.bf16.mxu0 %v218_v0 }
  0x1a   :  { %141 = vmatpush1.bf16.msra.mxu0 %v210_v9 }
  0x1b   :  { %142 = vmatprep.subr.bf16.mxu0 %v218_v0 }
  0x1e   :  { %143 = vmatpush1.bf16.msra.mxu0 %v211_v10 }
  0x1f   :  { %144 = vmatprep.subr.bf16.mxu0 %v218_v0 }
  0x22   :  { %145 = vmatpush1.bf16.msra.mxu0 %v212_v11 }
  0x23   :  { %146 = vmatprep.subr.bf16.mxu0 %v218_v0 }
  0x26   :  { %147 = vmatpush1.bf16.msra.mxu0 %v213_v12 }
  0x27   :  { %148 = vmatprep.subr.bf16.mxu0 %v218_v0 }
  0x2a   :  { %149 = vmatpush1.bf16.msra.mxu0 %v214_v13 }
  0x2b   :  { %150 = vmatprep.subr.bf16.mxu0 %v218_v0 }
  0x2e   :  { %151 = vmatpush1.bf16.msra.mxu0 %v215_v14 }
  0x31   :  { %161 = vmatmul.mubr.bf16.vlgmr.msra.gmra.mrb[0].mxu0 %v187_v15 }
 0x104   :  { %v162_v17 = vpop.f32.mrb[0].mxu0 }
 0x105   :  { %v181_v18 = vadd.f32 %v202_v16, %v162_v17  ;;  %v164_v19 = vpop.f32.mrb[1].mxu0 }
 0x106   :  { %v165_v20 = vpop.f32.mrb[2].mxu0 }
 0x107   :  { %182 = vst [vmem:[%s287_s3] sm:$0xff] %v181_v18  ;;  %v166_v21 = vpop.f32.mrb[3].mxu0 }

// kernel: efficient_counter_forward.16
= control target key start
LH: loop header
LB: loop body
LE: loop exit
PB: predicated region body
PF: predicated region fallthrough
CT: control target
= control target key end

     0   :  { %v120_v0 = vmov 0.0   ;;  %vm121_vm0 = vmmov 0   ;;  %vm38_vm1 = vcmask 261120   ;;  %s157_s1 = inlined_call_operand.vmem [shape: bf16[32,128], index: 1, kind: input, shape index: {}]   ;;  %s158_s0 = inlined_call_operand.vmem [shape: bf16[8,32], index: 0, kind: input, shape index: {}]   ;;  %s159_s2 = inlined_call_operand.vmem [shape: f32[1,128], index: 2, kind: input, shape index: {}]   ;;  %s160_s3 = inlined_call_operand.vmem [shape: f32[8,128], index: 3, kind: output, shape index: {}]  }
   0x1   :  { %108 = vmatprep.subr.bf16.mxu0 %v120_v0  ;;  %v118_v1 = vld [vmem:[%s157_s1] sm:$0xff]   ;;  %112 = vmatprep.mubr.msk.bf16.mxu0 %vm121_vm0, %v120_v0  ;;  %v119_v2 = vld [vmem:[%s157_s1 + $0x8] sm:$0xff]  }
   0x2   :  { %109 = vmatpush3.bf16.msra.mxu0 %v118_v1  ;;  %v21_v3 = vld [vmem:[%s158_s0] sm:$0xf] }
   0x3   :  { %110 = vmatprep.subr.bf16.mxu0 %v120_v0  ;;  %v104_v4 = vld [vmem:[%s159_s2] ss:$0 sm:$0xff] }
   0x6   :  { %111 = vmatpush3.bf16.msra.mxu0 %v119_v2 }
   0x9   :  { %113 = vmatmul.mubr.msk.bf16.vlgmr.msra.gmra.mrb[0].mxu0 %vm38_vm1, %v21_v3 }
  0xdc   :  { %v76_v5 = vpop.f32.mrb[0].mxu0 }
  0xdd   :  { %v95_v6 = vadd.f32 %v104_v4, %v76_v5  ;;  %v114_v7 = vpop.f32.mrb[1].mxu0 }
  0xde   :  { %v79_v8 = vpop.f32.mrb[2].mxu0 }
  0xdf   :  { %96 = vst [vmem:[%s160_s3] sm:$0xff] %v95_v6  ;;  %v115_v9 = vpop.f32.mrb[3].mxu0 }

// kernel: efficient_counter_forward.17
= control target key start
LH: loop header
LB: loop body
LE: loop exit
PB: predicated region body
PF: predicated region fallthrough
CT: control target
= control target key end

     0   :  { %v849_v0 = vmov 0.0   ;;  %vm850_vm0 = vmmov 0   ;;  %vm239_vm1 = vcmask 261120   ;;  %s1148_s1 = inlined_call_operand.vmem [shape: bf16[32,128], index: 1, kind: input, shape index: {}]   ;;  %s1149_s0 = inlined_call_operand.vmem [shape: bf16[296,32], index: 0, kind: input, shape index: {}]   ;;  %s1150_s2 = inlined_call_operand.vmem [shape: f32[1,128], index: 2, kind: input, shape index: {}]   ;;  %s1151_s3 = inlined_call_operand.vmem [shape: f32[296,128], index: 3, kind: output, shape index: {}]  }
   0x1   :  { %742 = vmatprep.subr.bf16.mxu0 %v849_v0  ;;  %v828_v1 = vld [vmem:[%s1148_s1] sm:$0xff]   ;;  %822 = vmatprep.subr.bf16.mxu1 %v849_v0  ;;  %v829_v2 = vld [vmem:[%s1148_s1 + $0x8] sm:$0xff]   ;;  %v831_v4 = vld [vmem:[%s1149_s0 + $0x50] sm:$0xff]  }
   0x2   :  { %746 = vmatprep.mubr.msk.bf16.mxu0 %vm850_vm0, %v849_v0  ;;  %786 = vmatprep.mubr.msk.bf16.mxu1 %vm850_vm0, %v849_v0  ;;  %v830_v3 = vld [vmem:[%s1149_s0] sm:$0xff]   ;;  %v832_v5 = vld [vmem:[%s1149_s0 + $0x8] sm:$0xff]   ;;  %v833_v6 = vld [vmem:[%s1149_s0 + $0x58] sm:$0xff]  }
   0x3   :  { %743 = vmatpush3.bf16.msra.mxu0 %v828_v1  ;;  %824 = vmatpush3.bf16.msra.mxu1 %v828_v1  ;;  %v834_v7 = vld [vmem:[%s1149_s0 + $0x10] sm:$0xff]   ;;  %v835_v8 = vld [vmem:[%s1149_s0 + $0x60] sm:$0xff]   ;;  %v836_v9 = vld [vmem:[%s1149_s0 + $0x18] sm:$0xff]  }
   0x4   :  { %744 = vmatprep.subr.bf16.mxu0 %v849_v0  ;;  %823 = vmatprep.subr.bf16.mxu1 %v849_v0  ;;  %v837_v10 = vld [vmem:[%s1149_s0 + $0x68] sm:$0xff]   ;;  %v838_v11 = vld [vmem:[%s1149_s0 + $0x20] sm:$0xff]   ;;  %v839_v12 = vld [vmem:[%s1149_s0 + $0x70] sm:$0xff]  }
   0x5   :  { %v840_v13 = vld [vmem:[%s1149_s0 + $0x28] sm:$0xff]   ;;  %v841_v14 = vld [vmem:[%s1149_s0 + $0x78] sm:$0xff]   ;;  %v842_v15 = vld [vmem:[%s1149_s0 + $0x30] sm:$0xff]  }
   0x6   :  { %v843_v16 = vld [vmem:[%s1149_s0 + $0x80] sm:$0xff]   ;;  %v844_v17 = vld [vmem:[%s1149_s0 + $0x38] sm:$0xff]   ;;  %v845_v18 = vld [vmem:[%s1149_s0 + $0x88] sm:$0xff]  }
   0x7   :  { %745 = vmatpush3.bf16.msra.mxu0 %v829_v2  ;;  %825 = vmatpush3.bf16.msra.mxu1 %v829_v2  ;;  %v846_v19 = vld [vmem:[%s1149_s0 + $0x40] sm:$0xff]   ;;  %v847_v20 = vld [vmem:[%s1149_s0 + $0x90] ss:$0 sps:$4 sm:$0xff]   ;;  %v848_v21 = vld [vmem:[%s1149_s0 + $0x48] sm:$0xff]  }
   0x8   :  { %v998_v22 = vld [vmem:[%s1150_s2] ss:$0 sm:$0xff] }
   0xa   :  { %747 = vmatmul.mubr.msk.bf16.vlgmr.msra.gmra.mrb[0].mxu0 %vm239_vm1, %v830_v3  ;;  %787 = vmatmul.mubr.msk.bf16.vlgmr.msra.gmra.mrb[0].mxu1 %vm239_vm1, %v831_v4 }
   0xb   :  { %750 = vmatprep.mubr.msk.bf16.mxu0 %vm850_vm0, %v849_v0  ;;  %790 = vmatprep.mubr.msk.bf16.mxu1 %vm850_vm0, %v849_v0 }
  0x12   :  { %751 = vmatmul.mubr.msk.bf16.gmra.mrb[4].mxu0 %vm239_vm1, %v832_v5  ;;  %791 = vmatmul.mubr.msk.bf16.gmra.mrb[4].mxu1 %vm239_vm1, %v833_v6 }
  0x13   :  { %754 = vmatprep.mubr.msk.bf16.mxu0 %vm850_vm0, %v849_v0  ;;  %794 = vmatprep.mubr.msk.bf16.mxu1 %vm850_vm0, %v849_v0 }
  0x1a   :  { %755 = vmatmul.mubr.msk.bf16.gmra.mrb[8].mxu0 %vm239_vm1, %v834_v7  ;;  %795 = vmatmul.mubr.msk.bf16.gmra.mrb[8].mxu1 %vm239_vm1, %v835_v8 }
  0x1b   :  { %758 = vmatprep.mubr.msk.bf16.mxu0 %vm850_vm0, %v849_v0  ;;  %798 = vmatprep.mubr.msk.bf16.mxu1 %vm850_vm0, %v849_v0 }
  0x22   :  { %759 = vmatmul.mubr.msk.bf16.gmra.mrb[12].mxu0 %vm239_vm1, %v836_v9  ;;  %799 = vmatmul.mubr.msk.bf16.gmra.mrb[12].mxu1 %vm239_vm1, %v837_v10 }
  0x23   :  { %762 = vmatprep.mubr.msk.bf16.mxu0 %vm850_vm0, %v849_v0  ;;  %802 = vmatprep.mubr.msk.bf16.mxu1 %vm850_vm0, %v849_v0 }
  0x2a   :  { %763 = vmatmul.mubr.msk.bf16.gmra.mrb[16].mxu0 %vm239_vm1, %v838_v11  ;;  %803 = vmatmul.mubr.msk.bf16.gmra.mrb[16].mxu1 %vm239_vm1, %v839_v12 }
  0x2b   :  { %766 = vmatprep.mubr.msk.bf16.mxu0 %vm850_vm0, %v849_v0  ;;  %806 = vmatprep.mubr.msk.bf16.mxu1 %vm850_vm0, %v849_v0 }
  0x32   :  { %767 = vmatmul.mubr.msk.bf16.gmra.mrb[20].mxu0 %vm239_vm1, %v840_v13  ;;  %807 = vmatmul.mubr.msk.bf16.gmra.mrb[20].mxu1 %vm239_vm1, %v841_v14 }
  0x33   :  { %770 = vmatprep.mubr.msk.bf16.mxu0 %vm850_vm0, %v849_v0  ;;  %810 = vmatprep.mubr.msk.bf16.mxu1 %vm850_vm0, %v849_v0 }
  0x3a   :  { %771 = vmatmul.mubr.msk.bf16.gmra.mrb[24].mxu0 %vm239_vm1, %v842_v15  ;;  %811 = vmatmul.mubr.msk.bf16.gmra.mrb[24].mxu1 %vm239_vm1, %v843_v16 }
  0x3b   :  { %774 = vmatprep.mubr.msk.bf16.mxu0 %vm850_vm0, %v849_v0  ;;  %814 = vmatprep.mubr.msk.bf16.mxu1 %vm850_vm0, %v849_v0 }
  0x42   :  { %775 = vmatmul.mubr.msk.bf16.gmra.mrb[28].mxu0 %vm239_vm1, %v844_v17  ;;  %815 = vmatmul.mubr.msk.bf16.gmra.mrb[28].mxu1 %vm239_vm1, %v845_v18 }
  0x43   :  { %778 = vmatprep.mubr.msk.bf16.mxu0 %vm850_vm0, %v849_v0  ;;  %818 = vmatprep.mubr.msk.bf16.mxu1 %vm850_vm0, %v849_v0 }
  0x4a   :  { %779 = vmatmul.mubr.msk.bf16.gmra.mrb[32].mxu0 %vm239_vm1, %v846_v19  ;;  %819 = vmatmul.mubr.msk.bf16.gmra.mrb[32].mxu1 %vm239_vm1, %v847_v20 }
  0x4b   :  { %782 = vmatprep.mubr.msk.bf16.mxu0 %vm850_vm0, %v849_v0 }
  0x52   :  { %783 = vmatmul.mubr.msk.bf16.gmra.mrb[36].mxu0 %vm239_vm1, %v848_v21 }
  0xdd   :  { %v331_v23 = vpop.f32.mrb[0].mxu0  ;;  %v411_v24 = vpop.f32.mrb[0].mxu1 }
  0xde   :  { %v602_v25 = vadd.f32 %v998_v22, %v331_v23  ;;  %v748_v26 = vpop.f32.mrb[1].mxu0  ;;  %v622_v27 = vadd.f32 %v998_v22, %v411_v24  ;;  %v788_v28 = vpop.f32.mrb[1].mxu1 }
  0xdf   :  { %v334_v29 = vpop.f32.mrb[2].mxu0  ;;  %v414_v30 = vpop.f32.mrb[2].mxu1 }
  0xe0   :  { %639 = vst [vmem:[%s1151_s3] sm:$0xff] %v602_v25  ;;  %v603_v31 = vadd.f32 %v998_v22, %v334_v29  ;;  %v749_v32 = vpop.f32.mrb[3].mxu0  ;;  %659 = vst [vmem:[%s1151_s3 + $0xa0] sm:$0xff] %v622_v27  ;;  %v623_v33 = vadd.f32 %v998_v22, %v414_v30  ;;  %v789_v34 = vpop.f32.mrb[3].mxu1 }
  0xe2   :  { %640 = vst [vmem:[%s1151_s3 + $0x8] sm:$0xff] %v603_v31  ;;  %660 = vst [vmem:[%s1151_s3 + $0xa8] sm:$0xff] %v623_v33 }
  0xe5   :  { %v339_v35 = vpop.f32.mrb[4].mxu0  ;;  %v419_v36 = vpop.f32.mrb[4].mxu1 }
  0xe6   :  { %v604_v37 = vadd.f32 %v998_v22, %v339_v35  ;;  %v752_v38 = vpop.f32.mrb[5].mxu0  ;;  %v624_v39 = vadd.f32 %v998_v22, %v419_v36  ;;  %v792_v40 = vpop.f32.mrb[5].mxu1 }
  0xe7   :  { %v342_v41 = vpop.f32.mrb[6].mxu0  ;;  %v422_v42 = vpop.f32.mrb[6].mxu1 }
  0xe8   :  { %641 = vst [vmem:[%s1151_s3 + $0x10] sm:$0xff] %v604_v37  ;;  %v605_v43 = vadd.f32 %v998_v22, %v342_v41  ;;  %v753_v44 = vpop.f32.mrb[7].mxu0  ;;  %661 = vst [vmem:[%s1151_s3 + $0xb0] sm:$0xff] %v624_v39  ;;  %v625_v45 = vadd.f32 %v998_v22, %v422_v42  ;;  %v793_v46 = vpop.f32.mrb[7].mxu1 }
  0xea   :  { %642 = vst [vmem:[%s1151_s3 + $0x18] sm:$0xff] %v605_v43  ;;  %662 = vst [vmem:[%s1151_s3 + $0xb8] sm:$0xff] %v625_v45 }
  0xed   :  { %v347_v47 = vpop.f32.mrb[8].mxu0  ;;  %v427_v48 = vpop.f32.mrb[8].mxu1 }
  0xee   :  { %v606_v49 = vadd.f32 %v998_v22, %v347_v47  ;;  %v756_v50 = vpop.f32.mrb[9].mxu0  ;;  %v626_v51 = vadd.f32 %v998_v22, %v427_v48  ;;  %v796_v52 = vpop.f32.mrb[9].mxu1 }
  0xef   :  { %v350_v53 = vpop.f32.mrb[10].mxu0  ;;  %v430_v54 = vpop.f32.mrb[10].mxu1 }
  0xf0   :  { %643 = vst [vmem:[%s1151_s3 + $0x20] sm:$0xff] %v606_v49  ;;  %v607_v55 = vadd.f32 %v998_v22, %v350_v53  ;;  %v757_v56 = vpop.f32.mrb[11].mxu0  ;;  %663 = vst [vmem:[%s1151_s3 + $0xc0] sm:$0xff] %v626_v51  ;;  %v627_v57 = vadd.f32 %v998_v22, %v430_v54  ;;  %v797_v58 = vpop.f32.mrb[11].mxu1 }
  0xf2   :  { %644 = vst [vmem:[%s1151_s3 + $0x28] sm:$0xff] %v607_v55  ;;  %664 = vst [vmem:[%s1151_s3 + $0xc8] sm:$0xff] %v627_v57 }
  0xf5   :  { %v355_v59 = vpop.f32.mrb[12].mxu0  ;;  %v435_v60 = vpop.f32.mrb[12].mxu1 }
  0xf6   :  { %v608_v61 = vadd.f32 %v998_v22, %v355_v59  ;;  %v760_v62 = vpop.f32.mrb[13].mxu0  ;;  %v628_v63 = vadd.f32 %v998_v22, %v435_v60  ;;  %v800_v0 = vpop.f32.mrb[13].mxu1 }
  0xf7   :  { %v358_v1 = vpop.f32.mrb[14].mxu0  ;;  %v438_v2 = vpop.f32.mrb[14].mxu1 }
  0xf8   :  { %645 = vst [vmem:[%s1151_s3 + $0x30] sm:$0xff] %v608_v61  ;;  %v609_v3 = vadd.f32 %v998_v22, %v358_v1  ;;  %v761_v4 = vpop.f32.mrb[15].mxu0  ;;  %665 = vst [vmem:[%s1151_s3 + $0xd0] sm:$0xff] %v628_v63  ;;  %v629_v5 = vadd.f32 %v998_v22, %v438_v2  ;;  %v801_v6 = vpop.f32.mrb[15].mxu1 }
  0xfa   :  { %646 = vst [vmem:[%s1151_s3 + $0x38] sm:$0xff] %v609_v3  ;;  %666 = vst [vmem:[%s1151_s3 + $0xd8] sm:$0xff] %v629_v5 }
  0xfd   :  { %v363_v7 = vpop.f32.mrb[16].mxu0  ;;  %v443_v8 = vpop.f32.mrb[16].mxu1 }
  0xfe   :  { %v610_v9 = vadd.f32 %v998_v22, %v363_v7  ;;  %v764_v10 = vpop.f32.mrb[17].mxu0  ;;  %v630_v11 = vadd.f32 %v998_v22, %v443_v8  ;;  %v804_v12 = vpop.f32.mrb[17].mxu1 }
  0xff   :  { %v366_v13 = vpop.f32.mrb[18].mxu0  ;;  %v446_v14 = vpop.f32.mrb[18].mxu1 }
 0x100   :  { %647 = vst [vmem:[%s1151_s3 + $0x40] sm:$0xff] %v610_v9  ;;  %v611_v15 = vadd.f32 %v998_v22, %v366_v13  ;;  %v765_v16 = vpop.f32.mrb[19].mxu0  ;;  %667 = vst [vmem:[%s1151_s3 + $0xe0] sm:$0xff] %v630_v11  ;;  %v631_v17 = vadd.f32 %v998_v22, %v446_v14  ;;  %v805_v18 = vpop.f32.mrb[19].mxu1 }
 0x102   :  { %648 = vst [vmem:[%s1151_s3 + $0x48] sm:$0xff] %v611_v15  ;;  %668 = vst [vmem:[%s1151_s3 + $0xe8] sm:$0xff] %v631_v17 }
 0x105   :  { %v371_v19 = vpop.f32.mrb[20].mxu0  ;;  %v451_v20 = vpop.f32.mrb[20].mxu1 }
 0x106   :  { %v612_v21 = vadd.f32 %v998_v22, %v371_v19  ;;  %v768_v23 = vpop.f32.mrb[21].mxu0  ;;  %v632_v24 = vadd.f32 %v998_v22, %v451_v20  ;;  %v808_v25 = vpop.f32.mrb[21].mxu1 }
 0x107   :  { %v374_v26 = vpop.f32.mrb[22].mxu0  ;;  %v454_v27 = vpop.f32.mrb[22].mxu1 }
 0x108   :  { %649 = vst [vmem:[%s1151_s3 + $0x50] sm:$0xff] %v612_v21  ;;  %v613_v28 = vadd.f32 %v998_v22, %v374_v26  ;;  %v769_v29 = vpop.f32.mrb[23].mxu0  ;;  %669 = vst [vmem:[%s1151_s3 + $0xf0] sm:$0xff] %v632_v24  ;;  %v633_v30 = vadd.f32 %v998_v22, %v454_v27  ;;  %v809_v31 = vpop.f32.mrb[23].mxu1 }
 0x10a   :  { %650 = vst [vmem:[%s1151_s3 + $0x58] sm:$0xff] %v613_v28  ;;  %670 = vst [vmem:[%s1151_s3 + $0xf8] sm:$0xff] %v633_v30 }
 0x10d   :  { %v379_v32 = vpop.f32.mrb[24].mxu0  ;;  %v459_v33 = vpop.f32.mrb[24].mxu1 }
 0x10e   :  { %v614_v34 = vadd.f32 %v998_v22, %v379_v32  ;;  %v772_v35 = vpop.f32.mrb[25].mxu0  ;;  %v634_v36 = vadd.f32 %v998_v22, %v459_v33  ;;  %v812_v37 = vpop.f32.mrb[25].mxu1 }
 0x10f   :  { %v382_v38 = vpop.f32.mrb[26].mxu0  ;;  %v462_v39 = vpop.f32.mrb[26].mxu1 }
 0x110   :  { %651 = vst [vmem:[%s1151_s3 + $0x60] sm:$0xff] %v614_v34  ;;  %v615_v40 = vadd.f32 %v998_v22, %v382_v38  ;;  %v773_v41 = vpop.f32.mrb[27].mxu0  ;;  %671 = vst [vmem:[%s1151_s3 + $0x100] sm:$0xff] %v634_v36  ;;  %v635_v42 = vadd.f32 %v998_v22, %v462_v39  ;;  %v813_v43 = vpop.f32.mrb[27].mxu1 }
 0x112   :  { %652 = vst [vmem:[%s1151_s3 + $0x68] sm:$0xff] %v615_v40  ;;  %672 = vst [vmem:[%s1151_s3 + $0x108] sm:$0xff] %v635_v42 }
 0x115   :  { %v387_v44 = vpop.f32.mrb[28].mxu0  ;;  %v467_v45 = vpop.f32.mrb[28].mxu1 }
 0x116   :  { %v616_v46 = vadd.f32 %v998_v22, %v387_v44  ;;  %v776_v47 = vpop.f32.mrb[29].mxu0  ;;  %v636_v48 = vadd.f32 %v998_v22, %v467_v45  ;;  %v816_v49 = vpop.f32.mrb[29].mxu1 }
 0x117   :  { %v390_v50 = vpop.f32.mrb[30].mxu0  ;;  %v470_v51 = vpop.f32.mrb[30].mxu1 }
 0x118   :  { %653 = vst [vmem:[%s1151_s3 + $0x70] sm:$0xff] %v616_v46  ;;  %v617_v52 = vadd.f32 %v998_v22, %v390_v50  ;;  %v777_v53 = vpop.f32.mrb[31].mxu0  ;;  %673 = vst [vmem:[%s1151_s3 + $0x110] sm:$0xff] %v636_v48  ;;  %v637_v54 = vadd.f32 %v998_v22, %v470_v51  ;;  %v817_v55 = vpop.f32.mrb[31].mxu1 }
 0x11a   :  { %654 = vst [vmem:[%s1151_s3 + $0x78] sm:$0xff] %v617_v52  ;;  %674 = vst [vmem:[%s1151_s3 + $0x118] sm:$0xff] %v637_v54 }
 0x11d   :  { %v395_v56 = vpop.f32.mrb[32].mxu0  ;;  %v475_v57 = vpop.f32.mrb[32].mxu1 }
 0x11e   :  { %v618_v58 = vadd.f32 %v998_v22, %v395_v56  ;;  %v780_v59 = vpop.f32.mrb[33].mxu0  ;;  %v638_v60 = vadd.f32 %v998_v22, %v475_v57  ;;  %v820_v61 = vpop.f32.mrb[33].mxu1 }
 0x11f   :  { %v398_v62 = vpop.f32.mrb[34].mxu0  ;;  %v478_v63 = vpop.f32.mrb[34].mxu1 }
 0x120   :  { %655 = vst [vmem:[%s1151_s3 + $0x80] sm:$0xff] %v618_v58  ;;  %v619_v0 = vadd.f32 %v998_v22, %v398_v62  ;;  %v781_v1 = vpop.f32.mrb[35].mxu0  ;;  %675 = vst [vmem:[%s1151_s3 + $0x120] sm:$0xff] %v638_v60  ;;  %v821_v2 = vpop.f32.mrb[35].mxu1 }
 0x122   :  { %656 = vst [vmem:[%s1151_s3 + $0x88] sm:$0xff] %v619_v0 }
 0x125   :  { %v403_v3 = vpop.f32.mrb[36].mxu0 }
 0x126   :  { %v620_v4 = vadd.f32 %v998_v22, %v403_v3  ;;  %v784_v5 = vpop.f32.mrb[37].mxu0 }
 0x127   :  { %v406_v6 = vpop.f32.mrb[38].mxu0 }
 0x128   :  { %657 = vst [vmem:[%s1151_s3 + $0x90] sm:$0xff] %v620_v4  ;;  %v621_v7 = vadd.f32 %v998_v22, %v406_v6  ;;  %v785_v8 = vpop.f32.mrb[39].mxu0 }
 0x12a   :  { %658 = vst [vmem:[%s1151_s3 + $0x98] sm:$0xff] %v621_v7 }

// kernel: efficient_counter_forward.18
= control target key start
LH: loop header
LB: loop body
LE: loop exit
PB: predicated region body
PF: predicated region fallthrough
CT: control target
= control target key end

     0   :  { %s2033_s15 = smov 0   ;;  %s2035_s16 = smov 0   ;;  %s2793_s0 = inlined_call_operand.vmem [shape: bf16[2,147,32], index: 0, kind: input, shape index: {}]   ;;  %s2794_s1 = inlined_call_operand.vmem [shape: bf16[2,8,32], index: 1, kind: input, shape index: {}]   ;;  %s2795_s2 = inlined_call_operand.vmem [shape: bf16[2,8,32], index: 2, kind: input, shape index: {}]   ;;  %s2796_s3 = inlined_call_operand.vmem [shape: f32[2,147,32], index: 3, kind: input, shape index: {}]   ;;  %s2797_s4 = inlined_call_operand.vmem [shape: f32[2,147,32], index: 4, kind: output, shape index: {}]  }
   0x1   :  { %s2037_s17 = smov 0  }
   0x2 LB: > { %s26_s18 = sadd.s32 1, %s1999_s16  ;;  %p1720_p0 = scmp.ge.s32.totalorder %s2003_s17, 1  ;;  %s2003_s17 = sphi %s2037_s17, %s14_s17   ;;  %s1999_s16 = sphi %s2035_s16, %s2825_s16   ;;  %s1995_s15 = sphi %s2033_s15, %s2824_s15  }
   0x3   : > { %p28_p1 = scmp.ge.s32.totalorder %s26_s18, 2  ;;  %p212_p2 = scmp.lt.s32.totalorder %s2003_s17, 3 }
   0x5   : > { %s2827_s18 = smov (%p28_p1, %s26_s18), 0  ;;  %p213_p3 = pnand %p1720_p0, %p212_p2 }
   0x7   : > { %216 = sbr.rel (%p213_p3) target bundleno = 929 (0x3a1), region = 36 }
   0xe   : > { %p257_p4 = scmp.lt.s32.totalorder %s1995_s15, 1  ;;  %vm331_vm0 = vcmask 261120   ;;  %vm291_vm1 = vcmask 7168   ;;  %v2005_v12 = vmov -1e+30   ;;  %v567_v13 = vlaneseq }
   0xf   : > { %294 = vst.msk [vmem:[#allocation2 + $0x10] sm:$0xff] %vm291_vm1, %v2005_v12  ;;  %292 = vst.msk [vmem:[#allocation2] sm:$0xff] %vm291_vm1, %v2005_v12  ;;  %vm610_vm3 = vcmask 64512   ;;  %v2006_v47 = vmov 0   ;;  %v2798_v60 = vmov 0.0   ;;  %vm665_vm4 = vcmask 59392  }
  0x10   : > { %s2829_s15 = smov (!%p257_p4, %s1995_s15), 1  ;;  %293 = vst.msk [vmem:[#allocation2 + $0x8] sm:$0xff] %vm291_vm1, %v2005_v12  ;;  %295 = vst.msk [vmem:[#allocation2 + $0x18] sm:$0xff] %vm291_vm1, %v2005_v12  ;;  %v2111_v14 = vand.u32 127, %v567_v13  ;;  %1855 = vset.pattern.permute.xlu1 %v2006_v47  ;;  %1856 = vset.pattern.permute.xlu0 %v2006_v47  ;;  %vm310_vm5 = vcmask 2048   ;;  %vm1206_vm6 = vcmask 1043456  }
  0x11   : > { %s1826_s19 = smul.u32 76, %s2829_s15  ;;  %s1722_s20 = sshll.u32 %s2829_s15, 2  ;;  %296 = vst.msk [vmem:[#allocation2 + $0x20] sm:$0xff] %vm291_vm1, %v2005_v12  ;;  %297 = vst.msk [vmem:[#allocation2 + $0x28] sm:$0xff] %vm291_vm1, %v2005_v12  ;;  %vm350_vm7 = vcmask 256000  }
  0x12   : > { %s268_s23 = scalar_lea.vmem %s2794_s1, %s1722_s20  ;;  %298 = vst.msk [vmem:[#allocation2 + $0x30] sm:$0xff] %vm291_vm1, %v2005_v12  ;;  %299 = vst.msk [vmem:[#allocation2 + $0x38] sm:$0xff] %vm291_vm1, %v2005_v12  ;;  %vm571_vm2 = vcmp.lt.s32.totalorder %v2111_v14, 4  ;;  %s275_s29 = scalar_lea.vmem %s2795_s2, %s1722_s20 }
  0x13   : > { %s261_s26 = scalar_lea.vmem %s2793_s0, %s1826_s19  ;;  %v371_v0 = vld [vmem:[%s268_s23] sm:$0xf]  ;;  %300 = vst.msk [vmem:[#allocation2 + $0x40] sm:$0xff] %vm291_vm1, %v2005_v12  ;;  %301 = vst.msk [vmem:[#allocation2 + $0x48] sm:$0xff] %vm291_vm1, %v2005_v12  ;;  %s1827_s30 = smul.u32 152, %s2829_s15 }
  0x14   : > { %1824 = vmatprep.subr.msk.bf16.mxu0 %vm331_vm0, %v371_v0  ;;  %v452_v1 = vsel %vm331_vm0, %v371_v0, 0  ;;  %v1857_v2 = vld [vmem:[%s261_s26] sm:$0xff]   ;;  %v1858_v3 = vld [vmem:[%s261_s26 + $0x8] sm:$0xff]   ;;  %v1859_v4 = vld [vmem:[%s261_s26 + $0x10] sm:$0xff]   ;;  %302 = vst.msk [vmem:[#allocation2 + $0x50] sm:$0xff] %vm291_vm1, %v2005_v12 }
  0x15   : > { %1781 = vmatpush3.bf16.xpose.msra.mxu0 %v452_v1  ;;  %1782 = vmatprep.mubr.msk.bf16.mxu0 %vm331_vm0, %v1857_v2  ;;  %v1860_v5 = vld [vmem:[%s261_s26 + $0x18] sm:$0xff]   ;;  %v1861_v6 = vld [vmem:[%s261_s26 + $0x20] sm:$0xff]   ;;  %v1862_v7 = vld [vmem:[%s261_s26 + $0x28] sm:$0xff]   ;;  %303 = vst.msk [vmem:[#allocation2 + $0x58] sm:$0xff] %vm291_vm1, %v2005_v12  ;;  %s2720_s7 = scalar_lea.vmem %s2796_s3, %s1827_s30  ;;  %s2726_s10 = scalar_lea.vmem %s2797_s4, %s1827_s30 }
  0x16   : > { %v1863_v8 = vld [vmem:[%s261_s26 + $0x30] sm:$0xff]   ;;  %v1864_v9 = vld [vmem:[%s261_s26 + $0x38] sm:$0xff]   ;;  %v1865_v10 = vld [vmem:[%s261_s26 + $0x40] sm:$0xff]   ;;  %304 = vst.msk [vmem:[#allocation2 + $0x60] sm:$0xff] %vm291_vm1, %v2005_v12 }
  0x17   : > { %v1866_v11 = vld [vmem:[%s261_s26 + $0x48] ss:$0 sps:$4 sm:$0x33]   ;;  %305 = vst.msk [vmem:[#allocation2 + $0x68] sm:$0xff] %vm291_vm1, %v2005_v12  ;;  %306 = vst.msk [vmem:[#allocation2 + $0x70] sm:$0xff] %vm291_vm1, %v2005_v12  ;;  %v2306_v13 = vld [vmem:[#allocation2] sm:$0xff] }
  0x18   : > { %307 = vst.msk [vmem:[#allocation2 + $0x78] sm:$0xff] %vm291_vm1, %v2005_v12  ;;  %308 = vst.msk [vmem:[#allocation2 + $0x80] sm:$0xff] %vm291_vm1, %v2005_v12 }
  0x19   : > { %309 = vst.msk [vmem:[#allocation2 + $0x88] sm:$0xff] %vm291_vm1, %v2005_v12  ;;  %312 = vst.msk [vmem:[#allocation3] sm:$0xff] %vm291_vm1, %v2798_v60 }
  0x1a   : > { %333 = vst.msk [vmem:[#allocation4 + $0x8] sm:$0xff] %vm331_vm0, %v2798_v60  ;;  %332 = vst.msk [vmem:[#allocation4] sm:$0xff] %vm331_vm0, %v2798_v60 }
  0x1b   : > { %313 = vst.msk [vmem:[#allocation3 + $0x8] sm:$0xff] %vm291_vm1, %v2798_v60  ;;  %314 = vst.msk [vmem:[#allocation3 + $0x10] sm:$0xff] %vm291_vm1, %v2798_v60 }
  0x1c   : > { %1783 = vmatmul.mubr.msk.bf16.vlgmr.msra.gmra.mrb[0].mxu0 %vm331_vm0, %v1858_v3  ;;  %315 = vst.msk [vmem:[#allocation3 + $0x18] sm:$0xff] %vm291_vm1, %v2798_v60  ;;  %316 = vst.msk [vmem:[#allocation3 + $0x20] sm:$0xff] %vm291_vm1, %v2798_v60 }
  0x1d   : > { %1786 = vmatprep.mubr.msk.bf16.mxu0 %vm331_vm0, %v1859_v4  ;;  %317 = vst.msk [vmem:[#allocation3 + $0x28] sm:$0xff] %vm291_vm1, %v2798_v60  ;;  %318 = vst.msk [vmem:[#allocation3 + $0x30] sm:$0xff] %vm291_vm1, %v2798_v60 }
  0x1e   : > { %319 = vst.msk [vmem:[#allocation3 + $0x38] sm:$0xff] %vm291_vm1, %v2798_v60  ;;  %320 = vst.msk [vmem:[#allocation3 + $0x40] sm:$0xff] %vm291_vm1, %v2798_v60 }
  0x1f   : > { %321 = vst.msk [vmem:[#allocation3 + $0x48] sm:$0xff] %vm291_vm1, %v2798_v60  ;;  %322 = vst.msk [vmem:[#allocation3 + $0x50] sm:$0xff] %vm291_vm1, %v2798_v60 }
  0x20   : > { %323 = vst.msk [vmem:[#allocation3 + $0x58] sm:$0xff] %vm291_vm1, %v2798_v60  ;;  %324 = vst.msk [vmem:[#allocation3 + $0x60] sm:$0xff] %vm291_vm1, %v2798_v60 }
  0x21   : > { %325 = vst.msk [vmem:[#allocation3 + $0x68] sm:$0xff] %vm291_vm1, %v2798_v60  ;;  %326 = vst.msk [vmem:[#allocation3 + $0x70] sm:$0xff] %vm291_vm1, %v2798_v60 }
  0x22   : > { %327 = vst.msk [vmem:[#allocation3 + $0x78] sm:$0xff] %vm291_vm1, %v2798_v60  ;;  %328 = vst.msk [vmem:[#allocation3 + $0x80] sm:$0xff] %vm291_vm1, %v2798_v60 }
  0x23   : > { %329 = vst.msk [vmem:[#allocation3 + $0x88] sm:$0xff] %vm291_vm1, %v2798_v60 }
  0x24   : > { %1787 = vmatmul.mubr.msk.bf16.gmra.mrb[4].mxu0 %vm331_vm0, %v1860_v5  ;;  %334 = vst.msk [vmem:[#allocation4 + $0x10] sm:$0xff] %vm331_vm0, %v2798_v60  ;;  %335 = vst.msk [vmem:[#allocation4 + $0x18] sm:$0xff] %vm331_vm0, %v2798_v60 }
  0x25   : > { %1790 = vmatprep.mubr.msk.bf16.mxu0 %vm331_vm0, %v1861_v6  ;;  %336 = vst.msk [vmem:[#allocation4 + $0x20] sm:$0xff] %vm331_vm0, %v2798_v60  ;;  %337 = vst.msk [vmem:[#allocation4 + $0x28] sm:$0xff] %vm331_vm0, %v2798_v60 }
  0x26   : > { %338 = vst.msk [vmem:[#allocation4 + $0x30] sm:$0xff] %vm331_vm0, %v2798_v60  ;;  %339 = vst.msk [vmem:[#allocation4 + $0x38] sm:$0xff] %vm331_vm0, %v2798_v60 }
  0x27   : > { %340 = vst.msk [vmem:[#allocation4 + $0x40] sm:$0xff] %vm331_vm0, %v2798_v60  ;;  %341 = vst.msk [vmem:[#allocation4 + $0x48] sm:$0xff] %vm331_vm0, %v2798_v60 }
  0x28   : > { %342 = vst.msk [vmem:[#allocation4 + $0x50] sm:$0xff] %vm331_vm0, %v2798_v60  ;;  %343 = vst.msk [vmem:[#allocation4 + $0x58] sm:$0xff] %vm331_vm0, %v2798_v60 }
  0x29   : > { %344 = vst.msk [vmem:[#allocation4 + $0x60] sm:$0xff] %vm331_vm0, %v2798_v60  ;;  %345 = vst.msk [vmem:[#allocation4 + $0x68] sm:$0xff] %vm331_vm0, %v2798_v60 }
  0x2a   : > { %346 = vst.msk [vmem:[#allocation4 + $0x70] sm:$0xff] %vm331_vm0, %v2798_v60  ;;  %347 = vst.msk [vmem:[#allocation4 + $0x78] sm:$0xff] %vm331_vm0, %v2798_v60 }
  0x2b   : > { %348 = vst.msk [vmem:[#allocation4 + $0x80] sm:$0xff] %vm331_vm0, %v2798_v60  ;;  %349 = vst.msk [vmem:[#allocation4 + $0x88] sm:$0xff] %vm331_vm0, %v2798_v60 }
  0x2c   : > { %1791 = vmatmul.mubr.msk.bf16.gmra.mrb[8].mxu0 %vm331_vm0, %v1862_v7  ;;  %311 = vst.msk [vmem:[#allocation2 + $0x90] sm:$0x7] %vm310_vm5, %v2005_v12  ;;  %330 = vst.msk [vmem:[#allocation3 + $0x90] sm:$0x7] %vm310_vm5, %v2798_v60  ;;  %v2318_v12 = vld [vmem:[#allocation2 + $0x8] sm:$0xff] }
  0x2d   : > { %1794 = vmatprep.mubr.msk.bf16.mxu0 %vm331_vm0, %v1863_v8 }
  0x34   : > { %1795 = vmatmul.mubr.msk.bf16.gmra.mrb[12].mxu0 %vm331_vm0, %v1864_v9 }
  0x35   : > { %1798 = vmatprep.mubr.msk.bf16.mxu0 %vm331_vm0, %v1865_v10 }
  0x3c   : > { %1799 = vmatmul.mubr.msk.bf16.gmra.mrb[16].mxu0 %vm331_vm0, %v1866_v11  ;;  %v2304_v11 = vld [vmem:[#allocation2 + $0x10] sm:$0xff] }
  0xef   : > { %v1784_v15 = vpop.f32.mrb[0].mxu0 }
  0xf0   : > { %v2116_v16 = vsel %vm571_vm2, %v1784_v15, -1e+30  ;;  %v488_v17 = vpop.f32.mrb[1].mxu0 }
  0xf1   : > { %v2120_v18 = vsel %vm571_vm2, %v488_v17, -1e+30  ;;  %v1785_v19 = vpop.f32.mrb[2].mxu0  ;;  %v617_v20 = vsel %vm610_vm3, %v2116_v16, -inf }
  0xf2   : > { %v2126_v21 = vsel %vm571_vm2, %v1785_v19, -1e+30  ;;  %618 = vmax.xlane.f32.xlu1 %v617_v20  ;;  %v491_v22 = vpop.f32.mrb[3].mxu0  ;;  %v611_v23 = vsel %vm610_vm3, %v2120_v18, -inf  ;;  %v2314_v20 = vld [vmem:[#allocation2 + $0x18] sm:$0xff] }
  0xf3   : > { %v2132_v24 = vsel %vm571_vm2, %v491_v22, -1e+30  ;;  %612 = vmax.xlane.f32.xlu0 %v611_v23  ;;  %v620_v25 = vsel %vm610_vm3, %v2126_v21, -inf }
  0xf4   : > { %v614_v26 = vsel %vm610_vm3, %v2132_v24, -inf }
  0xf6   : > { %621 = vmax.xlane.f32.xlu1 %v620_v25 }
  0xf7   : > { %615 = vmax.xlane.f32.xlu0 %v614_v26  ;;  %v1788_v27 = vpop.f32.mrb[4].mxu0 }
  0xf8   : > { %v504_v28 = vpop.f32.mrb[5].mxu0  ;;  %v2150_v34 = vsel %vm571_vm2, %v1788_v27, -1e+30  ;;  %v2331_v27 = vld [vmem:[#allocation2 + $0x20] sm:$0xff] }
  0xf9   : > { %v2140_v29 = vsel %vm571_vm2, %v504_v28, -1e+30  ;;  %v1789_v30 = vpop.f32.mrb[6].mxu0  ;;  %v629_v37 = vsel %vm610_vm3, %v2150_v34, -inf  ;;  %v2337_v28 = vld [vmem:[#allocation2 + $0x38] sm:$0xff] }
  0xfa   : > { %v2144_v31 = vsel %vm571_vm2, %v1789_v30, -1e+30  ;;  %v507_v32 = vpop.f32.mrb[7].mxu0  ;;  %v623_v33 = vsel %vm610_vm3, %v2140_v29, -inf }
  0xfb   : > { %624 = vmax.xlane.f32.xlu0 %v623_v33  ;;  %v632_v35 = vsel %vm610_vm3, %v2144_v31, -inf  ;;  %v2156_v36 = vsel %vm571_vm2, %v507_v32, -1e+30 }
  0xfc   : > { %633 = vmax.xlane.f32.xlu1 %v632_v35  ;;  %v626_v39 = vsel %vm610_vm3, %v2156_v36, -inf }
  0xff   : > { %630 = vmax.xlane.f32.xlu0 %v629_v37  ;;  %v1792_v38 = vpop.f32.mrb[8].mxu0  ;;  %v2345_v37 = vld [vmem:[#allocation2 + $0x30] sm:$0xff] }
 0x100   : > { %627 = vmax.xlane.f32.xlu1 %v626_v39  ;;  %v520_v40 = vpop.f32.mrb[9].mxu0  ;;  %v2164_v41 = vsel %vm571_vm2, %v1792_v38, -1e+30  ;;  %v2352_v39 = vld [vmem:[#allocation2 + $0x28] sm:$0xff] }
 0x101   : > { %v2168_v42 = vsel %vm571_vm2, %v520_v40, -1e+30  ;;  %v1793_v43 = vpop.f32.mrb[10].mxu0  ;;  %v641_v50 = vsel %vm610_vm3, %v2164_v41, -inf  ;;  %v2466_v40 = vld [vmem:[#allocation2 + $0x90] sm:$0x7] }
 0x102   : > { %v635_v44 = vsel %vm610_vm3, %v2168_v42, -inf  ;;  %v2174_v45 = vsel %vm571_vm2, %v1793_v43, -1e+30  ;;  %v523_v46 = vpop.f32.mrb[11].mxu0 }
 0x103   : > { %636 = vmax.xlane.f32.xlu0 %v635_v44  ;;  %v2178_v48 = vsel %vm571_vm2, %v523_v46, -1e+30  ;;  %v644_v49 = vsel %vm610_vm3, %v2174_v45, -inf }
 0x104   : > { %645 = vmax.xlane.f32.xlu1 %v644_v49  ;;  %v638_v51 = vsel %vm610_vm3, %v2178_v48, -inf  ;;  %v2364_v49 = vld [vmem:[#allocation2 + $0x40] sm:$0xff] }
 0x107   : > { %642 = vmax.xlane.f32.xlu0 %v641_v50  ;;  %v1796_v52 = vpop.f32.mrb[12].mxu0 }
 0x108   : > { %v536_v53 = vpop.f32.mrb[13].mxu0  ;;  %639 = vmax.xlane.f32.xlu1 %v638_v51  ;;  %v2188_v54 = vsel %vm571_vm2, %v1796_v52, -1e+30  ;;  %v2371_v51 = vld [vmem:[#allocation2 + $0x58] sm:$0xff] }
 0x109   : > { %v2192_v55 = vsel %vm571_vm2, %v536_v53, -1e+30  ;;  %v1797_v56 = vpop.f32.mrb[14].mxu0  ;;  %v653_v63 = vsel %vm610_vm3, %v2188_v54, -inf }
 0x10a   : > { %v647_v57 = vsel %vm610_vm3, %v2192_v55, -inf  ;;  %v2198_v58 = vsel %vm571_vm2, %v1797_v56, -1e+30  ;;  %v539_v59 = vpop.f32.mrb[15].mxu0 }
 0x10b   : > { %648 = vmax.xlane.f32.xlu0 %v647_v57  ;;  %v2274_v61 = vsel %vm571_vm2, %v539_v59, -1e+30  ;;  %v656_v62 = vsel %vm610_vm3, %v2198_v58, -inf  ;;  %v2380_v59 = vld [vmem:[#allocation2 + $0x50] sm:$0xff] }
 0x10c   : > { %657 = vmax.xlane.f32.xlu1 %v656_v62  ;;  %v650_v0 = vsel %vm610_vm3, %v2274_v61, -inf }
 0x10f   : > { %654 = vmax.xlane.f32.xlu0 %v653_v63  ;;  %v1800_v1 = vpop.f32.mrb[16].mxu0 }
 0x110   : > { %v552_v2 = vpop.f32.mrb[17].mxu0  ;;  %651 = vmax.xlane.f32.xlu1 %v650_v0  ;;  %v2284_v3 = vsel %vm571_vm2, %v1800_v1, -1e+30  ;;  %v2390_v0 = vld [vmem:[#allocation2 + $0x48] sm:$0xff] }
 0x111   : > { %v2288_v4 = vsel %vm571_vm2, %v552_v2, -1e+30  ;;  %v1801_v5 = vpop.f32.mrb[18].mxu0  ;;  %v666_v9 = vsel %vm665_vm4, %v2284_v3, -inf }
 0x112   : > { %v659_v6 = vsel %vm610_vm3, %v2288_v4, -inf  ;;  %v555_v7 = vpop.f32.mrb[19].mxu0 }
 0x113   : > { %660 = vmax.xlane.f32.xlu0 %v659_v6  ;;  %v2294_v8 = vsel %vm571_vm2, %v555_v7, -1e+30  ;;  %v2399_v7 = vld [vmem:[#allocation2 + $0x60] sm:$0xff] }
 0x114   : > { %v662_v10 = vsel %vm610_vm3, %v2294_v8, -inf }
 0x115   : > { %663 = vmax.xlane.f32.xlu1 %v662_v10 }
 0x117   : > { %667 = vmax.xlane.f32.xlu0 %v666_v9 }
 0x17f   : > { %v619_v14 = vpop.xlane.xlu1 %618 }
 0x180   : > { %v2309_v15 = vmax.f32 %v2304_v11, %v619_v14  ;;  %v613_v17 = vpop.xlane.xlu0 %612  ;;  %v2410_v14 = vld [vmem:[#allocation2 + $0x78] sm:$0xff] }
 0x181   : > { %v2312_v19 = vmax.f32 %v2306_v13, %v613_v17 }
 0x182   : > { %1363 = vst.msk [vmem:[#allocation2 + $0x10] sm:$0xff] %vm291_vm1, %v2309_v15 }
 0x183   : > { %1361 = vst.msk [vmem:[#allocation2] sm:$0xff] %vm291_vm1, %v2312_v19  ;;  %v622_v22 = vpop.xlane.xlu1 %621  ;;  %747 = vperm.xlu1 %1855, %v2312_v19  }
 0x184   : > { %v2324_v23 = vmax.f32 %v2314_v20, %v622_v22  ;;  %v616_v25 = vpop.xlane.xlu0 %615 }
 0x185   : > { %v2327_v26 = vmax.f32 %v2318_v12, %v616_v25 }
 0x186   : > { %1364 = vst.msk [vmem:[#allocation2 + $0x18] sm:$0xff] %vm291_vm1, %v2324_v23  ;;  %v691_v25 = vsub.f32 %v2314_v20, %v2324_v23 }
 0x187   : > { %1362 = vst.msk [vmem:[#allocation2 + $0x8] sm:$0xff] %vm291_vm1, %v2327_v26  ;;  %752 = vperm.xlu0 %1856, %v2327_v26   ;;  %757 = vperm.xlu1 %1855, %v2309_v15   ;;  %v689_v17 = vsub.f32 %v2318_v12, %v2327_v26  ;;  %v2437_v26 = vld [vmem:[#allocation2 + $0x68] sm:$0xff] }
 0x188   : > { %v625_v30 = vpop.xlane.xlu0 %624  ;;  %v713_v10 = vmul.f32 1.442695, %v691_v25 }
 0x189   : > { %v2340_v32 = vmax.f32 %v2331_v27, %v625_v30  ;;  %v634_v33 = vpop.xlane.xlu1 %633  ;;  %v1175_v30 = vld [vmem:[%s275_s29] sm:$0xf] }
 0x18a   : > { %v2343_v35 = vmax.f32 %v2337_v28, %v634_v33  ;;  %1825 = vmatprep.subr.msk.bf16.mxu1 %vm1206_vm6, %v1175_v30 }
 0x18b   : > { %1365 = vst.msk [vmem:[#allocation2 + $0x20] sm:$0xff] %vm291_vm1, %v2340_v32  ;;  %762 = vperm.xlu1 %1855, %v2324_v23  }
 0x18c   : > { %1368 = vst.msk [vmem:[#allocation2 + $0x38] sm:$0xff] %vm291_vm1, %v2343_v35  ;;  %v631_v43 = vpop.xlane.xlu0 %630 }
 0x18d   : > { %v2359_v44 = vmax.f32 %v2345_v37, %v631_v43  ;;  %v628_v46 = vpop.xlane.xlu1 %627 }
 0x18e   : > { %v2362_v47 = vmax.f32 %v2352_v39, %v628_v46  ;;  %v1208_v46 = vsel %vm1206_vm6, %v1175_v30, 0 }
 0x18f   : > { %1367 = vst.msk [vmem:[#allocation2 + $0x30] sm:$0xff] %vm291_vm1, %v2359_v44  ;;  %777 = vperm.xlu1 %1855, %v2359_v44   ;;  %1803 = vmatpush3.bf16.msra.mxu1 %v1208_v46  ;;  %v2446_v46 = vld [vmem:[#allocation2 + $0x80] sm:$0xff] }
 0x190   : > { %1366 = vst.msk [vmem:[#allocation2 + $0x28] sm:$0xff] %vm291_vm1, %v2362_v47  ;;  %v637_v53 = vpop.xlane.xlu0 %636 }
 0x191   : > { %v2378_v56 = vmax.f32 %v2364_v49, %v637_v53  ;;  %v646_v57 = vpop.xlane.xlu1 %645  ;;  %v2426_v53 = vld [vmem:[#allocation2 + $0x70] sm:$0xff] }
 0x192   : > { %v2383_v62 = vmax.f32 %v2371_v51, %v646_v57 }
 0x193   : > { %1369 = vst.msk [vmem:[#allocation2 + $0x40] sm:$0xff] %vm291_vm1, %v2378_v56  ;;  %767 = vperm.xlu1 %1855, %v2340_v32  }
 0x194   : > { %v643_v1 = vpop.xlane.xlu0 %642  ;;  %1372 = vst.msk [vmem:[#allocation2 + $0x58] sm:$0xff] %vm291_vm1, %v2383_v62 }
 0x195   : > { %v2397_v5 = vmax.f32 %v2380_v59, %v643_v1  ;;  %v640_v6 = vpop.xlane.xlu1 %639  ;;  %v709_v1 = vmul.f32 1.442695, %v689_v17 }
 0x196   : > { %v2402_v9 = vmax.f32 %v2390_v0, %v640_v6 }
 0x197   : > { %1371 = vst.msk [vmem:[#allocation2 + $0x50] sm:$0xff] %vm291_vm1, %v2397_v5  ;;  %797 = vperm.xlu0 %1856, %v2397_v5   ;;  %782 = vperm.xlu1 %1855, %v2343_v35   ;;  %1867 = vpow2.f32 %v709_v1 }
 0x198   : > { %v649_v22 = vpop.xlane.xlu0 %648  ;;  %1370 = vst.msk [vmem:[#allocation2 + $0x48] sm:$0xff] %vm291_vm1, %v2402_v9 }
 0x199   : > { %v2424_v33 = vmax.f32 %v2399_v7, %v649_v22  ;;  %v658_v43 = vpop.xlane.xlu1 %657 }
 0x19a   : > { %v2429_v57 = vmax.f32 %v2410_v14, %v658_v43 }
 0x19b   : > { %1373 = vst.msk [vmem:[#allocation2 + $0x60] sm:$0xff] %vm291_vm1, %v2424_v33  ;;  %807 = vperm.xlu0 %1856, %v2424_v33   ;;  %772 = vperm.xlu1 %1855, %v2362_v47  }
 0x19c   : > { %v655_v6 = vpop.xlane.xlu0 %654  ;;  %1376 = vst.msk [vmem:[#allocation2 + $0x78] sm:$0xff] %vm291_vm1, %v2429_v57 }
 0x19d   : > { %v2444_v30 = vmax.f32 %v2426_v53, %v655_v6  ;;  %v652_v43 = vpop.xlane.xlu1 %651 }
 0x19e   : > { %v2449_v2 = vmax.f32 %v2437_v26, %v652_v43  ;;  %v2461_v43 = vld [vmem:[#allocation2 + $0x88] sm:$0xff] }
 0x19f   : > { %1375 = vst.msk [vmem:[#allocation2 + $0x70] sm:$0xff] %vm291_vm1, %v2444_v30  ;;  %817 = vperm.xlu0 %1856, %v2444_v30   ;;  %787 = vperm.xlu1 %1855, %v2378_v56  }
 0x1a0   : > { %v661_v17 = vpop.xlane.xlu0 %660  ;;  %1374 = vst.msk [vmem:[#allocation2 + $0x68] sm:$0xff] %vm291_vm1, %v2449_v2 }
 0x1a1   : > { %v2464_v22 = vmax.f32 %v2446_v46, %v661_v17  ;;  %v688_v17 = vsub.f32 %v2306_v13, %v2312_v19  ;;  %v2494_v19 = vpop.eup %1867 }
 0x1a2   : > { %v664_v60 = vpop.xlane.xlu1 %663  ;;  %2802 = vst [vmem:[#allocation5_spill] sm:$0xff] %v2494_v19 }
 0x1a3   : > { %1377 = vst.msk [vmem:[#allocation2 + $0x80] sm:$0xff] %vm291_vm1, %v2464_v22  ;;  %827 = vperm.xlu0 %1856, %v2464_v22   ;;  %792 = vperm.xlu1 %1855, %v2402_v9   ;;  %v2475_v1 = vmax.f32 %v2461_v43, %v664_v60  ;;  %v690_v60 = vsub.f32 %v2304_v11, %v2309_v15  ;;  %v707_v13 = vmul.f32 1.442695, %v688_v17 }
 0x1a4   : > { %v668_v6 = vpop.xlane.xlu0 %667 }
 0x1a5   : > { %v2480_v12 = vmax.f32 %v2466_v40, %v668_v6  ;;  %1378 = vst.msk [vmem:[#allocation2 + $0x88] sm:$0xff] %vm291_vm1, %v2475_v1  ;;  %v711_v6 = vmul.f32 1.442695, %v690_v60  ;;  %1869 = vpow2.f32 %v707_v13 }
 0x1a7   : > { %1379 = vst.msk [vmem:[#allocation2 + $0x90] sm:$0x7] %vm310_vm5, %v2480_v12  ;;  %837 = vperm.xlu0 %1856, %v2480_v12   ;;  %802 = vperm.xlu1 %1855, %v2383_v62   ;;  %1871 = vpow2.f32 %v711_v6 }
 0x1a8   : > { %1873 = vpow2.f32 %v713_v10 }
 0x1ab   : > { %1058 = vperm.xlu0 %1856, %v2494_v19   ;;  %812 = vperm.xlu1 %1855, %v2449_v2  }
 0x1af   : > { %822 = vperm.xlu1 %1855, %v2429_v57   ;;  %v2502_v11 = vpop.eup %1869 }
 0x1b1   : > { %v2505_v15 = vpop.eup %1871 }
 0x1b2   : > { %2803 = vst [vmem:[#allocation6_spill] sm:$0xff] %v2505_v15  ;;  %v2508_v17 = vpop.eup %1873 }
 0x1b3   : > { %832 = vperm.xlu1 %1855, %v2475_v1   ;;  %2804 = vst [vmem:[#allocation7_spill] sm:$0xff] %v2508_v17 }
 0x1b7   : > { %1053 = vperm.xlu1 %1855, %v2502_v11  }
 0x1bb   : > { %1063 = vperm.xlu1 %1855, %v2505_v15  }
 0x1bf   : > { %1068 = vperm.xlu1 %1855, %v2508_v17  }
 0x202   : > { %v748_v20 = vpop.permute.xlu1 %747 }
 0x203   : > { %v840_v23 = vsub.f32 %v2120_v18, %v748_v20 }
 0x205   : > { %v859_v60 = vmul.f32 1.442695, %v840_v23 }
 0x206   : > { %v753_v25 = vpop.permute.xlu0 %752  ;;  %v758_v13 = vpop.permute.xlu1 %757 }
 0x207   : > { %1875 = vpow2.f32 %v859_v60  ;;  %v841_v10 = vsub.f32 %v2132_v24, %v753_v25  ;;  %v842_v6 = vsub.f32 %v2116_v16, %v758_v13 }
 0x209   : > { %v861_v63 = vmul.f32 1.442695, %v841_v10  ;;  %v863_v50 = vmul.f32 1.442695, %v842_v6 }
 0x20a   : > { %v763_v38 = vpop.permute.xlu1 %762 }
 0x20b   : > { %1877 = vpow2.f32 %v861_v63  ;;  %v843_v52 = vsub.f32 %v2126_v21, %v763_v38 }
 0x20c   : > { %1879 = vpow2.f32 %v863_v50 }
 0x20d   : > { %v865_v19 = vmul.f32 1.442695, %v843_v52 }
 0x20e   : > { %v778_v17 = vpop.permute.xlu1 %777 }
 0x20f   : > { %1881 = vpow2.f32 %v865_v19  ;;  %v846_v18 = vsub.f32 %v2150_v34, %v778_v17 }
 0x211   : > { %v1876_v20 = vpop.eup %1875  ;;  %v871_v23 = vmul.f32 1.442695, %v846_v18 }
 0x212   : > { %v768_v15 = vpop.permute.xlu1 %767  ;;  %v935_v60 = vsel %vm610_vm3, %v1876_v20, 0.0 }
 0x213   : > { %1883 = vpow2.f32 %v871_v23  ;;  %v844_v16 = vsub.f32 %v2140_v29, %v768_v15  ;;  %936 = vadd.xlane.f32.xlu1 %v935_v60 }
 0x215   : > { %v1878_v24 = vpop.eup %1877  ;;  %v867_v25 = vmul.f32 1.442695, %v844_v16 }
 0x216   : > { %v1880_v63 = vpop.eup %1879  ;;  %v798_v13 = vpop.permute.xlu0 %797  ;;  %v1165_v38 = vpack.c.bf16 %v1878_v24, %v1876_v20 }
 0x217   : > { %v783_v21 = vpop.permute.xlu1 %782  ;;  %1885 = vpow2.f32 %v867_v25  ;;  %v850_v50 = vsub.f32 %v2164_v41, %v798_v13  ;;  %v941_v52 = vsel %vm610_vm3, %v1880_v63, 0.0  ;;  %v938_v41 = vsel %vm610_vm3, %v1878_v24, 0.0 }
 0x218   : > { %v847_v34 = vsub.f32 %v2144_v31, %v783_v21  ;;  %942 = vadd.xlane.f32.xlu0 %v941_v52  ;;  %1804 = vmatprep.mubr.msk.bf16.mxu1 %vm610_vm3, %v1165_v38 }
 0x219   : > { %v1882_v19 = vpop.eup %1881  ;;  %v879_v17 = vmul.f32 1.442695, %v850_v50 }
 0x21a   : > { %v873_v29 = vmul.f32 1.442695, %v847_v34  ;;  %v808_v15 = vpop.permute.xlu0 %807  ;;  %v944_v6 = vsel %vm610_vm3, %v1882_v19, 0.0  ;;  %v1166_v18 = vpack.c.bf16 %v1882_v19, %v1880_v63 }
 0x21b   : > { %v773_v10 = vpop.permute.xlu1 %772  ;;  %1887 = vpow2.f32 %v879_v17  ;;  %945 = vadd.xlane.f32.xlu1 %v944_v6  ;;  %v852_v24 = vsub.f32 %v2192_v55, %v808_v15 }
 0x21c   : > { %v845_v20 = vsub.f32 %v2156_v36, %v773_v10  ;;  %1889 = vpow2.f32 %v873_v29  ;;  %939 = vadd.xlane.f32.xlu0 %v938_v41  ;;  %1805 = vmatmul.mubr.msk.bf16.vlgmr.msra.gmra.mrb[0].mxu1 %vm610_vm3, %v1166_v18 }
 0x21d   : > { %v1884_v31 = vpop.eup %1883  ;;  %v883_v10 = vmul.f32 1.442695, %v852_v24 }
 0x21e   : > { %v869_v23 = vmul.f32 1.442695, %v845_v20  ;;  %v818_v60 = vpop.permute.xlu0 %817  ;;  %v953_v25 = vsel %vm610_vm3, %v1884_v31, 0.0 }
 0x21f   : > { %v788_v16 = vpop.permute.xlu1 %787  ;;  %v854_v13 = vsub.f32 %v2188_v54, %v818_v60 }
 0x220   : > { %v848_v63 = vsub.f32 %v2168_v42, %v788_v16  ;;  %1891 = vpow2.f32 %v869_v23  ;;  %954 = vadd.xlane.f32.xlu0 %v953_v25 }
 0x221   : > { %v1886_v36 = vpop.eup %1885  ;;  %v887_v38 = vmul.f32 1.442695, %v854_v13 }
 0x222   : > { %v875_v21 = vmul.f32 1.442695, %v848_v63  ;;  %v828_v50 = vpop.permute.xlu0 %827  ;;  %v947_v52 = vsel %vm610_vm3, %v1886_v36, 0.0 }
 0x223   : > { %v793_v34 = vpop.permute.xlu1 %792  ;;  %v856_v23 = vsub.f32 %v2288_v4, %v828_v50 }
 0x224   : > { %v849_v19 = vsub.f32 %v2178_v48, %v793_v34  ;;  %1893 = vpow2.f32 %v875_v21  ;;  %948 = vadd.xlane.f32.xlu0 %v947_v52 }
 0x225   : > { %v1888_v17 = vpop.eup %1887  ;;  %1895 = vpow2.f32 %v887_v38  ;;  %v891_v24 = vmul.f32 1.442695, %v856_v23 }
 0x226   : > { %v877_v29 = vmul.f32 1.442695, %v849_v19  ;;  %v1890_v54 = vpop.eup %1889  ;;  %v838_v42 = vpop.permute.xlu0 %837  ;;  %v965_v18 = vsel %vm610_vm3, %v1888_v17, 0.0 }
 0x227   : > { %v803_v6 = vpop.permute.xlu1 %802  ;;  %v858_v55 = vsub.f32 %v2284_v3, %v838_v42  ;;  %v956_v20 = vsel %vm610_vm3, %v1890_v54, 0.0  ;;  %v1168_v63 = vpack.c.bf16 %v1890_v54, %v1884_v31 }
 0x228   : > { %v851_v15 = vsub.f32 %v2174_v45, %v803_v6  ;;  %1897 = vpow2.f32 %v877_v29  ;;  %966 = vadd.xlane.f32.xlu0 %v965_v18  ;;  %957 = vadd.xlane.f32.xlu1 %v956_v20 }
 0x229   : > { %1899 = vpow2.f32 %v883_v10  ;;  %v895_v60 = vmul.f32 1.442695, %v858_v55 }
 0x22a   : > { %v881_v48 = vmul.f32 1.442695, %v851_v15  ;;  %v1892_v41 = vpop.eup %1891 }
 0x22b   : > { %v813_v16 = vpop.permute.xlu1 %812  ;;  %v950_v13 = vsel %vm610_vm3, %v1892_v41, 0.0  ;;  %v1167_v3 = vpack.c.bf16 %v1892_v41, %v1886_v36 }
 0x22c   : > { %v853_v25 = vsub.f32 %v2274_v61, %v813_v16  ;;  %1901 = vpow2.f32 %v881_v48  ;;  %951 = vadd.xlane.f32.xlu1 %v950_v13 }
 0x22d   : > { %1903 = vpow2.f32 %v895_v60  ;;  %1808 = vmatprep.mubr.msk.bf16.mxu1 %vm610_vm3, %v1167_v3 }
 0x22e   : > { %v885_v45 = vmul.f32 1.442695, %v853_v25  ;;  %v1894_v21 = vpop.eup %1893  ;;  %1809 = vmatmul.mubr.msk.bf16.gmra.mrb[4].mxu1 %vm610_vm3, %v1168_v63 }
 0x22f   : > { %v823_v38 = vpop.permute.xlu1 %822  ;;  %v959_v61 = vsel %vm610_vm3, %v1894_v21, 0.0  ;;  %v1896_v50 = vpop.eup %1895 }
 0x230   : > { %1905 = vpow2.f32 %v885_v45  ;;  %v855_v4 = vsub.f32 %v2198_v58, %v823_v38  ;;  %960 = vadd.xlane.f32.xlu0 %v959_v61  ;;  %v977_v19 = vsel %vm610_vm3, %v1896_v50, 0.0  ;;  %v2805_v45 = vsub.f32 %v2352_v39, %v2362_v47 }
 0x231   : > { %1907 = vpow2.f32 %v891_v24  ;;  %v2809_v39 = vsub.f32 %v2380_v59, %v2397_v5 }
 0x232   : > { %v889_v34 = vmul.f32 1.442695, %v855_v4  ;;  %v1898_v52 = vpop.eup %1897  ;;  %v717_v63 = vmul.f32 1.442695, %v2805_v45  ;;  %v2807_v4 = vsub.f32 %v2345_v37, %v2359_v44  ;;  %v2810_v37 = vsub.f32 %v2399_v7, %v2424_v33  ;;  %v2822_v45 = vld [vmem:[#allocation7_spill] sm:$0xff] }
 0x233   : > { %v833_v36 = vpop.permute.xlu1 %832  ;;  %v1169_v29 = vpack.c.bf16 %v1898_v52, %v1894_v21  ;;  %v1900_v54 = vpop.eup %1899  ;;  %v962_v48 = vsel %vm610_vm3, %v1898_v52, 0.0  ;;  %v2806_v21 = vsub.f32 %v2331_v27, %v2340_v32  ;;  %v727_v27 = vmul.f32 1.442695, %v2809_v39 }
 0x234   : > { %1909 = vpow2.f32 %v889_v34  ;;  %v857_v31 = vsub.f32 %v2294_v8, %v833_v36  ;;  %978 = vadd.xlane.f32.xlu0 %v977_v19  ;;  %v971_v42 = vsel %vm610_vm3, %v1900_v54, 0.0  ;;  %v719_v61 = vmul.f32 1.442695, %v2807_v4 }
 0x235   : > { %1812 = vmatprep.mubr.msk.bf16.mxu1 %vm610_vm3, %v1169_v29  ;;  %v715_v24 = vmul.f32 1.442695, %v2806_v21  ;;  %v731_v44 = vmul.f32 1.442695, %v2810_v37  ;;  %v2812_v52 = vsub.f32 %v2446_v46, %v2464_v22  ;;  %v2813_v33 = vsub.f32 %v2466_v40, %v2480_v12  ;;  %v2823_v21 = vld [vmem:[#allocation5_spill] sm:$0xff] }
 0x236   : > { %v893_v10 = vmul.f32 1.442695, %v857_v31  ;;  %v1902_v58 = vpop.eup %1901  ;;  %v2814_v22 = vmov 0.0   ;;  %v2815_v12 = vsub.f32 %v2337_v28, %v2343_v35  ;;  %v2819_v28 = vsub.f32 %v2410_v14, %v2429_v57 }
 0x237   : > { %v968_v6 = vsel %vm610_vm3, %v1902_v58, 0.0  ;;  %v1170_v18 = vpack.c.bf16 %v1902_v58, %v1888_v17  ;;  %v1904_v55 = vpop.eup %1903  ;;  %v739_v36 = vmul.f32 1.442695, %v2812_v52  ;;  %v743_v31 = vmul.f32 1.442695, %v2813_v33  ;;  %v907_v52 = vld [vmem:[#allocation3 + $0x50] sm:$0xff] }
 0x238   : > { %1911 = vpow2.f32 %v893_v10  ;;  %972 = vadd.xlane.f32.xlu0 %v971_v42  ;;  %969 = vadd.xlane.f32.xlu1 %v968_v6  ;;  %v989_v20 = vsel %vm665_vm4, %v1904_v55, 0.0  ;;  %v1174_v38 = vpack.c.bf16 %v1904_v55, %v1904_v55  ;;  %351 = vst.msk [vmem:[#allocation4 + $0x90] sm:$0x7] %vm350_vm7, %v2814_v22  ;;  %v721_v29 = vmul.f32 1.442695, %v2815_v12 }
 0x239   : > { %1813 = vmatmul.mubr.msk.bf16.gmra.mrb[8].mxu1 %vm610_vm3, %v1170_v18  ;;  %1913 = vpow2.f32 %v717_v63  ;;  %v2817_v58 = vsub.f32 %v2371_v51, %v2383_v62  ;;  %v2818_v6 = vsub.f32 %v2437_v26, %v2449_v2  ;;  %v737_v35 = vmul.f32 1.442695, %v2819_v28  ;;  %v905_v28 = vld [vmem:[#allocation3 + $0x40] sm:$0xff] }
 0x23a   : > { %v1906_v15 = vpop.eup %1905  ;;  %1915 = vpow2.f32 %v715_v24  ;;  %v2820_v51 = vsub.f32 %v2461_v43, %v2475_v1  ;;  %v897_v43 = vld [vmem:[#allocation3] sm:$0xff] }
 0x23b   : > { %v1171_v8 = vpack.c.bf16 %v1906_v15, %v1900_v54  ;;  %v1908_v41 = vpop.eup %1907  ;;  %v974_v3 = vsel %vm610_vm3, %v1906_v15, 0.0  ;;  %1917 = vpow2.f32 %v719_v61  ;;  %v2816_v54 = vsub.f32 %v2390_v0, %v2402_v9  ;;  %v2636_v0 = vpop.permute.xlu1 %1053  ;;  %v903_v61 = vld [vmem:[#allocation3 + $0x30] sm:$0xff] }
 0x23c   : > { %990 = vadd.xlane.f32.xlu0 %v989_v20  ;;  %963 = vadd.xlane.f32.xlu1 %v962_v48  ;;  %v983_v16 = vsel %vm610_vm3, %v1908_v41, 0.0  ;;  %v729_v42 = vmul.f32 1.442695, %v2817_v58  ;;  %v733_v18 = vmul.f32 1.442695, %v2818_v6  ;;  %v2655_v48 = vpop.permute.xlu0 %1058 }
 0x23d   : > { %1816 = vmatprep.mubr.msk.bf16.mxu1 %vm610_vm3, %v1171_v8  ;;  %v725_v10 = vmul.f32 1.442695, %v2816_v54  ;;  %v741_v62 = vmul.f32 1.442695, %v2820_v51  ;;  %v916_v8 = vmul.f32 %v2502_v11, %v897_v43 }
 0x23e   : > { %v1910_v23 = vpop.eup %1909 }
 0x23f   : > { %v980_v60 = vsel %vm610_vm3, %v1910_v23, 0.0  ;;  %v1172_v17 = vpack.c.bf16 %v1910_v23, %v1896_v50  ;;  %v2808_v50 = vsub.f32 %v2364_v49, %v2378_v56  ;;  %v2811_v56 = vsub.f32 %v2426_v53, %v2444_v30  ;;  %v2643_v14 = vpop.permute.xlu1 %1063  ;;  %v899_v23 = vld [vmem:[#allocation3 + $0x10] sm:$0xff] }
 0x240   : > { %984 = vadd.xlane.f32.xlu0 %v983_v16  ;;  %981 = vadd.xlane.f32.xlu1 %v980_v60  ;;  %v2821_v60 = vld [vmem:[#allocation6_spill] sm:$0xff] }
 0x241   : > { %1817 = vmatmul.mubr.msk.bf16.gmra.mrb[12].mxu1 %vm610_vm3, %v1172_v17  ;;  %v723_v34 = vmul.f32 1.442695, %v2808_v50  ;;  %v735_v59 = vmul.f32 1.442695, %v2811_v56  ;;  %v918_v17 = vmul.f32 %v2821_v60, %v899_v23  ;;  %v900_v16 = vld [vmem:[#allocation3 + $0x18] sm:$0xff] }
 0x242   : > { %v1912_v25 = vpop.eup %1911  ;;  %v919_v63 = vmul.f32 %v2822_v45, %v900_v16 }
 0x243   : > { %v1173_v13 = vpack.c.bf16 %v1912_v25, %v1908_v41  ;;  %1919 = vpow2.f32 %v723_v34  ;;  %v2573_v32 = vpop.eup %1913  ;;  %v986_v40 = vsel %vm610_vm3, %v1912_v25, 0.0  ;;  %v2649_v26 = vpop.permute.xlu1 %1068 }
 0x244   : > { %975 = vadd.xlane.f32.xlu1 %v974_v3  ;;  %v2575_v47 = vpop.eup %1915  ;;  %1921 = vpow2.f32 %v727_v27  ;;  %v901_v27 = vld [vmem:[#allocation3 + $0x20] sm:$0xff] }
 0x245   : > { %1820 = vmatprep.mubr.msk.bf16.mxu1 %vm610_vm3, %v1173_v13  ;;  %v2582_v49 = vpop.eup %1917  ;;  %1923 = vpow2.f32 %v731_v44  ;;  %v898_v13 = vld [vmem:[#allocation3 + $0x8] sm:$0xff]  ;;  %v920_v56 = vmul.f32 %v2575_v47, %v901_v27 }
 0x246   : > { %1925 = vpow2.f32 %v735_v59  ;;  %v917_v24 = vmul.f32 %v2823_v21, %v898_v13  ;;  %v922_v34 = vmul.f32 %v2582_v49, %v903_v61  ;;  %v908_v13 = vld [vmem:[#allocation3 + $0x58] sm:$0xff] }
 0x247   : > { %1927 = vpow2.f32 %v739_v36  ;;  %v904_v36 = vld [vmem:[#allocation3 + $0x38] sm:$0xff] }
 0x248   : > { %1929 = vpow2.f32 %v743_v31 }
 0x249   : > { %1821 = vmatmul.mubr.msk.bf16.gmra.mrb[16].mxu1 %vm610_vm3, %v1174_v38  ;;  %1931 = vpow2.f32 %v721_v29 }
 0x24a   : > { %1933 = vpow2.f32 %v725_v10  ;;  %v902_v10 = vld [vmem:[#allocation3 + $0x28] sm:$0xff] }
 0x24b   : > { %1935 = vpow2.f32 %v729_v42  ;;  %v921_v6 = vmul.f32 %v2573_v32, %v902_v10 }
 0x24c   : > { %1937 = vpow2.f32 %v733_v18 }
 0x24d   : > { %v2588_v5 = vpop.eup %1919  ;;  %1939 = vpow2.f32 %v737_v35 }
 0x24e   : > { %v2594_v7 = vpop.eup %1921  ;;  %1941 = vpow2.f32 %v741_v62  ;;  %v924_v51 = vmul.f32 %v2588_v5, %v905_v28 }
 0x24f   : > { %v2600_v53 = vpop.eup %1923 }
 0x250   : > { %v2603_v30 = vpop.eup %1925 }
 0x251   : > { %v2608_v46 = vpop.eup %1927 }
 0x252   : > { %v2611_v19 = vpop.eup %1929 }
 0x253   : > { %v1932_v55 = vpop.eup %1931 }
 0x254   : > { %v2630_v15 = vpop.eup %1933 }
 0x255   : > { %1078 = vperm.xlu1 %1855, %v2573_v32   ;;  %v2638_v2 = vpop.eup %1935 }
 0x256   : > { %1073 = vperm.xlu0 %1856, %v2575_v47   ;;  %v2641_v9 = vpop.eup %1937  ;;  %v927_v21 = vmul.f32 %v2638_v2, %v908_v13 }
 0x257   : > { %v2646_v57 = vpop.eup %1939 }
 0x258   : > { %v2651_v1 = vpop.eup %1941 }
 0x25a   : > { %1083 = vperm.xlu0 %1856, %v2582_v49   ;;  %v926_v49 = vmul.f32 %v2594_v7, %v907_v52 }
 0x25e   : > { %1093 = vperm.xlu0 %1856, %v2588_v5  }
 0x262   : > { %1103 = vperm.xlu0 %1856, %v2594_v7  }
 0x266   : > { %1113 = vperm.xlu0 %1856, %v2600_v53  }
 0x26a   : > { %1123 = vperm.xlu0 %1856, %v2603_v30  }
 0x26e   : > { %1133 = vperm.xlu0 %1856, %v2608_v46  }
 0x272   : > { %1143 = vperm.xlu0 %1856, %v2611_v19  }
 0x279   : > { %987 = vadd.xlane.f32.xlu1 %v986_v40  ;;  %v923_v40 = vmul.f32 %v1932_v55, %v904_v36 }
 0x28a   : > { %1088 = vperm.xlu1 %1855, %v1932_v55  }
 0x28e   : > { %1098 = vperm.xlu1 %1855, %v2630_v15  }
 0x292   : > { %1108 = vperm.xlu1 %1855, %v2638_v2  }
 0x296   : > { %1118 = vperm.xlu1 %1855, %v2641_v9  }
 0x29a   : > { %1128 = vperm.xlu1 %1855, %v2646_v57  }
 0x29e   : > { %1138 = vperm.xlu1 %1855, %v2651_v1  }
 0x2a0   : > { %v937_v20 = vpop.xlane.xlu1 %936 }
 0x2a1   : > { %v992_v41 = vadd.f32 %v937_v20, %v916_v8  ;;  %v911_v8 = vld [vmem:[#allocation3 + $0x70] sm:$0xff] }
 0x2a2   : > { %v930_v60 = vmul.f32 %v2603_v30, %v911_v8 }
 0x2a3   : > { %1012 = vst.msk [vmem:[#allocation3] sm:$0xff] %vm291_vm1, %v992_v41 }
 0x2a5   : > { %v943_v25 = vpop.xlane.xlu0 %942 }
 0x2a6   : > { %v994_v3 = vadd.f32 %v943_v25, %v918_v17  ;;  %v909_v25 = vld [vmem:[#allocation3 + $0x60] sm:$0xff] }
 0x2a8   : > { %1014 = vst.msk [vmem:[#allocation3 + $0x10] sm:$0xff] %vm291_vm1, %v994_v3  ;;  %v946_v11 = vpop.xlane.xlu1 %945 }
 0x2a9   : > { %v940_v38 = vpop.xlane.xlu0 %939  ;;  %v995_v4 = vadd.f32 %v946_v11, %v919_v63  ;;  %v928_v63 = vmul.f32 %v2600_v53, %v909_v25  ;;  %v915_v11 = vld [vmem:[#allocation3 + $0x90] sm:$0x7] }
 0x2aa   : > { %v993_v50 = vadd.f32 %v940_v38, %v917_v24  ;;  %v1421_v33 = vld [vmem:[#allocation3] sm:$0xff]  ;;  %v906_v38 = vld [vmem:[#allocation3 + $0x48] sm:$0xff] }
 0x2ab   : > { %1015 = vst.msk [vmem:[#allocation3 + $0x18] sm:$0xff] %vm291_vm1, %v995_v4  ;;  %v925_v53 = vmul.f32 %v2630_v15, %v906_v38 }
 0x2ac   : > { %1013 = vst.msk [vmem:[#allocation3 + $0x8] sm:$0xff] %vm291_vm1, %v993_v50 }
 0x2ad   : > { %v955_v39 = vpop.xlane.xlu0 %954 }
 0x2ae   : > { %v998_v37 = vadd.f32 %v955_v39, %v922_v34  ;;  %v934_v39 = vmul.f32 %v2611_v19, %v915_v11 }
 0x2af   : > { %v1423_v44 = vld [vmem:[#allocation3 + $0x10] sm:$0xff] }
 0x2b0   : > { %1018 = vst.msk [vmem:[#allocation3 + $0x30] sm:$0xff] %vm291_vm1, %v998_v37  ;;  %1943 = vrcp.f32 %v1423_v44  ;;  %v913_v37 = vld [vmem:[#allocation3 + $0x80] sm:$0xff]  ;;  %v912_v44 = vld [vmem:[#allocation3 + $0x78] sm:$0xff] }
 0x2b1   : > { %v949_v59 = vpop.xlane.xlu0 %948  ;;  %v932_v19 = vmul.f32 %v2608_v46, %v913_v37  ;;  %v931_v15 = vmul.f32 %v2646_v57, %v912_v44 }
 0x2b2   : > { %v996_v31 = vadd.f32 %v949_v59, %v920_v56  ;;  %v1424_v22 = vld [vmem:[#allocation3 + $0x18] sm:$0xff] }
 0x2b3   : > { %1945 = vrcp.f32 %v1424_v22  ;;  %v1422_v12 = vld [vmem:[#allocation3 + $0x8] sm:$0xff] }
 0x2b4   : > { %1016 = vst.msk [vmem:[#allocation3 + $0x20] sm:$0xff] %vm291_vm1, %v996_v31  ;;  %1947 = vrcp.f32 %v1421_v33 }
 0x2b5   : > { %v967_v29 = vpop.xlane.xlu0 %966  ;;  %v958_v54 = vpop.xlane.xlu1 %957  ;;  %1949 = vrcp.f32 %v1422_v12 }
 0x2b6   : > { %v1002_v58 = vadd.f32 %v967_v29, %v926_v49  ;;  %v999_v47 = vadd.f32 %v958_v54, %v923_v40  ;;  %v910_v49 = vld [vmem:[#allocation3 + $0x68] sm:$0xff] }
 0x2b7   : > { %v1427_v42 = vld [vmem:[#allocation3 + $0x30] sm:$0xff] }
 0x2b8   : > { %1022 = vst.msk [vmem:[#allocation3 + $0x50] sm:$0xff] %vm291_vm1, %v1002_v58  ;;  %1019 = vst.msk [vmem:[#allocation3 + $0x38] sm:$0xff] %vm291_vm1, %v999_v47  ;;  %1951 = vrcp.f32 %v1427_v42  ;;  %v929_v58 = vmul.f32 %v2641_v9, %v910_v49  ;;  %v1039_v49 = vld [vmem:[#allocation4 + $0x38] sm:$0xff] }
 0x2b9   : > { %v952_v18 = vpop.xlane.xlu1 %951 }
 0x2ba   : > { %v1944_v7 = vpop.eup %1943  ;;  %v997_v55 = vadd.f32 %v952_v18, %v921_v6 }
 0x2bb   : > { %1471 = vperm.xlu1 %1855, %v1944_v7   ;;  %v1425_v35 = vld [vmem:[#allocation3 + $0x20] sm:$0xff] }
 0x2bc   : > { %1017 = vst.msk [vmem:[#allocation3 + $0x28] sm:$0xff] %vm291_vm1, %v997_v55  ;;  %1953 = vrcp.f32 %v1425_v35 }
 0x2bd   : > { %v1946_v62 = vpop.eup %1945  ;;  %v961_v43 = vpop.xlane.xlu0 %960 }
 0x2be   : > { %v1948_v20 = vpop.eup %1947  ;;  %v1000_v41 = vadd.f32 %v961_v43, %v924_v51  ;;  %1476 = vperm.xlu0 %1856, %v1946_v62  }
 0x2bf   : > { %1461 = vperm.xlu1 %1855, %v1948_v20   ;;  %v1431_v32 = vld [vmem:[#allocation3 + $0x50] sm:$0xff]  ;;  %v1428_v23 = vld [vmem:[#allocation3 + $0x38] sm:$0xff]  ;;  %v1950_v17 = vpop.eup %1949 }
 0x2c0   : > { %1020 = vst.msk [vmem:[#allocation3 + $0x40] sm:$0xff] %vm291_vm1, %v1000_v41  ;;  %1955 = vrcp.f32 %v1431_v32  ;;  %v1034_v41 = vld [vmem:[#allocation4 + $0x10] sm:$0xff]  ;;  %v1032_v32 = vld [vmem:[#allocation4] sm:$0xff] }
 0x2c1   : > { %v979_v16 = vpop.xlane.xlu0 %978  ;;  %1957 = vrcp.f32 %v1428_v23  ;;  %v1035_v23 = vld [vmem:[#allocation4 + $0x18] sm:$0xff]  ;;  %v1146_v25 = vmul.f32 %v2636_v0, %v1032_v32 }
 0x2c2   : > { %v1952_v5 = vpop.eup %1951  ;;  %v1006_v3 = vadd.f32 %v979_v16, %v930_v60  ;;  %1466 = vperm.xlu0 %1856, %v1950_v17   ;;  %v1033_v60 = vld [vmem:[#allocation4 + $0x8] sm:$0xff]  ;;  %v1148_v17 = vmul.f32 %v2643_v14, %v1034_v41 }
 0x2c3   : > { %1491 = vperm.xlu1 %1855, %v1952_v5   ;;  %v1426_v45 = vld [vmem:[#allocation3 + $0x28] sm:$0xff]  ;;  %v1149_v5 = vmul.f32 %v2649_v26, %v1035_v23 }
 0x2c4   : > { %1026 = vst.msk [vmem:[#allocation3 + $0x70] sm:$0xff] %vm291_vm1, %v1006_v3  ;;  %1959 = vrcp.f32 %v1426_v45  ;;  %v1038_v26 = vld [vmem:[#allocation4 + $0x30] sm:$0xff] }
 0x2c5   : > { %v973_v24 = vpop.xlane.xlu0 %972  ;;  %v970_v30 = vpop.xlane.xlu1 %969 }
 0x2c6   : > { %v1954_v4 = vpop.eup %1953  ;;  %v1004_v61 = vadd.f32 %v973_v24, %v928_v63  ;;  %v1003_v50 = vadd.f32 %v970_v30, %v927_v21  ;;  %v1147_v63 = vmul.f32 %v2655_v48, %v1033_v60 }
 0x2c7   : > { %1481 = vperm.xlu1 %1855, %v1954_v4   ;;  %v1429_v34 = vld [vmem:[#allocation3 + $0x40] sm:$0xff]  ;;  %v1036_v4 = vld [vmem:[#allocation4 + $0x20] sm:$0xff] }
 0x2c8   : > { %1024 = vst.msk [vmem:[#allocation3 + $0x60] sm:$0xff] %vm291_vm1, %v1004_v61  ;;  %1023 = vst.msk [vmem:[#allocation3 + $0x58] sm:$0xff] %vm291_vm1, %v1003_v50  ;;  %1961 = vrcp.f32 %v1429_v34  ;;  %v1037_v50 = vld [vmem:[#allocation4 + $0x28] sm:$0xff] }
 0x2c9   : > { %v991_v2 = vpop.xlane.xlu0 %990  ;;  %v964_v27 = vpop.xlane.xlu1 %963 }
 0x2ca   : > { %v1956_v56 = vpop.eup %1955  ;;  %v1010_v59 = vadd.f32 %v991_v2, %v934_v39  ;;  %v1001_v52 = vadd.f32 %v964_v27, %v925_v53  ;;  %v914_v2 = vld [vmem:[#allocation3 + $0x88] sm:$0xff] }
 0x2cb   : > { %v1958_v36 = vpop.eup %1957  ;;  %1511 = vperm.xlu1 %1855, %v1956_v56   ;;  %v1435_v33 = vld [vmem:[#allocation3 + $0x70] sm:$0xff] }
 0x2cc   : > { %1031 = vst.msk [vmem:[#allocation3 + $0x90] sm:$0x7] %vm310_vm5, %v1010_v59  ;;  %1496 = vperm.xlu0 %1856, %v1958_v36   ;;  %1963 = vrcp.f32 %v1435_v33  ;;  %v933_v36 = vmul.f32 %v2651_v1, %v914_v2  ;;  %v1041_v1 = vld [vmem:[#allocation4 + $0x48] sm:$0xff] }
 0x2cd   : > { %1021 = vst.msk [vmem:[#allocation3 + $0x48] sm:$0xff] %vm291_vm1, %v1001_v52  ;;  %v985_v31 = vpop.xlane.xlu0 %984  ;;  %v982_v22 = vpop.xlane.xlu1 %981 }
 0x2ce   : > { %v1960_v40 = vpop.eup %1959  ;;  %v1008_v12 = vadd.f32 %v985_v31, %v932_v19  ;;  %v1007_v29 = vadd.f32 %v982_v22, %v931_v15  ;;  %v1042_v22 = vld [vmem:[#allocation4 + $0x50] sm:$0xff] }
 0x2cf   : > { %v1433_v54 = vld [vmem:[#allocation3 + $0x60] sm:$0xff]  ;;  %v1432_v10 = vld [vmem:[#allocation3 + $0x58] sm:$0xff] }
 0x2d0   : > { %1028 = vst.msk [vmem:[#allocation3 + $0x80] sm:$0xff] %vm291_vm1, %v1008_v12  ;;  %1027 = vst.msk [vmem:[#allocation3 + $0x78] sm:$0xff] %vm291_vm1, %v1007_v29  ;;  %1486 = vperm.xlu0 %1856, %v1960_v40   ;;  %1965 = vrcp.f32 %v1433_v54  ;;  %v1040_v40 = vld [vmem:[#allocation4 + $0x40] sm:$0xff] }
 0x2d1   : > { %v976_v46 = vpop.xlane.xlu1 %975  ;;  %1967 = vrcp.f32 %v1432_v10 }
 0x2d2   : > { %v1962_v57 = vpop.eup %1961  ;;  %v1005_v47 = vadd.f32 %v976_v46, %v929_v58 }
 0x2d3   : > { %1501 = vperm.xlu1 %1855, %v1962_v57   ;;  %v1439_v7 = vld [vmem:[#allocation3 + $0x90] sm:$0x7] }
 0x2d4   : > { %v1430_v42 = vld [vmem:[#allocation3 + $0x48] sm:$0xff]  ;;  %1025 = vst.msk [vmem:[#allocation3 + $0x68] sm:$0xff] %vm291_vm1, %v1005_v47 }
 0x2d5   : > { %1969 = vrcp.f32 %v1430_v42  ;;  %v1074_v16 = vpop.permute.xlu0 %1073  ;;  %v1079_v48 = vpop.permute.xlu1 %1078 }
 0x2d6   : > { %v1964_v6 = vpop.eup %1963  ;;  %v1150_v39 = vmul.f32 %v1074_v16, %v1036_v4  ;;  %v1151_v44 = vmul.f32 %v1079_v48, %v1037_v50 }
 0x2d7   : > { %v1437_v18 = vld [vmem:[#allocation3 + $0x80] sm:$0xff]  ;;  %1531 = vperm.xlu1 %1855, %v1964_v6   ;;  %v1436_v28 = vld [vmem:[#allocation3 + $0x78] sm:$0xff] }
 0x2d8   : > { %1971 = vrcp.f32 %v1437_v18 }
 0x2d9   : > { %1973 = vrcp.f32 %v1436_v28  ;;  %v1084_v14 = vpop.permute.xlu0 %1083 }
 0x2da   : > { %v1966_v55 = vpop.eup %1965  ;;  %1975 = vrcp.f32 %v1439_v7  ;;  %v1152_v34 = vmul.f32 %v1084_v14, %v1038_v26 }
 0x2db   : > { %v1968_v35 = vpop.eup %1967  ;;  %1521 = vperm.xlu1 %1855, %v1966_v55   ;;  %v1434_v9 = vld [vmem:[#allocation3 + $0x68] sm:$0xff] }
 0x2dc   : > { %1516 = vperm.xlu0 %1856, %v1968_v35   ;;  %1977 = vrcp.f32 %v1434_v9  ;;  %v1046_v35 = vld [vmem:[#allocation4 + $0x70] sm:$0xff]  ;;  %v1043_v9 = vld [vmem:[#allocation4 + $0x58] sm:$0xff] }
 0x2dd   : > { %v1094_v0 = vpop.permute.xlu0 %1093 }
 0x2de   : > { %v1154_v10 = vmul.f32 %v1094_v0, %v1040_v40 }
 0x2df   : > { %v1970_v51 = vpop.eup %1969 }
 0x2e0   : > { %1506 = vperm.xlu0 %1856, %v1970_v51  }
 0x2e1   : > { %v1104_v61 = vpop.permute.xlu0 %1103 }
 0x2e2   : > { %v1972_v62 = vpop.eup %1971  ;;  %v1156_v29 = vmul.f32 %v1104_v61, %v1042_v22  ;;  %v1386_v22 = vld [vmem:[%s2720_s7 + $0x18] sm:$0xff] }
 0x2e3   : > { %v1974_v43 = vpop.eup %1973  ;;  %1541 = vperm.xlu1 %1855, %v1972_v62   ;;  %v1044_v62 = vld [vmem:[#allocation4 + $0x60] sm:$0xff] }
 0x2e4   : > { %1536 = vperm.xlu0 %1856, %v1974_v43   ;;  %v1976_v8 = vpop.eup %1975 }
 0x2e5   : > { %v1114_v33 = vpop.permute.xlu0 %1113 }
 0x2e6   : > { %v1978_v20 = vpop.eup %1977  ;;  %v1158_v23 = vmul.f32 %v1114_v33, %v1044_v62 }
 0x2e7   : > { %1551 = vperm.xlu1 %1855, %v1976_v8  }
 0x2e8   : > { %1526 = vperm.xlu0 %1856, %v1978_v20  }
 0x2e9   : > { %v1124_v58 = vpop.permute.xlu0 %1123 }
 0x2ea   : > { %v1160_v41 = vmul.f32 %v1124_v58, %v1046_v35 }
 0x2ed   : > { %v1134_v8 = vpop.permute.xlu0 %1133 }
 0x2ef   : > { %v1806_v13 = vpop.f32.mrb[0].mxu1 }
 0x2f0   : > { %v1324_v3 = vadd.f32 %v1806_v13, %v1148_v17  ;;  %v1244_v45 = vpop.f32.mrb[1].mxu1  ;;  %v1045_v17 = vld [vmem:[#allocation4 + $0x68] sm:$0xff] }
 0x2f1   : > { %v1322_v21 = vadd.f32 %v1244_v45, %v1146_v25  ;;  %v1807_v24 = vpop.f32.mrb[2].mxu1 }
 0x2f2   : > { %1343 = vst.msk [vmem:[#allocation4 + $0x10] sm:$0xff] %vm331_vm0, %v1324_v3  ;;  %v1325_v30 = vadd.f32 %v1807_v24, %v1149_v5  ;;  %v1247_v11 = vpop.f32.mrb[3].mxu1  ;;  %v1050_v24 = vld [vmem:[#allocation4 + $0x90] sm:$0x7] }
 0x2f3   : > { %1341 = vst.msk [vmem:[#allocation4] sm:$0xff] %vm331_vm0, %v1322_v21  ;;  %v1323_v38 = vadd.f32 %v1247_v11, %v1147_v63  ;;  %v1047_v11 = vld [vmem:[#allocation4 + $0x78] sm:$0xff] }
 0x2f4   : > { %1344 = vst.msk [vmem:[#allocation4 + $0x18] sm:$0xff] %vm331_vm0, %v1325_v30  ;;  %v1144_v30 = vpop.permute.xlu0 %1143 }
 0x2f5   : > { %1342 = vst.msk [vmem:[#allocation4 + $0x8] sm:$0xff] %vm331_vm0, %v1323_v38  ;;  %v1048_v38 = vld [vmem:[#allocation4 + $0x80] sm:$0xff]  ;;  %v1164_v4 = vmul.f32 %v1144_v30, %v1050_v24 }
 0x2f6   : > { %v1162_v50 = vmul.f32 %v1134_v8, %v1048_v38 }
 0x2f9   : > { %v1404_v33 = vld [vmem:[#allocation4 + $0x10] sm:$0xff] }
 0x301   : > { %v1810_v53 = vpop.f32.mrb[4].mxu1 }
 0x302   : > { %v1328_v27 = vadd.f32 %v1810_v53, %v1152_v34  ;;  %v1260_v37 = vpop.f32.mrb[5].mxu1  ;;  %v1049_v34 = vld [vmem:[#allocation4 + $0x88] sm:$0xff] }
 0x303   : > { %v1326_v56 = vadd.f32 %v1260_v37, %v1150_v39  ;;  %v1811_v59 = vpop.f32.mrb[6].mxu1 }
 0x304   : > { %1347 = vst.msk [vmem:[#allocation4 + $0x30] sm:$0xff] %vm331_vm0, %v1328_v27  ;;  %v1263_v52 = vpop.f32.mrb[7].mxu1 }
 0x305   : > { %1345 = vst.msk [vmem:[#allocation4 + $0x20] sm:$0xff] %vm331_vm0, %v1326_v56  ;;  %v1327_v19 = vadd.f32 %v1263_v52, %v1151_v44 }
 0x306   : > { %v988_v15 = vpop.xlane.xlu1 %987 }
 0x307   : > { %v1009_v31 = vadd.f32 %v988_v15, %v933_v36  ;;  %1346 = vst.msk [vmem:[#allocation4 + $0x28] sm:$0xff] %vm331_vm0, %v1327_v19  ;;  %v1385_v36 = vld [vmem:[%s2720_s7 + $0x10] sm:$0xff] }
 0x309   : > { %1029 = vst.msk [vmem:[#allocation3 + $0x88] sm:$0xff] %vm291_vm1, %v1009_v31 }
 0x30a   : > { %v1089_v12 = vpop.permute.xlu1 %1088 }
 0x30b   : > { %v1153_v54 = vmul.f32 %v1089_v12, %v1039_v49  ;;  %v1405_v49 = vld [vmem:[#allocation4 + $0x18] sm:$0xff] }
 0x30c   : > { %v1814_v46 = vpop.f32.mrb[8].mxu1  ;;  %v1406_v62 = vld [vmem:[#allocation4 + $0x20] sm:$0xff] }
 0x30d   : > { %v1329_v57 = vadd.f32 %v1811_v59, %v1153_v54  ;;  %v1332_v47 = vadd.f32 %v1814_v46, %v1156_v29  ;;  %v1276_v42 = vpop.f32.mrb[9].mxu1  ;;  %v1383_v29 = vld [vmem:[%s2720_s7] sm:$0xff]  ;;  %v1402_v54 = vld [vmem:[#allocation4] sm:$0xff] }
 0x30e   : > { %v1330_v6 = vadd.f32 %v1276_v42, %v1154_v10  ;;  %v1815_v18 = vpop.f32.mrb[10].mxu1  ;;  %v1099_v28 = vpop.permute.xlu1 %1098 }
 0x30f   : > { %1348 = vst.msk [vmem:[#allocation4 + $0x38] sm:$0xff] %vm331_vm0, %v1329_v57  ;;  %1351 = vst.msk [vmem:[#allocation4 + $0x50] sm:$0xff] %vm331_vm0, %v1332_v47  ;;  %v1155_v7 = vmul.f32 %v1099_v28, %v1041_v1  ;;  %v1279_v55 = vpop.f32.mrb[11].mxu1  ;;  %v1384_v57 = vld [vmem:[%s2720_s7 + $0x8] sm:$0xff]  ;;  %v1403_v47 = vld [vmem:[#allocation4 + $0x8] sm:$0xff] }
 0x310   : > { %1349 = vst.msk [vmem:[#allocation4 + $0x40] sm:$0xff] %vm331_vm0, %v1330_v6  ;;  %v1438_v51 = vld [vmem:[#allocation3 + $0x88] sm:$0xff] }
 0x311   : > { %v1331_v43 = vadd.f32 %v1279_v55, %v1155_v7  ;;  %1979 = vrcp.f32 %v1438_v51  ;;  %v1408_v28 = vld [vmem:[#allocation4 + $0x30] sm:$0xff] }
 0x312   : > { %v1109_v20 = vpop.permute.xlu1 %1108  ;;  %v1387_v51 = vld [vmem:[%s2720_s7 + $0x20] sm:$0xff] }
 0x313   : > { %1350 = vst.msk [vmem:[#allocation4 + $0x48] sm:$0xff] %vm331_vm0, %v1331_v43  ;;  %v1157_v32 = vmul.f32 %v1109_v20, %v1043_v9 }
 0x314   : > { %v1818_v60 = vpop.f32.mrb[12].mxu1 }
 0x315   : > { %v1333_v16 = vadd.f32 %v1815_v18, %v1157_v32  ;;  %v1336_v25 = vadd.f32 %v1818_v60, %v1160_v41  ;;  %v1292_v13 = vpop.f32.mrb[13].mxu1  ;;  %v1389_v18 = vld [vmem:[%s2720_s7 + $0x30] sm:$0xff]  ;;  %v1390_v60 = vld [vmem:[%s2720_s7 + $0x38] sm:$0xff] }
 0x316   : > { %v1334_v5 = vadd.f32 %v1292_v13, %v1158_v23  ;;  %v1819_v3 = vpop.f32.mrb[14].mxu1  ;;  %v1119_v45 = vpop.permute.xlu1 %1118  ;;  %v1393_v41 = vld [vmem:[%s2720_s7 + $0x50] sm:$0xff]  ;;  %v1412_v32 = vld [vmem:[#allocation4 + $0x50] sm:$0xff] }
 0x317   : > { %1352 = vst.msk [vmem:[#allocation4 + $0x58] sm:$0xff] %vm331_vm0, %v1333_v16  ;;  %1355 = vst.msk [vmem:[#allocation4 + $0x70] sm:$0xff] %vm331_vm0, %v1336_v25  ;;  %v1159_v63 = vmul.f32 %v1119_v45, %v1045_v17  ;;  %v1295_v21 = vpop.f32.mrb[15].mxu1  ;;  %v1409_v16 = vld [vmem:[#allocation4 + $0x38] sm:$0xff]  ;;  %v1410_v38 = vld [vmem:[#allocation4 + $0x40] sm:$0xff] }
 0x318   : > { %1353 = vst.msk [vmem:[#allocation4 + $0x60] sm:$0xff] %vm331_vm0, %v1334_v5  ;;  %v1388_v45 = vld [vmem:[%s2720_s7 + $0x28] sm:$0xff] }
 0x319   : > { %v1335_v14 = vadd.f32 %v1295_v21, %v1159_v63  ;;  %v1407_v21 = vld [vmem:[#allocation4 + $0x28] sm:$0xff] }
 0x31a   : > { %v1129_v0 = vpop.permute.xlu1 %1128 }
 0x31b   : > { %v1980_v26 = vpop.eup %1979  ;;  %1354 = vst.msk [vmem:[#allocation4 + $0x68] sm:$0xff] %vm331_vm0, %v1335_v14  ;;  %v1161_v61 = vmul.f32 %v1129_v0, %v1047_v11  ;;  %v1391_v11 = vld [vmem:[%s2720_s7 + $0x40] sm:$0xff] }
 0x31c   : > { %v1822_v48 = vpop.f32.mrb[16].mxu1  ;;  %1546 = vperm.xlu0 %1856, %v1980_v26  }
 0x31d   : > { %v1337_v39 = vadd.f32 %v1819_v3, %v1161_v61  ;;  %v1340_v53 = vadd.f32 %v1822_v48, %v1164_v4  ;;  %v1308_v2 = vpop.f32.mrb[17].mxu1  ;;  %v1397_v4 = vld [vmem:[%s2720_s7 + $0x70] sm:$0xff] }
 0x31e   : > { %v1338_v27 = vadd.f32 %v1308_v2, %v1162_v50  ;;  %v1823_v37 = vpop.f32.mrb[18].mxu1  ;;  %v1139_v44 = vpop.permute.xlu1 %1138  ;;  %v1416_v61 = vld [vmem:[#allocation4 + $0x70] sm:$0xff] }
 0x31f   : > { %1356 = vst.msk [vmem:[#allocation4 + $0x78] sm:$0xff] %vm331_vm0, %v1337_v39  ;;  %v1163_v56 = vmul.f32 %v1139_v44, %v1049_v34  ;;  %v1311_v59 = vpop.f32.mrb[19].mxu1  ;;  %v1395_v39 = vld [vmem:[%s2720_s7 + $0x60] sm:$0xff]  ;;  %v1413_v44 = vld [vmem:[#allocation4 + $0x58] sm:$0xff] }
 0x320   : > { %1360 = vst.msk [vmem:[#allocation4 + $0x90] sm:$0x7] %vm350_vm7, %v1340_v53  ;;  %v1414_v53 = vld [vmem:[#allocation4 + $0x60] sm:$0xff] }
 0x321   : > { %1357 = vst.msk [vmem:[#allocation4 + $0x80] sm:$0xff] %vm331_vm0, %v1338_v27  ;;  %v1339_v52 = vadd.f32 %v1311_v59, %v1163_v56  ;;  %v1394_v27 = vld [vmem:[%s2720_s7 + $0x58] sm:$0xff] }
 0x323   : > { %1358 = vst.msk [vmem:[#allocation4 + $0x88] sm:$0xff] %vm331_vm0, %v1339_v52 }
 0x33a   : > { %v1472_v19 = vpop.permute.xlu1 %1471 }
 0x33b   : > { %v1556_v15 = vmul.f32 %v1472_v19, %v1404_v33  ;;  %v1392_v33 = vld [vmem:[%s2720_s7 + $0x48] sm:$0xff] }
 0x33d   : > { %v1575_v31 = vadd.f32 %v1556_v15, %v1385_v36  ;;  %v1477_v40 = vpop.permute.xlu0 %1476  ;;  %v1411_v15 = vld [vmem:[#allocation4 + $0x48] sm:$0xff] }
 0x33e   : > { %v1557_v12 = vmul.f32 %v1477_v40, %v1405_v49  ;;  %v1462_v10 = vpop.permute.xlu1 %1461  ;;  %v1399_v49 = vld [vmem:[%s2720_s7 + $0x80] sm:$0xff]  ;;  %v1418_v40 = vld [vmem:[#allocation4 + $0x80] sm:$0xff] }
 0x33f   : > { %1594 = vst.msk [vmem:[%s2726_s10 + $0x10] sm:$0xff] %vm331_vm0, %v1575_v31  ;;  %v1554_v58 = vmul.f32 %v1462_v10, %v1402_v54  ;;  %v1417_v10 = vld [vmem:[#allocation4 + $0x78] sm:$0xff] }
 0x340   : > { %v1576_v46 = vadd.f32 %v1557_v12, %v1386_v22 }
 0x341   : > { %v1573_v1 = vadd.f32 %v1554_v58, %v1383_v29  ;;  %v1467_v42 = vpop.permute.xlu0 %1466  ;;  %v1398_v29 = vld [vmem:[%s2720_s7 + $0x78] sm:$0xff] }
 0x342   : > { %1595 = vst.msk [vmem:[%s2726_s10 + $0x18] sm:$0xff] %vm331_vm0, %v1576_v46  ;;  %v1555_v6 = vmul.f32 %v1467_v42, %v1403_v47  ;;  %v1492_v7 = vpop.permute.xlu1 %1491  ;;  %v1401_v47 = vld [vmem:[%s2720_s7 + $0x90] sm:$0x7]  ;;  %v1420_v42 = vld [vmem:[#allocation4 + $0x90] sm:$0x7] }
 0x343   : > { %1592 = vst.msk [vmem:[%s2726_s10] sm:$0xff] %vm331_vm0, %v1573_v1  ;;  %v1560_v55 = vmul.f32 %v1492_v7, %v1408_v28  ;;  %v1415_v7 = vld [vmem:[#allocation4 + $0x68] sm:$0xff] }
 0x344   : > { %v1574_v35 = vadd.f32 %v1555_v6, %v1384_v57 }
 0x345   : > { %v1579_v9 = vadd.f32 %v1560_v55, %v1389_v18  ;;  %v1396_v18 = vld [vmem:[%s2720_s7 + $0x68] sm:$0xff] }
 0x346   : > { %1593 = vst.msk [vmem:[%s2726_s10 + $0x8] sm:$0xff] %vm331_vm0, %v1574_v35  ;;  %v1482_v43 = vpop.permute.xlu1 %1481 }
 0x347   : > { %1598 = vst.msk [vmem:[%s2726_s10 + $0x30] sm:$0xff] %vm331_vm0, %v1579_v9  ;;  %v1558_v8 = vmul.f32 %v1482_v43, %v1406_v62  ;;  %v1400_v62 = vld [vmem:[%s2720_s7 + $0x88] sm:$0xff] }
 0x349   : > { %v1577_v20 = vadd.f32 %v1558_v8, %v1387_v51  ;;  %v1419_v8 = vld [vmem:[#allocation4 + $0x88] sm:$0xff] }
 0x34a   : > { %v1512_v23 = vpop.permute.xlu1 %1511 }
 0x34b   : > { %1596 = vst.msk [vmem:[%s2726_s10 + $0x20] sm:$0xff] %vm331_vm0, %v1577_v20  ;;  %v1497_v17 = vpop.permute.xlu0 %1496  ;;  %v1564_v25 = vmul.f32 %v1512_v23, %v1412_v32 }
 0x34c   : > { %v1561_v13 = vmul.f32 %v1497_v17, %v1409_v16 }
 0x34d   : > { %v1583_v5 = vadd.f32 %v1564_v25, %v1393_v41 }
 0x34e   : > { %v1580_v3 = vadd.f32 %v1561_v13, %v1390_v60 }
 0x34f   : > { %1602 = vst.msk [vmem:[%s2726_s10 + $0x50] sm:$0xff] %vm331_vm0, %v1583_v5  ;;  %v1487_v63 = vpop.permute.xlu0 %1486 }
 0x350   : > { %1599 = vst.msk [vmem:[%s2726_s10 + $0x38] sm:$0xff] %vm331_vm0, %v1580_v3  ;;  %v1559_v24 = vmul.f32 %v1487_v63, %v1407_v21 }
 0x352   : > { %v1578_v30 = vadd.f32 %v1559_v24, %v1388_v45  ;;  %v1502_v14 = vpop.permute.xlu1 %1501 }
 0x353   : > { %v1562_v0 = vmul.f32 %v1502_v14, %v1410_v38 }
 0x354   : > { %1597 = vst.msk [vmem:[%s2726_s10 + $0x28] sm:$0xff] %vm331_vm0, %v1578_v30 }
 0x355   : > { %v1581_v26 = vadd.f32 %v1562_v0, %v1391_v11 }
 0x356   : > { %v1532_v50 = vpop.permute.xlu1 %1531 }
 0x357   : > { %1600 = vst.msk [vmem:[%s2726_s10 + $0x40] sm:$0xff] %vm331_vm0, %v1581_v26  ;;  %v1568_v48 = vmul.f32 %v1532_v50, %v1416_v61 }
 0x359   : > { %v1587_v34 = vadd.f32 %v1568_v48, %v1397_v4 }
 0x35a   : > { %v1522_v2 = vpop.permute.xlu1 %1521 }
 0x35b   : > { %1606 = vst.msk [vmem:[%s2726_s10 + $0x70] sm:$0xff] %vm331_vm0, %v1587_v34  ;;  %v1517_v37 = vpop.permute.xlu0 %1516  ;;  %v1566_v56 = vmul.f32 %v1522_v2, %v1414_v53 }
 0x35c   : > { %v1565_v59 = vmul.f32 %v1517_v37, %v1413_v44 }
 0x35d   : > { %v1585_v52 = vadd.f32 %v1566_v56, %v1395_v39 }
 0x35e   : > { %v1584_v36 = vadd.f32 %v1565_v59, %v1394_v27 }
 0x35f   : > { %1604 = vst.msk [vmem:[%s2726_s10 + $0x60] sm:$0xff] %vm331_vm0, %v1585_v52  ;;  %v1507_v19 = vpop.permute.xlu0 %1506 }
 0x360   : > { %1603 = vst.msk [vmem:[%s2726_s10 + $0x58] sm:$0xff] %vm331_vm0, %v1584_v36  ;;  %v1563_v31 = vmul.f32 %v1507_v19, %v1411_v15 }
 0x362   : > { %v1582_v22 = vadd.f32 %v1563_v31, %v1392_v33  ;;  %v1542_v12 = vpop.permute.xlu1 %1541 }
 0x363   : > { %v1537_v54 = vpop.permute.xlu0 %1536  ;;  %v1570_v58 = vmul.f32 %v1542_v12, %v1418_v40 }
 0x364   : > { %1601 = vst.msk [vmem:[%s2726_s10 + $0x48] sm:$0xff] %vm331_vm0, %v1582_v22  ;;  %v1569_v46 = vmul.f32 %v1537_v54, %v1417_v10 }
 0x365   : > { %v1589_v1 = vadd.f32 %v1570_v58, %v1399_v49 }
 0x366   : > { %v1588_v57 = vadd.f32 %v1569_v46, %v1398_v29  ;;  %v1552_v6 = vpop.permute.xlu1 %1551 }
 0x367   : > { %1608 = vst.msk [vmem:[%s2726_s10 + $0x80] sm:$0xff] %vm331_vm0, %v1589_v1  ;;  %v1527_v28 = vpop.permute.xlu0 %1526  ;;  %v1572_v55 = vmul.f32 %v1552_v6, %v1420_v42 }
 0x368   : > { %1607 = vst.msk [vmem:[%s2726_s10 + $0x78] sm:$0xff] %vm331_vm0, %v1588_v57  ;;  %v1567_v35 = vmul.f32 %v1527_v28, %v1415_v7 }
 0x369   : > { %v1591_v9 = vadd.f32 %v1572_v55, %v1401_v47 }
 0x36a   : > { %v1586_v51 = vadd.f32 %v1567_v35, %v1396_v18 }
 0x36b   : > { %1610 = vst.msk [vmem:[%s2726_s10 + $0x90] sm:$0x7] %vm350_vm7, %v1591_v9 }
 0x36c   : > { %1605 = vst.msk [vmem:[%s2726_s10 + $0x68] sm:$0xff] %vm331_vm0, %v1586_v51 }
 0x39b   : > { %v1547_v43 = vpop.permute.xlu0 %1546 }
 0x39c   : > { %v1571_v20 = vmul.f32 %v1547_v43, %v1419_v8 }
 0x39e   : > { %v1590_v41 = vadd.f32 %v1571_v20, %v1400_v62 }
 0x3a0   : > { %1609 = vst.msk [vmem:[%s2726_s10 + $0x88] sm:$0xff] %vm331_vm0, %v1590_v41 }
 0x3a1 PF: > { %s14_s17 = sadd.s32 1, %s2003_s17   ;;  %s2824_s15 = smov %s1999_s16 }
 0x3a2   : > { %p11_p5 = scmp.ge.s32.totalorder %s14_s17, 4   ;;  %s2825_s16 = smov %s2827_s18 }
 0x3a4   :  { %13 = sbr.rel (!%p11_p5) target bundleno = 2 (0x2), region = 83 }

// kernel: efficient_counter_forward.22
= control target key start
LH: loop header
LB: loop body
LE: loop exit
PB: predicated region body
PF: predicated region fallthrough
CT: control target
= control target key end

     0   :  { %v193_v0 = vmov 0.0   ;;  %vm194_vm0 = vmmov 0   ;;  %s248_s1 = inlined_call_operand.vmem [shape: bf16[128,128], index: 1, kind: input, shape index: {}]   ;;  %s249_s0 = inlined_call_operand.vmem [shape: bf16[8,128], index: 0, kind: input, shape index: {}]   ;;  %s250_s2 = inlined_call_operand.vmem [shape: f32[1,128], index: 2, kind: input, shape index: {}]   ;;  %s251_s3 = inlined_call_operand.vmem [shape: f32[8,128], index: 3, kind: output, shape index: {}]  }
   0x1   :  { %163 = vmatprep.subr.bf16.mxu0 %v193_v0  ;;  %v185_v1 = vld [vmem:[%s248_s1] sm:$0xff]   ;;  %179 = vmatprep.mubr.msk.bf16.mxu0 %vm194_vm0, %v193_v0  ;;  %v186_v2 = vld [vmem:[%s248_s1 + $0x8] sm:$0xff]   ;;  %v187_v3 = vld [vmem:[%s248_s1 + $0x10] sm:$0xff]  }
   0x2   :  { %164 = vmatpush3.bf16.msra.mxu0 %v185_v1  ;;  %v188_v4 = vld [vmem:[%s248_s1 + $0x18] sm:$0xff]   ;;  %v189_v5 = vld [vmem:[%s248_s1 + $0x20] sm:$0xff]   ;;  %v190_v6 = vld [vmem:[%s248_s1 + $0x28] sm:$0xff]  }
   0x3   :  { %165 = vmatprep.subr.bf16.mxu0 %v193_v0  ;;  %v191_v7 = vld [vmem:[%s248_s1 + $0x30] sm:$0xff]   ;;  %v192_v8 = vld [vmem:[%s248_s1 + $0x38] sm:$0xff]   ;;  %v21_v9 = vld [vmem:[%s249_s0] sm:$0xf] }
   0x4   :  { %v153_v10 = vld [vmem:[%s250_s2] ss:$0 sm:$0xff] }
   0x6   :  { %166 = vmatpush3.bf16.msra.mxu0 %v186_v2 }
   0x7   :  { %167 = vmatprep.subr.bf16.mxu0 %v193_v0 }
   0xa   :  { %168 = vmatpush3.bf16.msra.mxu0 %v187_v3 }
   0xb   :  { %169 = vmatprep.subr.bf16.mxu0 %v193_v0 }
   0xe   :  { %170 = vmatpush3.bf16.msra.mxu0 %v188_v4 }
   0xf   :  { %171 = vmatprep.subr.bf16.mxu0 %v193_v0 }
  0x12   :  { %172 = vmatpush3.bf16.msra.mxu0 %v189_v5 }
  0x13   :  { %173 = vmatprep.subr.bf16.mxu0 %v193_v0 }
  0x16   :  { %174 = vmatpush3.bf16.msra.mxu0 %v190_v6 }
  0x17   :  { %175 = vmatprep.subr.bf16.mxu0 %v193_v0 }
  0x1a   :  { %176 = vmatpush3.bf16.msra.mxu0 %v191_v7 }
  0x1b   :  { %177 = vmatprep.subr.bf16.mxu0 %v193_v0 }
  0x1e   :  { %178 = vmatpush3.bf16.msra.mxu0 %v192_v8 }
  0x21   :  { %180 = vmatmul.mubr.bf16.vlgmr.msra.gmra.mrb[0].mxu0 %v21_v9 }
  0xf4   :  { %v120_v11 = vpop.f32.mrb[0].mxu0 }
  0xf5   :  { %v139_v12 = vadd.f32 %v153_v10, %v120_v11  ;;  %v181_v13 = vpop.f32.mrb[1].mxu0 }
  0xf6   :  { %v123_v14 = vpop.f32.mrb[2].mxu0 }
  0xf7   :  { %140 = vst [vmem:[%s251_s3] sm:$0xff] %v139_v12  ;;  %v182_v15 = vpop.f32.mrb[3].mxu0 }

// kernel: efficient_counter_forward.21
= control target key start
LH: loop header
LB: loop body
LE: loop exit
PB: predicated region body
PF: predicated region fallthrough
CT: control target
= control target key end

     0   :  { %s528_s9 = smov 0   ;;  %s530_s10 = smov 0   ;;  %s578_s0 = inlined_call_operand.vmem [shape: bf16[2,8,32], index: 0, kind: input, shape index: {}]   ;;  %s579_s1 = inlined_call_operand.vmem [shape: bf16[2,128,32], index: 1, kind: input, shape index: {}]   ;;  %s580_s2 = inlined_call_operand.vmem [shape: f32[2,8,128], index: 2, kind: output, shape index: {}]  }
   0x1   :  { %s532_s11 = smov 0  }
   0x2 LB: > { %s24_s12 = sadd.s32 1, %s505_s10  ;;  %p407_p0 = scmp.ge.s32.totalorder %s509_s11, 1  ;;  %s509_s11 = sphi %s532_s11, %s12_s11   ;;  %s505_s10 = sphi %s530_s10, %s582_s10   ;;  %s501_s9 = sphi %s528_s9, %s581_s9  }
   0x3   : > { %p26_p1 = scmp.ge.s32.totalorder %s24_s12, 2  ;;  %p140_p2 = scmp.lt.s32.totalorder %s509_s11, 3 }
   0x5   : > { %s584_s12 = smov (%p26_p1, %s24_s12), 0  ;;  %p141_p3 = pnand %p407_p0, %p140_p2 }
   0x6   : > { %p171_p4 = scmp.lt.s32.totalorder (!%p141_p3), %s501_s9, 1  ;;  %v511_v0 = vmov (!%p141_p3), 0.0   ;;  %vm512_vm0 = vmmov (!%p141_p3), 0   ;;  %vm248_vm1 = vcmask (!%p141_p3), 261120  }
   0x7   : > { %144 = sbr.rel (%p141_p3) target bundleno = 297 (0x129), region = 28  ;;  %433 = vmatprep.subr.bf16.mxu0 (!%p141_p3), %v511_v0  ;;  %449 = vmatprep.mubr.msk.bf16.mxu0 (!%p141_p3), %vm512_vm0, %v511_v0 }
   0xe   : > { %s586_s9 = smov (!%p171_p4, %s501_s9), 1 }
   0xf   : > { %s423_s13 = sshll.u32 %s586_s9, 6  ;;  %s408_s17 = sshll.u32 %s586_s9, 2 }
  0x10   : > { %s182_s16 = scalar_lea.vmem %s579_s1, %s423_s13  ;;  %s177_s20 = scalar_lea.vmem %s578_s0, %s408_s17 }
  0x11   : > { %v479_v1 = vld [vmem:[%s182_s16] sm:$0xff]   ;;  %v480_v3 = vld [vmem:[%s182_s16 + $0x8] sm:$0xff]   ;;  %v481_v5 = vld [vmem:[%s182_s16 + $0x10] sm:$0xff]   ;;  %s411_s21 = sshll.u32 %s586_s9, 3 }
  0x12   : > { %v253_v2 = vsel %vm248_vm1, %v479_v1, 0  ;;  %v256_v4 = vsel %vm248_vm1, %v480_v3, 0  ;;  %v259_v6 = vsel %vm248_vm1, %v481_v5, 0  ;;  %v482_v7 = vld [vmem:[%s182_s16 + $0x18] sm:$0xff]   ;;  %v483_v9 = vld [vmem:[%s182_s16 + $0x20] sm:$0xff]   ;;  %v484_v11 = vld [vmem:[%s182_s16 + $0x28] sm:$0xff]   ;;  %s189_s24 = scalar_lea.vmem %s580_s2, %s411_s21 }
  0x13   : > { %434 = vmatpush3.bf16.xpose.msra.mxu0 %v253_v2  ;;  %v262_v8 = vsel %vm248_vm1, %v482_v7, 0  ;;  %v265_v10 = vsel %vm248_vm1, %v483_v9, 0  ;;  %v268_v12 = vsel %vm248_vm1, %v484_v11, 0  ;;  %v485_v13 = vld [vmem:[%s182_s16 + $0x30] sm:$0xff]   ;;  %v486_v15 = vld [vmem:[%s182_s16 + $0x38] sm:$0xff]  }
  0x14   : > { %435 = vmatprep.subr.bf16.mxu0 %v511_v0  ;;  %v271_v14 = vsel %vm248_vm1, %v485_v13, 0  ;;  %v274_v16 = vsel %vm248_vm1, %v486_v15, 0  ;;  %v191_v17 = vld [vmem:[%s177_s20] sm:$0xf] }
  0x1b   : > { %436 = vmatpush3.bf16.xpose.msra.mxu0 %v256_v4 }
  0x1c   : > { %437 = vmatprep.subr.bf16.mxu0 %v511_v0 }
  0x23   : > { %438 = vmatpush3.bf16.xpose.msra.mxu0 %v259_v6 }
  0x24   : > { %439 = vmatprep.subr.bf16.mxu0 %v511_v0 }
  0x2b   : > { %440 = vmatpush3.bf16.xpose.msra.mxu0 %v262_v8 }
  0x2c   : > { %441 = vmatprep.subr.bf16.mxu0 %v511_v0 }
  0x33   : > { %442 = vmatpush3.bf16.xpose.msra.mxu0 %v265_v10 }
  0x34   : > { %443 = vmatprep.subr.bf16.mxu0 %v511_v0 }
  0x3b   : > { %444 = vmatpush3.bf16.xpose.msra.mxu0 %v268_v12 }
  0x3c   : > { %445 = vmatprep.subr.bf16.mxu0 %v511_v0 }
  0x43   : > { %446 = vmatpush3.bf16.xpose.msra.mxu0 %v271_v14 }
  0x44   : > { %447 = vmatprep.subr.bf16.mxu0 %v511_v0 }
  0x4b   : > { %448 = vmatpush3.bf16.xpose.msra.mxu0 %v274_v16 }
  0x52   : > { %450 = vmatmul.mubr.msk.bf16.vlgmr.msra.gmra.mrb[0].mxu0 %vm248_vm1, %v191_v17 }
 0x125   : > { %v310_v18 = vpop.f32.mrb[0].mxu0 }
 0x126   : > { %316 = vst [vmem:[%s189_s24] sm:$0xff] %v310_v18  ;;  %v451_v19 = vpop.f32.mrb[1].mxu0 }
 0x127   : > { %v313_v20 = vpop.f32.mrb[2].mxu0 }
 0x128   : > { %v452_v21 = vpop.f32.mrb[3].mxu0 }
 0x129 PF: > { %s12_s11 = sadd.s32 1, %s509_s11   ;;  %s581_s9 = smov %s505_s10 }
 0x12a   : > { %p9_p5 = scmp.ge.s32.totalorder %s12_s11, 4   ;;  %s582_s10 = smov %s584_s12 }
 0x12c   :  { %11 = sbr.rel (!%p9_p5) target bundleno = 2 (0x2), region = 61 }

// kernel: squeeze.13
= control target key start
LH: loop header
LB: loop body
LE: loop exit
PB: predicated region body
PF: predicated region fallthrough
CT: control target
= control target key end

     0   :  { %vm7_vm0 = vcmask 15360   ;;  %s43_s8 = smov 122   ;;  %s44_s9 = smov 124   ;;  %s68_s0 = inlined_call_operand.vmem [shape: f32[8], index: 0, kind: input, shape index: {}]   ;;  %s69_s1 = inlined_call_operand.vmem [shape: f32[2,1,2,2], index: 1, kind: output, shape index: {}]  }
   0x1   :  { %v4_v0 = vld [vmem:[%s68_s0] sm:$0x1]  ;;  %s42_s0 = smov 126  }
   0x2   :  { %5 = vst [vmem:[#allocation1] sm:$0x1] %v4_v0 }
   0x9   :  { %v9_v1 = vld [vmem:[#allocation1] sm:$0x1]  }
   0xa   :  { %v21_v2 = vld [vmem:[#allocation1] sm:$0x1]   ;;  %10 = vrot.lane.b32.xlu0 %v9_v1, %s42_s0 }
   0xb   :  { %22 = vrot.lane.b32.xlu1 %v21_v2, %s43_s8  ;;  %v6_v3 = vld [vmem:[#allocation1] sm:$0x1]  }
   0xc   :  { %v15_v4 = vld [vmem:[#allocation1] sm:$0x1]   ;;  %8 = vst.msk [vmem:[#allocation0] sm:$0x1] %vm7_vm0, %v6_v3  }
   0xe   :  { %16 = vrot.lane.b32.xlu0 %v15_v4, %s44_s9 }
  0x7c   :  { %v11_v5 = vpop.permute.xlu0 %10  }
  0x7d   :  { %v23_v6 = vpop.permute.xlu1 %22   ;;  %14 = vst.msk [vmem:[#allocation0 + $0x1] sm:$0x1] %vm7_vm0, %v11_v5  }
  0x7e   :  { %26 = vst.msk [vmem:[#allocation0 + $0x9] sm:$0x1] %vm7_vm0, %v23_v6  }
  0x80   :  { %v17_v7 = vpop.permute.xlu0 %16  }
  0x81   :  { %20 = vst.msk [vmem:[#allocation0 + $0x8] sm:$0x1] %vm7_vm0, %v17_v7  }
  0x84   :  { %v30_v8 = vld [vmem:[#allocation0] sm:$0x3] }
  0x85   :  { %32 = vst [vmem:[%s69_s1] sm:$0x3] %v30_v8 }
  0x88   :  { %v34_v9 = vld [vmem:[#allocation0 + $0x8] sm:$0x3] }
  0x89   :  { %38 = vst [vmem:[%s69_s1 + $0x2] sm:$0x3] %v34_v9 }

// kernel: efficient_counter_forward.23
= control target key start
LH: loop header
LB: loop body
LE: loop exit
PB: predicated region body
PF: predicated region fallthrough
CT: control target
= control target key end

     0   :  { %s1555_s12 = smov 0   ;;  %s1557_s13 = smov 0   ;;  %s1859_s0 = inlined_call_operand.vmem [shape: bf16[2,4,4,32], index: 0, kind: input, shape index: {}]   ;;  %s1860_s1 = inlined_call_operand.vmem [shape: bf16[288,384], index: 1, kind: input, shape index: {}]   ;;  %s1861_s2 = inlined_call_operand.vmem [shape: f32[1,384], index: 2, kind: input, shape index: {}]   ;;  %s1862_s3 = inlined_call_operand.vmem [shape: f32[2,2,2,384], index: 3, kind: output, shape index: {}]  }
   0x1   :  { %s1559_s14 = smov 0   ;;  %s1561_s15 = smov 0  }
   0x2   :  { %s1563_s16 = smov 0   ;;  %s1565_s17 = smov 0  }
   0x3   :  { %s1567_s18 = smov 0   ;;  %s1569_s19 = smov 0  }
   0x4   :  { %s1571_s20 = smov 0  }
   0x5 LB: > { %s1193_s21 = sadd.s32 4294967295, %s1527_s20   ;;  %s22_s22 = sadd.s32 1, %s1519_s18  ;;  %s1527_s20 = sphi %s1571_s20, %s13_s20   ;;  %s1523_s19 = sphi %s1569_s19, %s1871_s19   ;;  %s1519_s18 = sphi %s1567_s18, %s1870_s18   ;;  %s1515_s17 = sphi %s1565_s17, %s1869_s17   ;;  %s1511_s16 = sphi %s1563_s16, %s1868_s16   ;;  %s1507_s15 = sphi %s1561_s15, %s1867_s15   ;;  %s1503_s14 = sphi %s1559_s14, %s1866_s14   ;;  %s1499_s13 = sphi %s1557_s13, %s1865_s13   ;;  %s1495_s12 = sphi %s1555_s12, %s1864_s12  }
   0x6   : > { %p23_p0 = scmp.ge.s32.totalorder %s22_s22, 3  ;;  %s25_s23 = sadd.s32 1, %s1523_s19 }
   0x7   : > { %s58_s24 = sadd.s32 1, %s1507_s15  ;;  %p65_p1 = scmp.ne.s32.totalorder %s1507_s15, %s1503_s14 }
   0x8   : > { %s1873_s22 = smov (%p23_p0, %s22_s22), 0  ;;  %s1875_s23 = smov (!%p23_p0, %s25_s23), %s1523_s19 }
   0x9   : > { %s55_s25 = ssub.s32 %s1519_s18, %s1873_s22  ;;  %p66_p2 = scmp.eq.s32.totalorder %s1527_s20, 0 }
   0xa   : > { %p27_p3 = scmp.ge.s32.totalorder %s1875_s23, 2  ;;  %p56_p4 = scmp.eq.s32.totalorder %s55_s25, 0 }
   0xb   : > { %p67_p5 = por %p66_p2, %p65_p1  ;;  %s112_s26 = sadd.s32 1, %s1499_s13 }
   0xc   : > { %s1877_s23 = smov (%p27_p3, %s1875_s23), 0  ;;  %p122_p6 = scmp.ne.s32.totalorder %s1499_s13, %s1495_s12 }
   0xd   : > { %s1616_s27 = scalar_select %p56_p4, %s1507_s15, %s58_s24  }
   0xe   : > { %s107_s28 = ssub.s32 %s1523_s19, %s1877_s23  ;;  %p123_p7 = scmp.eq.s32.totalorder %s1193_s21, 5 }
   0xf   : > { %s109_s29 = sor.u32 %s107_s28, %s55_s25  ;;  %p1196_p10 = scmp.ge.s32.totalorder %s1527_s20, 6 }
  0x10   : > { %p110_p8 = scmp.eq.s32.totalorder %s109_s29, 0  ;;  %p1622_p9 = por %p123_p7, %p122_p6 }
  0x11   : > { %145 = sbr.rel (%p1196_p10) target bundleno = 52 (0x34), region = 16 }
  0x12   : > { %s1627_s4 = scalar_select %p110_p8, %s1499_s13, %s112_s26  }
  0x18   : > { %156 = sbr.rel (!%p67_p5) target bundleno = 52 (0x34), region = 24  ;;  %s158_s5 = sand.u32 (%p67_p5), 1, %s1507_s15  }
  0x19   : > { %s1197_s6 = sshll.u32 (%p67_p5), %s1519_s18, 2  ;;  %s1350_s7 = smul.u32 (%p67_p5), 144, %s158_s5 }
  0x1a   : > { %s1635_s10 = scalar_lea.vmem (%p67_p5), %s1860_s1, %s1197_s6 }
  0x1b   : > { %v178_v0 = vld [vmem:[%s1635_s10] sm:$0xf] (%p67_p5)  ;;  %v180_v1 = vld [vmem:[%s1635_s10 + $0xc] sm:$0xf] (%p67_p5)  ;;  %v182_v2 = vld [vmem:[%s1635_s10 + $0x18] sm:$0xf] (%p67_p5) }
  0x1c   : > { %v184_v3 = vld [vmem:[%s1635_s10 + $0x24] sm:$0xf] (%p67_p5)  ;;  %v186_v4 = vld [vmem:[%s1635_s10 + $0x30] sm:$0xf] (%p67_p5)  ;;  %s1642_s11 = scalar_lea.vmem (%p67_p5), [#allocation2], %s1350_s7 }
  0x1d   : > { %179 = vst [vmem:[%s1642_s11] sm:$0xf] (%p67_p5), %v178_v0  ;;  %181 = vst [vmem:[%s1642_s11 + $0x4] sm:$0xf] (%p67_p5), %v180_v1  ;;  %v188_v5 = vld [vmem:[%s1635_s10 + $0x3c] sm:$0xf] (%p67_p5) }
  0x1e   : > { %183 = vst [vmem:[%s1642_s11 + $0x8] sm:$0xf] (%p67_p5), %v182_v2  ;;  %185 = vst [vmem:[%s1642_s11 + $0xc] sm:$0xf] (%p67_p5), %v184_v3  ;;  %v190_v6 = vld [vmem:[%s1635_s10 + $0x48] sm:$0xf] (%p67_p5) }
  0x1f   : > { %187 = vst [vmem:[%s1642_s11 + $0x10] sm:$0xf] %v186_v4  ;;  %v192_v7 = vld [vmem:[%s1635_s10 + $0x54] sm:$0xf]  ;;  %189 = vst [vmem:[%s1642_s11 + $0x14] sm:$0xf] %v188_v5 }
  0x20   : > { %191 = vst [vmem:[%s1642_s11 + $0x18] sm:$0xf] %v190_v6  ;;  %193 = vst [vmem:[%s1642_s11 + $0x1c] sm:$0xf] %v192_v7  ;;  %v194_v8 = vld [vmem:[%s1635_s10 + $0x60] sm:$0xf] }
  0x21   : > { %v196_v9 = vld [vmem:[%s1635_s10 + $0x6c] sm:$0xf]  ;;  %v198_v10 = vld [vmem:[%s1635_s10 + $0x78] sm:$0xf]  ;;  %195 = vst [vmem:[%s1642_s11 + $0x20] sm:$0xf] %v194_v8 }
  0x22   : > { %197 = vst [vmem:[%s1642_s11 + $0x24] sm:$0xf] %v196_v9  ;;  %199 = vst [vmem:[%s1642_s11 + $0x28] sm:$0xf] %v198_v10  ;;  %v200_v11 = vld [vmem:[%s1635_s10 + $0x84] sm:$0xf] }
  0x23   : > { %v202_v12 = vld [vmem:[%s1635_s10 + $0x90] sm:$0xf]  ;;  %v204_v13 = vld [vmem:[%s1635_s10 + $0x9c] sm:$0xf]  ;;  %201 = vst [vmem:[%s1642_s11 + $0x2c] sm:$0xf] %v200_v11 }
  0x24   : > { %203 = vst [vmem:[%s1642_s11 + $0x30] sm:$0xf] %v202_v12  ;;  %205 = vst [vmem:[%s1642_s11 + $0x34] sm:$0xf] %v204_v13  ;;  %v206_v14 = vld [vmem:[%s1635_s10 + $0xa8] sm:$0xf] }
  0x25   : > { %v208_v15 = vld [vmem:[%s1635_s10 + $0xb4] sm:$0xf]  ;;  %v210_v16 = vld [vmem:[%s1635_s10 + $0xc0] sm:$0xf]  ;;  %207 = vst [vmem:[%s1642_s11 + $0x38] sm:$0xf] %v206_v14 }
  0x26   : > { %209 = vst [vmem:[%s1642_s11 + $0x3c] sm:$0xf] %v208_v15  ;;  %211 = vst [vmem:[%s1642_s11 + $0x40] sm:$0xf] %v210_v16  ;;  %v212_v17 = vld [vmem:[%s1635_s10 + $0xcc] sm:$0xf] }
  0x27   : > { %v214_v18 = vld [vmem:[%s1635_s10 + $0xd8] sm:$0xf]  ;;  %v216_v19 = vld [vmem:[%s1635_s10 + $0xe4] sm:$0xf]  ;;  %213 = vst [vmem:[%s1642_s11 + $0x44] sm:$0xf] %v212_v17 }
  0x28   : > { %215 = vst [vmem:[%s1642_s11 + $0x48] sm:$0xf] %v214_v18  ;;  %217 = vst [vmem:[%s1642_s11 + $0x4c] sm:$0xf] %v216_v19  ;;  %v218_v20 = vld [vmem:[%s1635_s10 + $0xf0] sm:$0xf] }
  0x29   : > { %v220_v21 = vld [vmem:[%s1635_s10 + $0xfc] sm:$0xf]  ;;  %v222_v22 = vld [vmem:[%s1635_s10 + $0x108] sm:$0xf]  ;;  %219 = vst [vmem:[%s1642_s11 + $0x50] sm:$0xf] %v218_v20 }
  0x2a   : > { %221 = vst [vmem:[%s1642_s11 + $0x54] sm:$0xf] %v220_v21  ;;  %223 = vst [vmem:[%s1642_s11 + $0x58] sm:$0xf] %v222_v22  ;;  %v224_v23 = vld [vmem:[%s1635_s10 + $0x114] sm:$0xf] }
  0x2b   : > { %v226_v24 = vld [vmem:[%s1635_s10 + $0x120] sm:$0xf]  ;;  %v228_v25 = vld [vmem:[%s1635_s10 + $0x12c] sm:$0xf]  ;;  %225 = vst [vmem:[%s1642_s11 + $0x5c] sm:$0xf] %v224_v23 }
  0x2c   : > { %227 = vst [vmem:[%s1642_s11 + $0x60] sm:$0xf] %v226_v24  ;;  %229 = vst [vmem:[%s1642_s11 + $0x64] sm:$0xf] %v228_v25  ;;  %v230_v26 = vld [vmem:[%s1635_s10 + $0x138] sm:$0xf] }
  0x2d   : > { %v232_v27 = vld [vmem:[%s1635_s10 + $0x144] sm:$0xf]  ;;  %v234_v28 = vld [vmem:[%s1635_s10 + $0x150] sm:$0xf]  ;;  %231 = vst [vmem:[%s1642_s11 + $0x68] sm:$0xf] %v230_v26 }
  0x2e   : > { %233 = vst [vmem:[%s1642_s11 + $0x6c] sm:$0xf] %v232_v27  ;;  %235 = vst [vmem:[%s1642_s11 + $0x70] sm:$0xf] %v234_v28  ;;  %v236_v29 = vld [vmem:[%s1635_s10 + $0x15c] sm:$0xf] }
  0x2f   : > { %v238_v30 = vld [vmem:[%s1635_s10 + $0x168] sm:$0xf]  ;;  %v240_v31 = vld [vmem:[%s1635_s10 + $0x174] sm:$0xf]  ;;  %237 = vst [vmem:[%s1642_s11 + $0x74] sm:$0xf] %v236_v29 }
  0x30   : > { %239 = vst [vmem:[%s1642_s11 + $0x78] sm:$0xf] %v238_v30  ;;  %241 = vst [vmem:[%s1642_s11 + $0x7c] sm:$0xf] %v240_v31  ;;  %v242_v32 = vld [vmem:[%s1635_s10 + $0x180] sm:$0xf] }
  0x31   : > { %v244_v33 = vld [vmem:[%s1635_s10 + $0x18c] sm:$0xf]  ;;  %v246_v34 = vld [vmem:[%s1635_s10 + $0x198] sm:$0xf]  ;;  %243 = vst [vmem:[%s1642_s11 + $0x80] sm:$0xf] %v242_v32 }
  0x32   : > { %245 = vst [vmem:[%s1642_s11 + $0x84] sm:$0xf] %v244_v33  ;;  %247 = vst [vmem:[%s1642_s11 + $0x88] sm:$0xf] %v246_v34  ;;  %v248_v35 = vld [vmem:[%s1635_s10 + $0x1a4] sm:$0xf] }
  0x33   : > { %249 = vst [vmem:[%s1642_s11 + $0x8c] sm:$0xf] %v248_v35 }
  0x34 PF: > { %p1198_p11 = scmp.ge.s32.totalorder %s1527_s20, 1  ;;  %p349_p12 = scmp.lt.s32.totalorder %s1527_s20, 7 }
  0x36   : > { %p350_p13 = pnand %p1198_p11, %p349_p12 }
  0x37   : > { %s356_s21 = sand.u32 (!%p350_p13), 1, %s1503_s14   ;;  %s383_s24 = sand.u32 (!%p350_p13), 1, %s1495_s12  }
  0x38   : > { %353 = sbr.rel (%p350_p13) target bundleno = 336 (0x150), region = 69  ;;  %s1199_s26 = sshll.u32 (!%p350_p13), %s383_s24, 2 }
  0x39   : > { %s1351_s25 = smul.u32 (!%p350_p13), 144, %s356_s21  ;;  %p386_p0 = scmp.lt.s32.totalorder (!%p350_p13), %s1515_s17, 1 }
  0x3a   : > { %p391_p1 = scmp.lt.s32.totalorder (!%p350_p13), %s1511_s16, 2  ;;  %s1731_s12 = scalar_lea.vmem (!%p350_p13), [#allocation3], %s1199_s26 }
  0x3b   : > { %s1729_s14 = scalar_lea.vmem (!%p350_p13), [#allocation2], %s1351_s25  ;;  %s1733_s21 = smov (!%p350_p13), 0  }
  0x3f   : > { %s387_s28 = scalar_select %p386_p0, %s1515_s17, 1 }
  0x40   : > { %s392_s29 = scalar_select %p391_p1, %s1511_s16, 2 }
  0x41   : > { %s1250_s5 = sshll.u32 %s387_s28, 3 }
  0x42   : > { %s1722_s8 = scalar_lea.vmem %s1859_s0, %s1250_s5  ;;  %s393_s11 = scalar_lea.vmem %s1861_s2, %s392_s29 }
  0x43   : > { %v1727_v36 = vld [vmem:[%s393_s11] ss:$0 sm:$0xff] }
  0x44 LB: >> { %v1435_v37 = vld [vmem:[%s1729_s14 + $0x10] sm:$0xff]   ;;  %v1533_v38 = vmov 0.0   ;;  %v1436_v39 = vld [vmem:[%s1729_s14] sm:$0xff]   ;;  %v1437_v40 = vld [vmem:[%s1729_s14 + $0x18] sm:$0xff]   ;;  %vm1534_vm0 = vmmov 0   ;;  %s1202_s24 = sshll.u32 %s1531_s21, 1  ;;  %s1531_s21 = sphi %s1733_s21, %s401_s21  }
  0x45   : >> { %1278 = vmatprep.subr.bf16.mxu0 %v1533_v38  ;;  %1286 = vmatprep.subr.bf16.mxu1 %v1533_v38  ;;  %v1438_v41 = vld [vmem:[%s1729_s14 + $0x8] sm:$0xff]   ;;  %s1751_s25 = scalar_lea.vmem %s1722_s8, %s1202_s24  ;;  %vm441_vm1 = vcmask 261120   ;;  %v1440_v47 = vld [vmem:[%s1729_s14 + $0x30] sm:$0xff]   ;;  %v1439_v48 = vld [vmem:[%s1729_s14 + $0x20] sm:$0xff]   ;;  %s1039_s26 = scalar_lea.vmem %s1731_s12, %s1202_s24 [#allocation3] }
  0x46   : >> { %1279 = vmatpush3.bf16.msra.mxu0 %v1435_v37  ;;  %1282 = vmatprep.mubr.msk.bf16.mxu0 %vm1534_vm0, %v1533_v38  ;;  %v1203_v42 = vld.sshfl [vmem:[%s1751_s25] sm:$0x3 pattern:$0x76325410]  ;;  %v1442_v51 = vld [vmem:[%s1729_s14 + $0x38] sm:$0xff]   ;;  %v1441_v52 = vld [vmem:[%s1729_s14 + $0x28] sm:$0xff]  }
  0x47   : >> { %1287 = vmatpush3.bf16.msra.mxu1 %v1436_v39  ;;  %1280 = vmatprep.subr.bf16.mxu0 %v1533_v38  ;;  %v423_v43 = vshrl.u32 %v1203_v42, 16  ;;  %v425_v44 = vshll.u32 %v1203_v42, 16  ;;  %v404_v45 = vld [vmem:[%s1751_s25] sm:$0x1]  ;;  %v1215_v55 = vld [vmem:[%s1751_s25 + $0x2] sm:$0x1] }
  0x48   : >> { %1288 = vmatprep.subr.bf16.mxu1 %v1533_v38  ;;  %1290 = vmatprep.mubr.msk.bf16.mxu1 %vm1534_vm0, %v1533_v38  ;;  %v1210_v50 = vld.sshfl [vmem:[%s1751_s25] sm:$0x2 pattern:$0x76325410]  ;;  %v1446_v60 = vld [vmem:[%s1729_s14 + $0x58] sm:$0xff]   ;;  %v1445_v63 = vld [vmem:[%s1729_s14 + $0x48] sm:$0xff]  }
  0x49   : >> { %v427_v46 = vrot.slane %v425_v44, 1  ;;  %v553_v53 = vrot.slane %v1210_v50, 1  ;;  %v1220_v54 = vld.sshfl [vmem:[%s1751_s25 + $0x2] sm:$0x3 pattern:$0x76325410] }
  0x4a   : >> { %1281 = vmatpush3.bf16.msra.mxu0 %v1437_v40  ;;  %v1444_v56 = vld [vmem:[%s1729_s14 + $0x50] sm:$0xff]   ;;  %v690_v57 = vshll.u32 %v1220_v54, 16  ;;  %v1443_v58 = vld [vmem:[%s1729_s14 + $0x40] sm:$0xff]   ;;  %v688_v61 = vshrl.u32 %v1220_v54, 16  ;;  %v1450_v8 = vld [vmem:[%s1729_s14 + $0x78] sm:$0xff]   ;;  %s401_s21 = sadd.s32 1, %s1531_s21  }
  0x4b   : >> { %1289 = vmatpush3.bf16.msra.mxu1 %v1438_v41  ;;  %1294 = vmatprep.subr.bf16.mxu0 %v1533_v38  ;;  %v428_v49 = vor.u32 %v427_v46, %v423_v43  ;;  %v1225_v59 = vld.sshfl [vmem:[%s1751_s25 + $0x2] sm:$0x2 pattern:$0x76325410]  ;;  %v1449_v9 = vld [vmem:[%s1729_s14 + $0x68] sm:$0xff]   ;;  %p398_p2 = scmp.ge.s32.totalorder %s401_s21, 2  }
  0x4c   : >> { %1302 = vmatprep.subr.bf16.mxu1 %v1533_v38  ;;  %v692_v62 = vrot.slane %v690_v57, 1  ;;  %v1235_v0 = vld.sshfl [vmem:[%s1751_s25 + $0x4] sm:$0x3 pattern:$0x76325410]  ;;  %v763_v1 = vrot.slane %v1225_v59, 1 }
  0x4d   : >> { %1283 = vmatmul.mubr.msk.bf16.vlgmr.msra.gmra.mrb[0].mxu0 %vm441_vm1, %v428_v49  ;;  %v900_v2 = vshll.u32 %v1235_v0, 16  ;;  %v1448_v4 = vld [vmem:[%s1729_s14 + $0x70] sm:$0xff]   ;;  %v1447_v5 = vld [vmem:[%s1729_s14 + $0x60] sm:$0xff]   ;;  %v898_v6 = vshrl.u32 %v1235_v0, 16  ;;  %v1452_v13 = vld [vmem:[%s1729_s14 + $0x88] sm:$0xff]  }
  0x4e   : >> { %1291 = vmatmul.mubr.msk.bf16.vlgmr.msra.gmra.mrb[0].mxu1 %vm441_vm1, %v404_v45  ;;  %1295 = vmatpush3.bf16.msra.mxu0 %v1439_v48  ;;  %v693_v3 = vor.u32 %v692_v62, %v688_v61  ;;  %v1230_v11 = vld [vmem:[%s1751_s25 + $0x4] sm:$0x1]  ;;  %v1240_v14 = vld.sshfl [vmem:[%s1751_s25 + $0x4] sm:$0x2 pattern:$0x76325410] }
  0x4f   : >> { %1303 = vmatpush3.bf16.msra.mxu1 %v1440_v47  ;;  %1296 = vmatprep.subr.bf16.mxu0 %v1533_v38  ;;  %v902_v7 = vrot.slane %v900_v2, 1  ;;  %v1451_v12 = vld [vmem:[%s1729_s14 + $0x80] sm:$0xff]   ;;  %v973_v15 = vrot.slane %v1240_v14, 1 }
  0x50   : >> { %1304 = vmatprep.subr.bf16.mxu1 %v1533_v38  ;;  %1298 = vmatprep.mubr.msk.bf16.mxu0 %vm1534_vm0, %v1533_v38 }
  0x51   : >> { %1306 = vmatprep.mubr.msk.bf16.mxu1 %vm1534_vm0, %v1533_v38  ;;  %v903_v10 = vor.u32 %v902_v7, %v898_v6 }
  0x52   : >> { %1297 = vmatpush3.bf16.msra.mxu0 %v1441_v52 }
  0x53   : >> { %1305 = vmatpush3.bf16.msra.mxu1 %v1442_v51  ;;  %1310 = vmatprep.subr.bf16.mxu0 %v1533_v38 }
  0x54   : >> { %1318 = vmatprep.subr.bf16.mxu1 %v1533_v38 }
  0x55   : >> { %1299 = vmatmul.mubr.msk.bf16.vlgmr.msra.gmra.mrb[4].mxu0 %vm441_vm1, %v553_v53 }
  0x56   : >> { %1307 = vmatmul.mubr.msk.bf16.vlgmr.msra.gmra.mrb[4].mxu1 %vm441_vm1, %v1215_v55  ;;  %1311 = vmatpush3.bf16.msra.mxu0 %v1443_v58 }
  0x57   : >> { %1319 = vmatpush3.bf16.msra.mxu1 %v1444_v56  ;;  %1312 = vmatprep.subr.bf16.mxu0 %v1533_v38 }
  0x58   : >> { %1320 = vmatprep.subr.bf16.mxu1 %v1533_v38  ;;  %1314 = vmatprep.mubr.msk.bf16.mxu0 %vm1534_vm0, %v1533_v38 }
  0x59   : >> { %1322 = vmatprep.mubr.msk.bf16.mxu1 %vm1534_vm0, %v1533_v38 }
  0x5a   : >> { %1313 = vmatpush3.bf16.msra.mxu0 %v1445_v63 }
  0x5b   : >> { %1321 = vmatpush3.bf16.msra.mxu1 %v1446_v60  ;;  %1326 = vmatprep.subr.bf16.mxu0 %v1533_v38 }
  0x5c   : >> { %1334 = vmatprep.subr.bf16.mxu1 %v1533_v38 }
  0x5d   : >> { %1315 = vmatmul.mubr.msk.bf16.vlgmr.msra.gmra.mrb[8].mxu0 %vm441_vm1, %v693_v3 }
  0x5e   : >> { %1323 = vmatmul.mubr.msk.bf16.vlgmr.msra.gmra.mrb[8].mxu1 %vm441_vm1, %v763_v1  ;;  %1327 = vmatpush3.bf16.msra.mxu0 %v1447_v5 }
  0x5f   : >> { %1335 = vmatpush3.bf16.msra.mxu1 %v1448_v4  ;;  %1328 = vmatprep.subr.bf16.mxu0 %v1533_v38 }
  0x60   : >> { %1336 = vmatprep.subr.bf16.mxu1 %v1533_v38  ;;  %1330 = vmatprep.mubr.msk.bf16.mxu0 %vm1534_vm0, %v1533_v38 }
  0x61   : >> { %1338 = vmatprep.mubr.msk.bf16.mxu1 %vm1534_vm0, %v1533_v38 }
  0x62   : >> { %1329 = vmatpush3.bf16.msra.mxu0 %v1449_v9 }
  0x63   : >> { %1337 = vmatpush3.bf16.msra.mxu1 %v1450_v8  ;;  %1342 = vmatprep.subr.bf16.mxu0 %v1533_v38 }
  0x65   : >> { %1331 = vmatmul.mubr.msk.bf16.vlgmr.msra.gmra.mrb[12].mxu0 %vm441_vm1, %v1230_v11 }
  0x66   : >> { %1339 = vmatmul.mubr.msk.bf16.vlgmr.msra.gmra.mrb[12].mxu1 %vm441_vm1, %v903_v10  ;;  %1343 = vmatpush3.bf16.msra.mxu0 %v1451_v12 }
  0x67   : >> { %1346 = vmatprep.mubr.msk.bf16.mxu0 %vm1534_vm0, %v1533_v38  ;;  %1344 = vmatprep.subr.bf16.mxu0 %v1533_v38 }
  0x6a   : >> { %1345 = vmatpush3.bf16.msra.mxu0 %v1452_v13 }
  0x6d   : >> { %1347 = vmatmul.mubr.msk.bf16.vlgmr.msra.gmra.mrb[16].mxu0 %vm441_vm1, %v973_v15 }
 0x120   : >> { %v479_v17 = vpop.f32.mrb[0].mxu0 }
 0x121   : >> { %v534_v16 = vpop.f32.mrb[0].mxu1  ;;  %v1284_v20 = vpop.f32.mrb[1].mxu0 }
 0x122   : >> { %v1292_v18 = vpop.f32.mrb[1].mxu1  ;;  %v535_v19 = vadd.f32 %v534_v16, %v479_v17  ;;  %v482_v22 = vpop.f32.mrb[2].mxu0 }
 0x123   : >> { %v537_v21 = vpop.f32.mrb[2].mxu1  ;;  %v1285_v24 = vpop.f32.mrb[3].mxu0 }
 0x124   : >> { %v1293_v23 = vpop.f32.mrb[3].mxu1 }
 0x128   : >> { %v603_v26 = vpop.f32.mrb[4].mxu0 }
 0x129   : >> { %v667_v25 = vpop.f32.mrb[4].mxu1  ;;  %v609_v28 = vadd.f32 %v603_v26, %v535_v19  ;;  %v1300_v29 = vpop.f32.mrb[5].mxu0 }
 0x12a   : >> { %v1308_v27 = vpop.f32.mrb[5].mxu1  ;;  %v606_v31 = vpop.f32.mrb[6].mxu0 }
 0x12b   : >> { %v670_v30 = vpop.f32.mrb[6].mxu1  ;;  %v673_v33 = vadd.f32 %v667_v25, %v609_v28  ;;  %v1301_v34 = vpop.f32.mrb[7].mxu0 }
 0x12c   : >> { %v1309_v32 = vpop.f32.mrb[7].mxu1 }
 0x130   : >> { %v743_v37 = vpop.f32.mrb[8].mxu0 }
 0x131   : >> { %v813_v35 = vpop.f32.mrb[8].mxu1  ;;  %v749_v39 = vadd.f32 %v743_v37, %v673_v33  ;;  %v1316_v40 = vpop.f32.mrb[9].mxu0 }
 0x132   : >> { %v1324_v38 = vpop.f32.mrb[9].mxu1  ;;  %v746_v42 = vpop.f32.mrb[10].mxu0 }
 0x133   : >> { %v816_v41 = vpop.f32.mrb[10].mxu1  ;;  %v819_v44 = vadd.f32 %v813_v35, %v749_v39  ;;  %v1317_v45 = vpop.f32.mrb[11].mxu0 }
 0x134   : >> { %v1325_v43 = vpop.f32.mrb[11].mxu1 }
 0x138   : >> { %v877_v47 = vpop.f32.mrb[12].mxu0 }
 0x139   : >> { %v953_v46 = vpop.f32.mrb[12].mxu1  ;;  %v883_v49 = vadd.f32 %v877_v47, %v819_v44  ;;  %v1332_v50 = vpop.f32.mrb[13].mxu0 }
 0x13a   : >> { %v1340_v48 = vpop.f32.mrb[13].mxu1  ;;  %v880_v52 = vpop.f32.mrb[14].mxu0 }
 0x13b   : >> { %v956_v51 = vpop.f32.mrb[14].mxu1  ;;  %v959_v54 = vadd.f32 %v953_v46, %v883_v49  ;;  %v1333_v55 = vpop.f32.mrb[15].mxu0 }
 0x13c   : >> { %v1341_v53 = vpop.f32.mrb[15].mxu1 }
 0x140   : >> { %v1023_v56 = vpop.f32.mrb[16].mxu0 }
 0x141   : >> { %v1029_v57 = vadd.f32 %v1023_v56, %v959_v54  ;;  %v1348_v58 = vpop.f32.mrb[17].mxu0  ;;  %400 = sbr.rel (!%p398_p2) target bundleno = 68 (0x44), region = 159 }
 0x142   : >> { %v1026_v59 = vpop.f32.mrb[18].mxu0 }
 0x143   : >> { %v1036_v60 = vadd.f32 %v1727_v36, %v1029_v57  ;;  %v1349_v61 = vpop.f32.mrb[19].mxu0 }
 0x145   : >> { %v1037_v62 = vmax.f32 %v1036_v60, 0.0 }
 0x147   : >> { %1040 = vst [vmem:[%s1039_s26] sm:$0x3] %v1037_v62 }
 0x148   : > { %1047 = sbr.rel (!%p1622_p9) target bundleno = 336 (0x150), region = 84 }
 0x149   : > { %s1352_s28 = smul.u32 (%p1622_p9), 6, %s1515_s17 }
 0x14b   : > { %s1049_s29 = sadd.s32 (%p1622_p9), %s1511_s16, %s1352_s28 }
 0x14c   : > { %s1247_s5 = sshll.u32 (%p1622_p9), %s1049_s29, 1 }
 0x14d   : > { %s1051_s9 = scalar_lea.vmem (%p1622_p9), %s1862_s3, %s1247_s5 }
 0x14e   : > { %v1067_v63 = vld [vmem:[%s1731_s12] sm:$0x3] (%p1622_p9)  ;;  %v1069_v0 = vld [vmem:[%s1731_s12 + $0x2] sm:$0x3] (%p1622_p9) }
 0x14f   : > { %1068 = vst [vmem:[%s1051_s9] sm:$0x3] %v1067_v63  ;;  %1070 = vst [vmem:[%s1051_s9 + $0x6] sm:$0x3] %v1069_v0 }
 0x150 PF: > { %s13_s20 = sadd.s32 1, %s1527_s20   ;;  %s1864_s12 = smov %s1499_s13 }
 0x151   : > { %p10_p3 = scmp.ge.s32.totalorder %s13_s20, 8   ;;  %s1865_s13 = smov %s1627_s4 }
 0x152   : > { %s1866_s14 = smov %s1507_s15  ;;  %s1867_s15 = smov %s1616_s27 }
 0x153   : > { %s1868_s16 = smov %s1519_s18  ;;  %s1869_s17 = smov %s1523_s19 }
 0x154   : > { %s1870_s18 = smov %s1873_s22  ;;  %s1871_s19 = smov %s1877_s23 }
 0x155   :  { %12 = sbr.rel (!%p10_p3) target bundleno = 5 (0x5), region = 170 }

// kernel: efficient_counter_forward.25
= control target key start
LH: loop header
LB: loop body
LE: loop exit
PB: predicated region body
PF: predicated region fallthrough
CT: control target
= control target key end

     0   :  { %s1924_s12 = smov 0   ;;  %s1926_s13 = smov 0   ;;  %s2299_s0 = inlined_call_operand.vmem [shape: bf16[2,4,4,128], index: 0, kind: input, shape index: {}]   ;;  %s2300_s1 = inlined_call_operand.vmem [shape: bf16[1152,128], index: 1, kind: input, shape index: {}]   ;;  %s2301_s2 = inlined_call_operand.vmem [shape: f32[1,128], index: 2, kind: input, shape index: {}]   ;;  %s2302_s3 = inlined_call_operand.vmem [shape: f32[2,2,2,128], index: 3, kind: output, shape index: {}]  }
   0x1   :  { %s1928_s14 = smov 0  }
   0x2 LB: > { %s25_s15 = sadd.s32 1, %s1892_s13  ;;  %p1405_p0 = scmp.ge.s32.totalorder %s1896_s14, 1  ;;  %s1896_s14 = sphi %s1928_s14, %s13_s14   ;;  %s1892_s13 = sphi %s1926_s13, %s2304_s13   ;;  %s1888_s12 = sphi %s1924_s12, %s2303_s12  }
   0x3   : > { %p27_p1 = scmp.ge.s32.totalorder %s25_s15, 2  ;;  %p168_p2 = scmp.lt.s32.totalorder %s1896_s14, 3 }
   0x5   : > { %s2306_s15 = smov (%p27_p1, %s25_s15), 0  ;;  %p169_p3 = pnand %p1405_p0, %p168_p2 }
   0x6   : > { %p202_p4 = scmp.lt.s32.totalorder (!%p169_p3), %s1888_s12, 1  ;;  %v1945_v0 = vld [vmem:[%s2301_s2] ss:$0 sm:$0xff] (!%p169_p3)  ;;  %s1957_s26 = smov (!%p169_p3), 0  }
   0x7   : > { %172 = sbr.rel (%p169_p3) target bundleno = 397 (0x18d), region = 32 }
   0xe   : > { %s2308_s12 = smov (!%p202_p4, %s1888_s12), 1 }
   0xf   : > { %s1501_s18 = sshll.u32 %s2308_s12, 3  ;;  %s1502_s19 = sshll.u32 %s2308_s12, 2 }
  0x10   : > { %s1950_s22 = scalar_lea.vmem %s2299_s0, %s1501_s18  ;;  %s1955_s25 = scalar_lea.vmem %s2302_s3, %s1502_s19 }
  0x11 LB: >> { %v1798_v1 = vld [vmem:[%s2300_s1 + $0x40] sm:$0xff]   ;;  %v1902_v2 = vmov 0.0   ;;  %v1800_v4 = vld [vmem:[%s2300_s1 + $0x48] sm:$0xff]   ;;  %vm1903_vm0 = vmmov 0   ;;  %v1802_v6 = vld [vmem:[%s2300_s1 + $0x50] sm:$0xff]   ;;  %s1410_s17 = sshll.u32 %s1900_s26, 1  ;;  %s1900_s26 = sphi %s1957_s26, %s229_s26  }
  0x12   : >> { %1584 = vmatprep.subr.bf16.mxu0 %v1902_v2  ;;  %1604 = vmatprep.subr.bf16.mxu1 %v1902_v2  ;;  %v1799_v3 = vld [vmem:[%s2300_s1] sm:$0xff]   ;;  %v1801_v5 = vld [vmem:[%s2300_s1 + $0x8] sm:$0xff]   ;;  %v1803_v7 = vld [vmem:[%s2300_s1 + $0x10] sm:$0xff]   ;;  %s2002_s20 = scalar_lea.vmem %s1950_s22, %s1410_s17  ;;  %s229_s26 = sadd.s32 1, %s1900_s26  }
  0x13   : >> { %1585 = vmatpush3.bf16.msra.mxu0 %v1798_v1  ;;  %1600 = vmatprep.mubr.msk.bf16.mxu0 %vm1903_vm0, %v1902_v2  ;;  %v1804_v8 = vld [vmem:[%s2300_s1 + $0x58] sm:$0xff]   ;;  %v1806_v10 = vld [vmem:[%s2300_s1 + $0x60] sm:$0xff]   ;;  %v1808_v13 = vld [vmem:[%s2300_s1 + $0x68] sm:$0xff]   ;;  %p226_p5 = scmp.ge.s32.totalorder %s229_s26, 2  }
  0x14   : >> { %1605 = vmatpush3.bf16.msra.mxu1 %v1799_v3  ;;  %1586 = vmatprep.subr.bf16.mxu0 %v1902_v2  ;;  %v1805_v9 = vld [vmem:[%s2300_s1 + $0x18] sm:$0xff]   ;;  %v1807_v11 = vld [vmem:[%s2300_s1 + $0x20] sm:$0xff]   ;;  %v1809_v14 = vld [vmem:[%s2300_s1 + $0x28] sm:$0xff]  }
  0x15   : >> { %1606 = vmatprep.subr.bf16.mxu1 %v1902_v2  ;;  %1620 = vmatprep.mubr.msk.bf16.mxu1 %vm1903_vm0, %v1902_v2  ;;  %v1411_v12 = vld.sshfl [vmem:[%s2002_s20] sm:$0x3 pattern:$0x76325410]  ;;  %v1810_v16 = vld [vmem:[%s2300_s1 + $0x70] sm:$0xff]   ;;  %v1812_v20 = vld [vmem:[%s2300_s1 + $0x78] sm:$0xff]  }
  0x16   : >> { %v277_v15 = vshll.u32 %v1411_v12, 16  ;;  %v1811_v17 = vld [vmem:[%s2300_s1 + $0x30] sm:$0xff]   ;;  %v275_v18 = vshrl.u32 %v1411_v12, 16  ;;  %v1813_v21 = vld [vmem:[%s2300_s1 + $0x38] sm:$0xff]   ;;  %v232_v23 = vld [vmem:[%s2002_s20] sm:$0x1] }
  0x17   : >> { %1587 = vmatpush3.bf16.msra.mxu0 %v1800_v4  ;;  %v1814_v24 = vld [vmem:[%s2300_s1 + $0x80] sm:$0xff]   ;;  %v1816_v26 = vld [vmem:[%s2300_s1 + $0x88] sm:$0xff]   ;;  %v1818_v28 = vld [vmem:[%s2300_s1 + $0x90] sm:$0xff]  }
  0x18   : >> { %1607 = vmatpush3.bf16.msra.mxu1 %v1801_v5  ;;  %1588 = vmatprep.subr.bf16.mxu0 %v1902_v2  ;;  %v279_v19 = vrot.slane %v277_v15, 1  ;;  %v1815_v25 = vld [vmem:[%s2300_s1 + $0xc0] sm:$0xff]   ;;  %v1817_v27 = vld [vmem:[%s2300_s1 + $0xc8] sm:$0xff]   ;;  %v1819_v29 = vld [vmem:[%s2300_s1 + $0xd0] sm:$0xff]  }
  0x19   : >> { %1608 = vmatprep.subr.bf16.mxu1 %v1902_v2  ;;  %v1820_v30 = vld [vmem:[%s2300_s1 + $0x98] sm:$0xff]   ;;  %v1822_v32 = vld [vmem:[%s2300_s1 + $0xa0] sm:$0xff]   ;;  %v1824_v34 = vld [vmem:[%s2300_s1 + $0xa8] sm:$0xff]  }
  0x1a   : >> { %v280_v22 = vor.u32 %v279_v19, %v275_v18  ;;  %v1821_v31 = vld [vmem:[%s2300_s1 + $0xd8] sm:$0xff]   ;;  %v1823_v33 = vld [vmem:[%s2300_s1 + $0xe0] sm:$0xff]   ;;  %v1825_v35 = vld [vmem:[%s2300_s1 + $0xe8] sm:$0xff]  }
  0x1b   : >> { %1589 = vmatpush3.bf16.msra.mxu0 %v1802_v6  ;;  %v1826_v36 = vld [vmem:[%s2300_s1 + $0xb0] sm:$0xff]   ;;  %v1428_v38 = vld.sshfl [vmem:[%s2002_s20] sm:$0x2 pattern:$0x76325410]  ;;  %v1828_v39 = vld [vmem:[%s2300_s1 + $0xb8] sm:$0xff]  }
  0x1c   : >> { %1609 = vmatpush3.bf16.msra.mxu1 %v1803_v7  ;;  %1590 = vmatprep.subr.bf16.mxu0 %v1902_v2  ;;  %v1827_v37 = vld [vmem:[%s2300_s1 + $0xf0] sm:$0xff]   ;;  %v1829_v40 = vld [vmem:[%s2300_s1 + $0xf8] sm:$0xff]   ;;  %v483_v41 = vrot.slane %v1428_v38, 1  ;;  %v1830_v42 = vld [vmem:[%s2300_s1 + $0x100] sm:$0xff]  }
  0x1d   : >> { %1610 = vmatprep.subr.bf16.mxu1 %v1902_v2  ;;  %v1831_v43 = vld [vmem:[%s2300_s1 + $0x140] sm:$0xff]   ;;  %v1832_v45 = vld [vmem:[%s2300_s1 + $0x108] sm:$0xff]   ;;  %v1834_v47 = vld [vmem:[%s2300_s1 + $0x110] sm:$0xff]  }
  0x1e   : >> { %v1438_v44 = vld [vmem:[%s2002_s20 + $0x2] sm:$0x1]  ;;  %v1833_v46 = vld [vmem:[%s2300_s1 + $0x148] sm:$0xff]   ;;  %v1835_v48 = vld [vmem:[%s2300_s1 + $0x150] sm:$0xff]  }
  0x1f   : >> { %1591 = vmatpush3.bf16.msra.mxu0 %v1804_v8  ;;  %v1836_v49 = vld [vmem:[%s2300_s1 + $0x118] sm:$0xff]   ;;  %v1838_v51 = vld [vmem:[%s2300_s1 + $0x120] sm:$0xff]   ;;  %v1840_v53 = vld [vmem:[%s2300_s1 + $0x128] sm:$0xff]  }
  0x20   : >> { %1611 = vmatpush3.bf16.msra.mxu1 %v1805_v9  ;;  %1592 = vmatprep.subr.bf16.mxu0 %v1902_v2  ;;  %v1837_v50 = vld [vmem:[%s2300_s1 + $0x158] sm:$0xff]   ;;  %v1839_v52 = vld [vmem:[%s2300_s1 + $0x160] sm:$0xff]   ;;  %v1841_v55 = vld [vmem:[%s2300_s1 + $0x168] sm:$0xff]  }
  0x21   : >> { %1612 = vmatprep.subr.bf16.mxu1 %v1902_v2  ;;  %v1448_v54 = vld.sshfl [vmem:[%s2002_s20 + $0x2] sm:$0x3 pattern:$0x76325410]  ;;  %v1842_v57 = vld [vmem:[%s2300_s1 + $0x130] sm:$0xff]   ;;  %v1844_v61 = vld [vmem:[%s2300_s1 + $0x138] sm:$0xff]  }
  0x22   : >> { %v711_v56 = vshll.u32 %v1448_v54, 16  ;;  %v1843_v58 = vld [vmem:[%s2300_s1 + $0x170] sm:$0xff]   ;;  %v709_v59 = vshrl.u32 %v1448_v54, 16  ;;  %v1845_v62 = vld [vmem:[%s2300_s1 + $0x178] sm:$0xff]   ;;  %v1846_v3 = vld [vmem:[%s2300_s1 + $0x180] sm:$0xff]  }
  0x23   : >> { %1593 = vmatpush3.bf16.msra.mxu0 %v1806_v10  ;;  %v1458_v63 = vld.sshfl [vmem:[%s2002_s20 + $0x2] sm:$0x2 pattern:$0x76325410]  ;;  %v1848_v6 = vld [vmem:[%s2300_s1 + $0x188] sm:$0xff]   ;;  %v1850_v8 = vld [vmem:[%s2300_s1 + $0x190] sm:$0xff]  }
  0x24   : >> { %1613 = vmatpush3.bf16.msra.mxu1 %v1807_v11  ;;  %1594 = vmatprep.subr.bf16.mxu0 %v1902_v2  ;;  %v713_v60 = vrot.slane %v711_v56, 1  ;;  %v830_v4 = vrot.slane %v1458_v63, 1  ;;  %v1847_v5 = vld [vmem:[%s2300_s1 + $0x1c0] sm:$0xff]   ;;  %v1849_v7 = vld [vmem:[%s2300_s1 + $0x1c8] sm:$0xff]   ;;  %v1851_v9 = vld [vmem:[%s2300_s1 + $0x1d0] sm:$0xff]  }
  0x25   : >> { %1614 = vmatprep.subr.bf16.mxu1 %v1902_v2  ;;  %v1852_v10 = vld [vmem:[%s2300_s1 + $0x198] sm:$0xff]   ;;  %v1854_v12 = vld [vmem:[%s2300_s1 + $0x1a0] sm:$0xff]   ;;  %v1857_v15 = vld [vmem:[%s2300_s1 + $0x1e8] sm:$0xff]  }
  0x26   : >> { %v714_v1 = vor.u32 %v713_v60, %v709_v59  ;;  %v1853_v11 = vld [vmem:[%s2300_s1 + $0x1d8] sm:$0xff]   ;;  %v1859_v19 = vld [vmem:[%s2300_s1 + $0x1f0] sm:$0xff]  }
  0x27   : >> { %1595 = vmatpush3.bf16.msra.mxu0 %v1808_v13  ;;  %v1855_v13 = vld [vmem:[%s2300_s1 + $0x1e0] sm:$0xff]  }
  0x28   : >> { %1615 = vmatpush3.bf16.msra.mxu1 %v1809_v14  ;;  %1596 = vmatprep.subr.bf16.mxu0 %v1902_v2  ;;  %v1856_v14 = vld [vmem:[%s2300_s1 + $0x1a8] sm:$0xff]  }
  0x29   : >> { %1616 = vmatprep.subr.bf16.mxu1 %v1902_v2 }
  0x2b   : >> { %1597 = vmatpush3.bf16.msra.mxu0 %v1810_v16  ;;  %v1478_v16 = vld.sshfl [vmem:[%s2002_s20 + $0x4] sm:$0x3 pattern:$0x76325410] }
  0x2c   : >> { %1617 = vmatpush3.bf16.msra.mxu1 %v1811_v17  ;;  %1598 = vmatprep.subr.bf16.mxu0 %v1902_v2  ;;  %v1858_v17 = vld [vmem:[%s2300_s1 + $0x1b0] sm:$0xff]   ;;  %v1058_v18 = vshll.u32 %v1478_v16, 16 }
  0x2d   : >> { %1618 = vmatprep.subr.bf16.mxu1 %v1902_v2 }
  0x2f   : >> { %1599 = vmatpush3.bf16.msra.mxu0 %v1812_v20  ;;  %v1860_v20 = vld [vmem:[%s2300_s1 + $0x1b8] sm:$0xff]  }
  0x30   : >> { %1619 = vmatpush3.bf16.msra.mxu1 %v1813_v21  ;;  %1624 = vmatprep.subr.bf16.mxu0 %v1902_v2  ;;  %v1056_v21 = vshrl.u32 %v1478_v16, 16 }
  0x31   : >> { %1644 = vmatprep.subr.bf16.mxu1 %v1902_v2 }
  0x32   : >> { %1601 = vmatmul.mubr.bf16.vlgmr.msra.gmra.mrb[0].mxu0 %v280_v22  ;;  %v1060_v22 = vrot.slane %v1058_v18, 1 }
  0x33   : >> { %1621 = vmatmul.mubr.bf16.vlgmr.msra.gmra.mrb[0].mxu1 %v232_v23  ;;  %1625 = vmatpush3.bf16.msra.mxu0 %v1814_v24  ;;  %v1861_v23 = vld [vmem:[%s2300_s1 + $0x1f8] sm:$0xff]   ;;  %v1468_v24 = vld [vmem:[%s2002_s20 + $0x4] sm:$0x1] }
  0x34   : >> { %1645 = vmatpush3.bf16.msra.mxu1 %v1815_v25  ;;  %1626 = vmatprep.subr.bf16.mxu0 %v1902_v2  ;;  %v1862_v25 = vld [vmem:[%s2300_s1 + $0x200] sm:$0xff]  }
  0x35   : >> { %1646 = vmatprep.subr.bf16.mxu1 %v1902_v2  ;;  %1640 = vmatprep.mubr.msk.bf16.mxu0 %vm1903_vm0, %v1902_v2 }
  0x36   : >> { %1660 = vmatprep.mubr.msk.bf16.mxu1 %vm1903_vm0, %v1902_v2 }
  0x37   : >> { %1627 = vmatpush3.bf16.msra.mxu0 %v1816_v26  ;;  %v1061_v26 = vor.u32 %v1060_v22, %v1056_v21 }
  0x38   : >> { %1647 = vmatpush3.bf16.msra.mxu1 %v1817_v27  ;;  %1628 = vmatprep.subr.bf16.mxu0 %v1902_v2  ;;  %v1863_v27 = vld [vmem:[%s2300_s1 + $0x208] sm:$0xff]  }
  0x39   : >> { %1648 = vmatprep.subr.bf16.mxu1 %v1902_v2 }
  0x3b   : >> { %1629 = vmatpush3.bf16.msra.mxu0 %v1818_v28  ;;  %v1864_v28 = vld [vmem:[%s2300_s1 + $0x210] sm:$0xff]  }
  0x3c   : >> { %1649 = vmatpush3.bf16.msra.mxu1 %v1819_v29  ;;  %1630 = vmatprep.subr.bf16.mxu0 %v1902_v2  ;;  %v1865_v29 = vld [vmem:[%s2300_s1 + $0x218] sm:$0xff]  }
  0x3d   : >> { %1650 = vmatprep.subr.bf16.mxu1 %v1902_v2 }
  0x3f   : >> { %1631 = vmatpush3.bf16.msra.mxu0 %v1820_v30  ;;  %v1866_v30 = vld [vmem:[%s2300_s1 + $0x220] sm:$0xff]  }
  0x40   : >> { %1651 = vmatpush3.bf16.msra.mxu1 %v1821_v31  ;;  %1632 = vmatprep.subr.bf16.mxu0 %v1902_v2  ;;  %v1867_v31 = vld [vmem:[%s2300_s1 + $0x228] sm:$0xff]  }
  0x41   : >> { %1652 = vmatprep.subr.bf16.mxu1 %v1902_v2 }
  0x43   : >> { %1633 = vmatpush3.bf16.msra.mxu0 %v1822_v32  ;;  %v1868_v32 = vld [vmem:[%s2300_s1 + $0x230] sm:$0xff]  }
  0x44   : >> { %1653 = vmatpush3.bf16.msra.mxu1 %v1823_v33  ;;  %1634 = vmatprep.subr.bf16.mxu0 %v1902_v2  ;;  %v1869_v33 = vld [vmem:[%s2300_s1 + $0x238] sm:$0xff]  }
  0x45   : >> { %1654 = vmatprep.subr.bf16.mxu1 %v1902_v2 }
  0x47   : >> { %1635 = vmatpush3.bf16.msra.mxu0 %v1824_v34  ;;  %v1488_v34 = vld.sshfl [vmem:[%s2002_s20 + $0x4] sm:$0x2 pattern:$0x76325410]  ;;  %s1277_s20 = scalar_lea.vmem %s1955_s25, %s1410_s17 }
  0x48   : >> { %1655 = vmatpush3.bf16.msra.mxu1 %v1825_v35  ;;  %1636 = vmatprep.subr.bf16.mxu0 %v1902_v2  ;;  %v1177_v35 = vrot.slane %v1488_v34, 1 }
  0x49   : >> { %1656 = vmatprep.subr.bf16.mxu1 %v1902_v2 }
  0x4b   : >> { %1637 = vmatpush3.bf16.msra.mxu0 %v1826_v36 }
  0x4c   : >> { %1657 = vmatpush3.bf16.msra.mxu1 %v1827_v37  ;;  %1638 = vmatprep.subr.bf16.mxu0 %v1902_v2 }
  0x4d   : >> { %1658 = vmatprep.subr.bf16.mxu1 %v1902_v2 }
  0x4f   : >> { %1639 = vmatpush3.bf16.msra.mxu0 %v1828_v39 }
  0x50   : >> { %1659 = vmatpush3.bf16.msra.mxu1 %v1829_v40  ;;  %1664 = vmatprep.subr.bf16.mxu0 %v1902_v2 }
  0x51   : >> { %1684 = vmatprep.subr.bf16.mxu1 %v1902_v2 }
  0x52   : >> { %1641 = vmatmul.mubr.bf16.vlgmr.msra.gmra.mrb[4].mxu0 %v483_v41 }
  0x53   : >> { %1665 = vmatpush3.bf16.msra.mxu0 %v1830_v42  ;;  %1661 = vmatmul.mubr.bf16.vlgmr.msra.gmra.mrb[4].mxu1 %v1438_v44 }
  0x54   : >> { %1685 = vmatpush3.bf16.msra.mxu1 %v1831_v43  ;;  %1666 = vmatprep.subr.bf16.mxu0 %v1902_v2 }
  0x55   : >> { %1686 = vmatprep.subr.bf16.mxu1 %v1902_v2  ;;  %1680 = vmatprep.mubr.msk.bf16.mxu0 %vm1903_vm0, %v1902_v2 }
  0x56   : >> { %1700 = vmatprep.mubr.msk.bf16.mxu1 %vm1903_vm0, %v1902_v2 }
  0x57   : >> { %1667 = vmatpush3.bf16.msra.mxu0 %v1832_v45 }
  0x58   : >> { %1687 = vmatpush3.bf16.msra.mxu1 %v1833_v46  ;;  %1668 = vmatprep.subr.bf16.mxu0 %v1902_v2 }
  0x59   : >> { %1688 = vmatprep.subr.bf16.mxu1 %v1902_v2 }
  0x5b   : >> { %1669 = vmatpush3.bf16.msra.mxu0 %v1834_v47 }
  0x5c   : >> { %1689 = vmatpush3.bf16.msra.mxu1 %v1835_v48  ;;  %1670 = vmatprep.subr.bf16.mxu0 %v1902_v2 }
  0x5d   : >> { %1690 = vmatprep.subr.bf16.mxu1 %v1902_v2 }
  0x5f   : >> { %1671 = vmatpush3.bf16.msra.mxu0 %v1836_v49 }
  0x60   : >> { %1691 = vmatpush3.bf16.msra.mxu1 %v1837_v50  ;;  %1672 = vmatprep.subr.bf16.mxu0 %v1902_v2 }
  0x61   : >> { %1692 = vmatprep.subr.bf16.mxu1 %v1902_v2 }
  0x63   : >> { %1673 = vmatpush3.bf16.msra.mxu0 %v1838_v51 }
  0x64   : >> { %1693 = vmatpush3.bf16.msra.mxu1 %v1839_v52  ;;  %1674 = vmatprep.subr.bf16.mxu0 %v1902_v2 }
  0x65   : >> { %1694 = vmatprep.subr.bf16.mxu1 %v1902_v2 }
  0x67   : >> { %1675 = vmatpush3.bf16.msra.mxu0 %v1840_v53 }
  0x68   : >> { %1695 = vmatpush3.bf16.msra.mxu1 %v1841_v55  ;;  %1676 = vmatprep.subr.bf16.mxu0 %v1902_v2 }
  0x69   : >> { %1696 = vmatprep.subr.bf16.mxu1 %v1902_v2 }
  0x6b   : >> { %1677 = vmatpush3.bf16.msra.mxu0 %v1842_v57 }
  0x6c   : >> { %1697 = vmatpush3.bf16.msra.mxu1 %v1843_v58  ;;  %1678 = vmatprep.subr.bf16.mxu0 %v1902_v2 }
  0x6d   : >> { %1698 = vmatprep.subr.bf16.mxu1 %v1902_v2 }
  0x6f   : >> { %1679 = vmatpush3.bf16.msra.mxu0 %v1844_v61 }
  0x70   : >> { %1699 = vmatpush3.bf16.msra.mxu1 %v1845_v62  ;;  %1704 = vmatprep.subr.bf16.mxu0 %v1902_v2 }
  0x71   : >> { %1724 = vmatprep.subr.bf16.mxu1 %v1902_v2 }
  0x72   : >> { %1681 = vmatmul.mubr.bf16.vlgmr.msra.gmra.mrb[8].mxu0 %v714_v1 }
  0x73   : >> { %1705 = vmatpush3.bf16.msra.mxu0 %v1846_v3  ;;  %1701 = vmatmul.mubr.bf16.vlgmr.msra.gmra.mrb[8].mxu1 %v830_v4 }
  0x74   : >> { %1725 = vmatpush3.bf16.msra.mxu1 %v1847_v5  ;;  %1706 = vmatprep.subr.bf16.mxu0 %v1902_v2 }
  0x75   : >> { %1726 = vmatprep.subr.bf16.mxu1 %v1902_v2  ;;  %1720 = vmatprep.mubr.msk.bf16.mxu0 %vm1903_vm0, %v1902_v2 }
  0x76   : >> { %1740 = vmatprep.mubr.msk.bf16.mxu1 %vm1903_vm0, %v1902_v2 }
  0x77   : >> { %1707 = vmatpush3.bf16.msra.mxu0 %v1848_v6 }
  0x78   : >> { %1727 = vmatpush3.bf16.msra.mxu1 %v1849_v7  ;;  %1708 = vmatprep.subr.bf16.mxu0 %v1902_v2 }
  0x79   : >> { %1728 = vmatprep.subr.bf16.mxu1 %v1902_v2 }
  0x7b   : >> { %1709 = vmatpush3.bf16.msra.mxu0 %v1850_v8 }
  0x7c   : >> { %1729 = vmatpush3.bf16.msra.mxu1 %v1851_v9  ;;  %1710 = vmatprep.subr.bf16.mxu0 %v1902_v2 }
  0x7d   : >> { %1730 = vmatprep.subr.bf16.mxu1 %v1902_v2 }
  0x7f   : >> { %1711 = vmatpush3.bf16.msra.mxu0 %v1852_v10 }
  0x80   : >> { %1731 = vmatpush3.bf16.msra.mxu1 %v1853_v11  ;;  %1712 = vmatprep.subr.bf16.mxu0 %v1902_v2 }
  0x81   : >> { %1732 = vmatprep.subr.bf16.mxu1 %v1902_v2 }
  0x83   : >> { %1713 = vmatpush3.bf16.msra.mxu0 %v1854_v12 }
  0x84   : >> { %1733 = vmatpush3.bf16.msra.mxu1 %v1855_v13  ;;  %1714 = vmatprep.subr.bf16.mxu0 %v1902_v2 }
  0x85   : >> { %1734 = vmatprep.subr.bf16.mxu1 %v1902_v2 }
  0x87   : >> { %1715 = vmatpush3.bf16.msra.mxu0 %v1856_v14 }
  0x88   : >> { %1735 = vmatpush3.bf16.msra.mxu1 %v1857_v15  ;;  %1716 = vmatprep.subr.bf16.mxu0 %v1902_v2 }
  0x89   : >> { %1736 = vmatprep.subr.bf16.mxu1 %v1902_v2 }
  0x8b   : >> { %1717 = vmatpush3.bf16.msra.mxu0 %v1858_v17 }
  0x8c   : >> { %1737 = vmatpush3.bf16.msra.mxu1 %v1859_v19  ;;  %1718 = vmatprep.subr.bf16.mxu0 %v1902_v2 }
  0x8d   : >> { %1738 = vmatprep.subr.bf16.mxu1 %v1902_v2 }
  0x8f   : >> { %1719 = vmatpush3.bf16.msra.mxu0 %v1860_v20 }
  0x90   : >> { %1739 = vmatpush3.bf16.msra.mxu1 %v1861_v23  ;;  %1744 = vmatprep.subr.bf16.mxu0 %v1902_v2 }
  0x92   : >> { %1721 = vmatmul.mubr.bf16.vlgmr.msra.gmra.mrb[12].mxu0 %v1468_v24 }
  0x93   : >> { %1745 = vmatpush3.bf16.msra.mxu0 %v1862_v25  ;;  %1741 = vmatmul.mubr.bf16.vlgmr.msra.gmra.mrb[12].mxu1 %v1061_v26 }
  0x94   : >> { %1746 = vmatprep.subr.bf16.mxu0 %v1902_v2  ;;  %1760 = vmatprep.mubr.msk.bf16.mxu0 %vm1903_vm0, %v1902_v2 }
  0x97   : >> { %1747 = vmatpush3.bf16.msra.mxu0 %v1863_v27 }
  0x98   : >> { %1748 = vmatprep.subr.bf16.mxu0 %v1902_v2 }
  0x9b   : >> { %1749 = vmatpush3.bf16.msra.mxu0 %v1864_v28 }
  0x9c   : >> { %1750 = vmatprep.subr.bf16.mxu0 %v1902_v2 }
  0x9f   : >> { %1751 = vmatpush3.bf16.msra.mxu0 %v1865_v29 }
  0xa0   : >> { %1752 = vmatprep.subr.bf16.mxu0 %v1902_v2 }
  0xa3   : >> { %1753 = vmatpush3.bf16.msra.mxu0 %v1866_v30 }
  0xa4   : >> { %1754 = vmatprep.subr.bf16.mxu0 %v1902_v2 }
  0xa7   : >> { %1755 = vmatpush3.bf16.msra.mxu0 %v1867_v31 }
  0xa8   : >> { %1756 = vmatprep.subr.bf16.mxu0 %v1902_v2 }
  0xab   : >> { %1757 = vmatpush3.bf16.msra.mxu0 %v1868_v32 }
  0xac   : >> { %1758 = vmatprep.subr.bf16.mxu0 %v1902_v2 }
  0xaf   : >> { %1759 = vmatpush3.bf16.msra.mxu0 %v1869_v33 }
  0xb2   : >> { %1761 = vmatmul.mubr.bf16.vlgmr.msra.gmra.mrb[16].mxu0 %v1177_v35 }
 0x105   : >> { %v364_v36 = vpop.f32.mrb[0].mxu0 }
 0x106   : >> { %v1602_v37 = vpop.f32.mrb[1].mxu0  ;;  %v452_v38 = vpop.f32.mrb[0].mxu1 }
 0x107   : >> { %v453_v39 = vadd.f32 %v452_v38, %v364_v36  ;;  %v367_v40 = vpop.f32.mrb[2].mxu0  ;;  %v1622_v41 = vpop.f32.mrb[1].mxu1 }
 0x108   : >> { %v1603_v42 = vpop.f32.mrb[3].mxu0  ;;  %v455_v43 = vpop.f32.mrb[2].mxu1 }
 0x109   : >> { %v1623_v44 = vpop.f32.mrb[3].mxu1 }
 0x125   : >> { %v567_v45 = vpop.f32.mrb[4].mxu0 }
 0x126   : >> { %v573_v46 = vadd.f32 %v567_v45, %v453_v39  ;;  %v1642_v47 = vpop.f32.mrb[5].mxu0  ;;  %v676_v48 = vpop.f32.mrb[4].mxu1 }
 0x127   : >> { %v570_v49 = vpop.f32.mrb[6].mxu0  ;;  %v1662_v50 = vpop.f32.mrb[5].mxu1 }
 0x128   : >> { %v682_v51 = vadd.f32 %v676_v48, %v573_v46  ;;  %v1643_v2 = vpop.f32.mrb[7].mxu0  ;;  %v679_v52 = vpop.f32.mrb[6].mxu1 }
 0x129   : >> { %v1663_v53 = vpop.f32.mrb[7].mxu1 }
 0x145   : >> { %v798_v54 = vpop.f32.mrb[8].mxu0 }
 0x146   : >> { %v804_v55 = vadd.f32 %v798_v54, %v682_v51  ;;  %v1682_v56 = vpop.f32.mrb[9].mxu0  ;;  %v914_v57 = vpop.f32.mrb[8].mxu1 }
 0x147   : >> { %v801_v58 = vpop.f32.mrb[10].mxu0  ;;  %v1702_v59 = vpop.f32.mrb[9].mxu1 }
 0x148   : >> { %v920_v60 = vadd.f32 %v914_v57, %v804_v55  ;;  %v1683_v61 = vpop.f32.mrb[11].mxu0  ;;  %v917_v62 = vpop.f32.mrb[10].mxu1 }
 0x149   : >> { %v1703_v63 = vpop.f32.mrb[11].mxu1 }
 0x165   : >> { %v1023_v1 = vpop.f32.mrb[12].mxu0 }
 0x166   : >> { %v1029_v3 = vadd.f32 %v1023_v1, %v920_v60  ;;  %v1722_v4 = vpop.f32.mrb[13].mxu0  ;;  %v1145_v5 = vpop.f32.mrb[12].mxu1 }
 0x167   : >> { %v1026_v6 = vpop.f32.mrb[14].mxu0  ;;  %v1742_v7 = vpop.f32.mrb[13].mxu1 }
 0x168   : >> { %v1151_v8 = vadd.f32 %v1145_v5, %v1029_v3  ;;  %v1723_v9 = vpop.f32.mrb[15].mxu0  ;;  %v1148_v10 = vpop.f32.mrb[14].mxu1 }
 0x169   : >> { %v1743_v11 = vpop.f32.mrb[15].mxu1 }
 0x185   : >> { %v1261_v12 = vpop.f32.mrb[16].mxu0 }
 0x186   : >> { %v1267_v13 = vadd.f32 %v1261_v12, %v1151_v8  ;;  %v1762_v14 = vpop.f32.mrb[17].mxu0  ;;  %228 = sbr.rel (!%p226_p5) target bundleno = 17 (0x11), region = 79 }
 0x187   : >> { %v1264_v15 = vpop.f32.mrb[18].mxu0 }
 0x188   : >> { %v1274_v16 = vadd.f32 %v1945_v0, %v1267_v13  ;;  %v1763_v17 = vpop.f32.mrb[19].mxu0 }
 0x18a   : >> { %v1275_v18 = vmax.f32 %v1274_v16, 0.0 }
 0x18c   : >> { %1278 = vst [vmem:[%s1277_s20] sm:$0x3] %v1275_v18 }
 0x18d PF: > { %s13_s14 = sadd.s32 1, %s1896_s14   ;;  %s2303_s12 = smov %s1892_s13 }
 0x18e   : > { %p10_p6 = scmp.ge.s32.totalorder %s13_s14, 4   ;;  %s2304_s13 = smov %s2306_s15 }
 0x190   :  { %12 = sbr.rel (!%p10_p6) target bundleno = 2 (0x2), region = 90 }

// kernel: efficient_counter_forward.26
= control target key start
LH: loop header
LB: loop body
LE: loop exit
PB: predicated region body
PF: predicated region fallthrough
CT: control target
= control target key end

     0   :  { %v146_v0 = vmov 0.0   ;;  %vm147_vm0 = vmmov 0   ;;  %vm54_vm1 = vcmask 523264   ;;  %s189_s1 = inlined_call_operand.vmem [shape: bf16[64,128], index: 1, kind: input, shape index: {}]   ;;  %s190_s0 = inlined_call_operand.vmem [shape: bf16[8,64], index: 0, kind: input, shape index: {}]   ;;  %s191_s2 = inlined_call_operand.vmem [shape: f32[1,128], index: 2, kind: input, shape index: {}]   ;;  %s192_s3 = inlined_call_operand.vmem [shape: f32[8,128], index: 3, kind: output, shape index: {}]  }
   0x1   :  { %128 = vmatprep.subr.bf16.mxu0 %v146_v0  ;;  %v142_v1 = vld [vmem:[%s189_s1] sm:$0xff]   ;;  %136 = vmatprep.mubr.msk.bf16.mxu0 %vm147_vm0, %v146_v0  ;;  %v143_v2 = vld [vmem:[%s189_s1 + $0x8] sm:$0xff]   ;;  %v144_v3 = vld [vmem:[%s189_s1 + $0x10] sm:$0xff]  }
   0x2   :  { %129 = vmatpush3.bf16.msra.mxu0 %v142_v1  ;;  %v145_v4 = vld [vmem:[%s189_s1 + $0x18] sm:$0xff]   ;;  %v21_v5 = vld [vmem:[%s190_s0] sm:$0xf] }
   0x3   :  { %130 = vmatprep.subr.bf16.mxu0 %v146_v0  ;;  %v122_v6 = vld [vmem:[%s191_s2] ss:$0 sm:$0xff] }
   0x6   :  { %131 = vmatpush3.bf16.msra.mxu0 %v143_v2 }
   0x7   :  { %132 = vmatprep.subr.bf16.mxu0 %v146_v0 }
   0xa   :  { %133 = vmatpush3.bf16.msra.mxu0 %v144_v3 }
   0xb   :  { %134 = vmatprep.subr.bf16.mxu0 %v146_v0 }
   0xe   :  { %135 = vmatpush3.bf16.msra.mxu0 %v145_v4 }
  0x11   :  { %137 = vmatmul.mubr.msk.bf16.vlgmr.msra.gmra.mrb[0].mxu0 %vm54_vm1, %v21_v5 }
  0xe4   :  { %v92_v7 = vpop.f32.mrb[0].mxu0 }
  0xe5   :  { %v111_v8 = vadd.f32 %v122_v6, %v92_v7  ;;  %v138_v9 = vpop.f32.mrb[1].mxu0 }
  0xe6   :  { %v95_v10 = vpop.f32.mrb[2].mxu0 }
  0xe7   :  { %112 = vst [vmem:[%s192_s3] sm:$0xff] %v111_v8  ;;  %v139_v11 = vpop.f32.mrb[3].mxu0 }

// kernel: efficient_counter_forward.27
= control target key start
LH: loop header
LB: loop body
LE: loop exit
PB: predicated region body
PF: predicated region fallthrough
CT: control target
= control target key end

     0   :  { %s469_s12 = smov 0   ;;  %s499_s0 = inlined_call_operand.vmem [shape: f32[6,2,2], index: 0, kind: input, shape index: {}]   ;;  %s500_s1 = inlined_call_operand.vmem [shape: f32[16,2], index: 1, kind: input, shape index: {}]   ;;  %s501_s2 = inlined_call_operand.vmem [shape: f32[2,16], index: 2, kind: input, shape index: {}]   ;;  %s502_s3 = inlined_call_operand.vmem [shape: f32[6,16,16], index: 3, kind: output, shape index: {}]  }
   0x1 LB: > { %s400_s13 = sadd.s32 4294967295, %s447_s12   ;;  %p404_p0 = scmp.ge.s32.totalorder %s447_s12, 1  ;;  %s447_s12 = sphi %s469_s12, %s13_s12  }
   0x2   : > { %p136_p1 = scmp.lt.s32.totalorder %s447_s12, 7 }
   0x4   : > { %p137_p2 = pnand %p404_p0, %p136_p1 }
   0x5   : > { %p159_p3 = scmp.lt.s32.totalorder (!%p137_p2), %s400_s13, 5  ;;  %v168_v0 = vld [vmem:[%s500_s1] sm:$0xff] (!%p137_p2)  ;;  %vm171_vm0 = vcmask (!%p137_p2), 15360   ;;  %vm178_vm1 = vcmask (!%p137_p2), 1041408   ;;  %v169_v2 = vld [vmem:[%s500_s1 + $0x8] sm:$0xff] (!%p137_p2)  ;;  %vm342_vm2 = vcmask (!%p137_p2), 130048  }
   0x6   : > { %140 = sbr.rel (%p137_p2) target bundleno = 447 (0x1bf), region = 32  ;;  %425 = vmatprep.mubr.msk.f32.mxu0 (!%p137_p2), %vm171_vm0, %v168_v0  ;;  %v257_v3 = vld [vmem:[%s501_s2] sm:$0x3] (!%p137_p2) }
   0x7   : > { %428 = vmatprep.subr.msk.mxu1 (!%p137_p2), %vm178_vm1, %v257_v3 }
   0x8   : > { %429 = vmatpush3.msk.msra.mxu1 (!%p137_p2), %vm178_vm1, %v257_v3 }
   0xd   : > { %s504_s13 = smov (!%p159_p3, %s400_s13), 5 }
   0xe   : > { %s405_s16 = sshll.u32 %s504_s13, 1  ;;  %s416_s24 = sshll.u32 %s504_s13, 4 }
   0xf   : > { %s162_s19 = scalar_lea.vmem %s499_s0, %s405_s16  ;;  %s167_s27 = scalar_lea.vmem %s502_s3, %s416_s24 }
  0x10   : > { %v170_v1 = vld [vmem:[%s162_s19] sm:$0x3] }
  0x11   : > { %423 = vmatprep.subr.msk.mxu0 %vm178_vm1, %v170_v1 }
  0x12   : > { %424 = vmatpush3.msk.msra.mxu0 %vm178_vm1, %v170_v1 }
  0x13   : > { %426 = vmatmul.mubr.msk.f32.vlgmr.msra.gmra.mrb[0].mxu0 %vm171_vm0, %v169_v2 }
  0xe6   : > { %v427_v4 = vpop.f32.mrb[0].mxu0 }
  0xe7   : > { %v248_v5 = vpop.f32.mrb[1].mxu0 }
  0xe8   : > { %430 = vmatprep.mubr.msk.f32.mxu1 %vm171_vm0, %v248_v5 }
  0xe9   : > { %431 = vmatmul.mubr.msk.f32.vlgmr.msra.gmra.mrb[0].mxu1 %vm171_vm0, %v427_v4 }
 0x1bc   : > { %v432_v6 = vpop.f32.mrb[0].mxu1 }
 0x1bd   : > { %344 = vst.msk [vmem:[%s167_s27 + $0x8] sm:$0xff] %vm342_vm2, %v432_v6  ;;  %v333_v7 = vpop.f32.mrb[1].mxu1 }
 0x1be   : > { %343 = vst.msk [vmem:[%s167_s27] sm:$0xff] %vm342_vm2, %v333_v7 }
 0x1bf PF: > { %s13_s12 = sadd.s32 1, %s447_s12  }
 0x1c0   : > { %p10_p4 = scmp.ge.s32.totalorder %s13_s12, 8  }
 0x1c2   :  { %12 = sbr.rel (!%p10_p4) target bundleno = 1 (0x1), region = 62 }

</bundles_post_ra>
